<compile_context>
chip_gen: v7x
topology: tpu7x:2x2x1
jax: 0.10.0
libtpu: 0.0.40
codegen_flags: <defaults>
</compile_context>

<pallas_src>
import functools
import math

import jax
import jax.numpy as jnp
from jax.experimental import pallas as pl
from jax.experimental.pallas import tpu as pltpu

H = 64     # LSTM hidden size (matches the PyTorch spec)
HP = 128   # per-gate lane-padded width (vreg aligned); padded lanes stay zero


def _lstm_fc_kernel(x_ref,      # (T*B, I)      time-major, flattened input (f32)
                    wih0_ref,   # (I, 4*HP)     layer-0 input weights (bf16, gate-padded)
                    b0_ref,     # (1, 4*HP)     layer-0 summed biases (f32)
                    wstep_ref,  # (2*HP, 8*HP)  fused per-step weights (bf16)
                    b1_ref,     # (1, 4*HP)     layer-1 summed biases (f32)
                    wfc_ref,    # (1, HP)       final Linear weight row (f32, lane-padded)
                    bfc_ref,    # (1, 1)
                    out_ref,    # (B, 1)
                    xp_ref,     # VMEM scratch (T*B, 4*HP) f32: staged input projection
                    lhs_ref,    # VMEM scratch (B, 2*HP) bf16: persistent [h0 | h1] LHS
                    *, T, B):
    f32 = jnp.float32
    bf16 = jnp.bfloat16

    # --- Hoisted layer-0 input projection: no sequential dependency, so do it
    # once for all time steps (bias folded in) and park it in VMEM so it does
    # not occupy vregs across the whole recurrence. ---
    xp_ref[...] = (jnp.dot(x_ref[...].astype(bf16), wih0_ref[...],
                           preferred_element_type=f32)
                   + jnp.broadcast_to(b0_ref[...], (T * B, 4 * HP)))

    wstep = wstep_ref[...]                                   # loaded once
    b1 = jnp.broadcast_to(b1_ref[...], (B, 4 * HP))          # hoisted broadcast

    def activate(g, c):
        # Gate blocks are padded to 128 lanes -> every slice is vreg-aligned.
        # PyTorch gate order: i, f, g, o.
        i = jax.nn.sigmoid(g[:, 0 * HP:1 * HP])
        f = jax.nn.sigmoid(g[:, 1 * HP:2 * HP])
        gg = jnp.tanh(g[:, 2 * HP:3 * HP])
        o = jax.nn.sigmoid(g[:, 3 * HP:4 * HP])
        c_new = f * c + i * gg
        h_new = o * jnp.tanh(c_new)
        return h_new, c_new

    c0 = jnp.zeros((B, HP), f32)
    c1 = jnp.zeros((B, HP), f32)

    # Prologue: h0_{-1} = 0, so layer-0 gates at t=0 need no matmul at all.
    h0, c0 = activate(xp_ref[0:B, :], c0)
    lhs_ref[:, 0:HP] = h0.astype(bf16)
    lhs_ref[:, HP:2 * HP] = jnp.zeros((B, HP), bf16)          # h1_{-1} = 0

    h1 = jnp.zeros((B, HP), f32)

    # Fully unrolled time loop (T is static and tiny).  Per step: ONE fused
    # matmul, then the two activate() blocks (layer-1@t and layer-0@t+1) are
    # independent given `comb`, so the scheduler can overlap them.
    for t in range(T):
        comb = jnp.dot(lhs_ref[...], wstep, preferred_element_type=f32)

        # Layer 1 at step t: gates = h0_t @ Wih1 + h1_{t-1} @ Whh1 (+ bias).
        h1, c1 = activate(comb[:, 4 * HP:8 * HP] + b1, c1)
        lhs_ref[:, HP:2 * HP] = h1.astype(bf16)

        if t + 1 < T:
            # Layer 0 at step t+1: recurrent half came from the fused matmul.
            h0, c0 = activate(xp_ref[(t + 1) * B:(t + 2) * B, :]
                              + comb[:, 0:4 * HP], c0)
            lhs_ref[:, 0:HP] = h0.astype(bf16)

    # Final Linear(H, 1) on the last-step output of the top layer: VPU multiply
    # + lane reduce (cheaper tail than a degenerate N=1 MXU matmul).  Padded
    # lanes of h1 and wfc are both zero.
    out_ref[...] = (jnp.sum(h1 * jnp.broadcast_to(wfc_ref[...], (B, HP)),
                            axis=-1, keepdims=True)
                    + bfc_ref[...])


def lstm_forward(x, params):
    """x: (B, T, I) float32 (batch_first, like PyTorch). Returns (B, 1)."""
    B, T, I = x.shape
    # Layout plumbing only: time-major, flattened to (T*B, I).
    x_flat = jnp.transpose(x, (1, 0, 2)).reshape(T * B, I)

    vmem = pl.BlockSpec(memory_space=pltpu.MemorySpace.VMEM)
    kernel = functools.partial(_lstm_fc_kernel, T=T, B=B)
    # NOTE: at B=2 a batch grid axis (for v7x's 2nd TensorCore) buys nothing;
    # if batch is scaled up, add grid=(B//Bblk,) with
    # dimension_semantics=("parallel",) and block the batch in the BlockSpecs.
    # Total resident footprint is <1 MiB, so no vmem_limit_bytes tuning needed.
    return pl.pallas_call(
        kernel,
        out_shape=jax.ShapeDtypeStruct((B, 1), jnp.float32),
        in_specs=[vmem] * 7,
        out_specs=vmem,
        scratch_shapes=[pltpu.VMEM((T * B, 4 * HP), jnp.float32),   # staged xp
                        pltpu.VMEM((B, 2 * HP), jnp.bfloat16)],     # [h0 | h1]
    )(x_flat,
      params["wih0"], params["b0"],
      params["wstep"], params["b1"],
      params["wfc"], params["bfc"])


# ----------------------------- weight packing -----------------------------

def _pack_gate_cols(w, hp):
    """(K, 4*H) -> (K, 4*hp): each gate's H columns at offset g*hp, rest zero."""
    k_dim, four_h = w.shape
    h = four_h // 4
    out = jnp.zeros((k_dim, 4 * hp), w.dtype)
    for g in range(4):
        out = out.at[:, g * hp:g * hp + h].set(w[:, g * h:(g + 1) * h])
    return out


def _pad_rows(w, kp):
    """(K, N) -> (kp, N) with zero rows appended (padded h-lanes are zero)."""
    k, n = w.shape
    return jnp.zeros((kp, n), w.dtype).at[:k, :].set(w)


def init_params(key, input_size, hidden_size):
    """Deterministic init mimicking PyTorch's U(-1/sqrt(H), 1/sqrt(H)),
    then pre-transposed / gate-padded / fused / bf16-packed for the kernel."""
    h = hidden_size
    stdv = 1.0 / math.sqrt(h)
    keys = jax.random.split(key, 10)

    def u(k, shape):
        return jax.random.uniform(k, shape, jnp.float32, -stdv, stdv)

    # nn.LSTM native layouts: weight_ih (4H, in), weight_hh (4H, H), biases (4H,)
    w_ih0 = u(keys[0], (4 * h, input_size))
    w_hh0 = u(keys[1], (4 * h, h))
    b_ih0 = u(keys[2], (4 * h,))
    b_hh0 = u(keys[3], (4 * h,))
    w_ih1 = u(keys[4], (4 * h, h))
    w_hh1 = u(keys[5], (4 * h, h))
    b_ih1 = u(keys[6], (4 * h,))
    b_hh1 = u(keys[7], (4 * h,))
    w_fc = u(keys[8], (1, h))
    b_fc = u(keys[9], (1,))

    # Layer 0 input projection: transpose, pad gate columns to HP, bf16.
    wih0 = _pack_gate_cols(w_ih0.T, HP).astype(jnp.bfloat16)          # (I, 4*HP)
    b0 = _pack_gate_cols((b_ih0 + b_hh0).reshape(1, 4 * h), HP)       # (1, 4*HP)

    # Fused per-step weights W_step = [[Whh0, Wih1], [0, Whh1]]:
    #   LHS = [h0_t | h1_{t-1}]  ->  cols [0:4HP) = recurrent part of g0_{t+1},
    #                                cols [4HP:8HP) = g1_t.
    whh0 = _pack_gate_cols(_pad_rows(w_hh0.T, HP), HP)                # (HP, 4*HP)
    wih1 = _pack_gate_cols(_pad_rows(w_ih1.T, HP), HP)                # (HP, 4*HP)
    whh1 = _pack_gate_cols(_pad_rows(w_hh1.T, HP), HP)                # (HP, 4*HP)
    top = jnp.concatenate([whh0, wih1], axis=1)                       # (HP, 8*HP)
    bot = jnp.concatenate([jnp.zeros_like(whh1), whh1], axis=1)       # (HP, 8*HP)
    wstep = jnp.concatenate([top, bot], axis=0).astype(jnp.bfloat16)  # (2HP, 8*HP)
    b1 = _pack_gate_cols((b_ih1 + b_hh1).reshape(1, 4 * h), HP)       # (1, 4*HP)

    # Final Linear as a padded row vector (used via VPU mul + lane reduce).
    wfc = jnp.zeros((1, HP), jnp.float32).at[:, :h].set(w_fc)         # (1, HP)
    bfc = b_fc.reshape(1, 1)                                          # (1, 1)

    return {"wih0": wih0, "b0": b0,
            "wstep": wstep, "b1": b1,
            "wfc": wfc, "bfc": bfc}


if __name__ == "__main__":
    hidden_size = 64
    input_size = 4        # len(feature_columns)
    num_layers = 2        # both layers fused into the kernel's per-step body
    B, T = 2, 8

    key = jax.random.PRNGKey(0)
    k_params, k_x = jax.random.split(key)
    params = init_params(k_params, input_size, hidden_size)
    x = jax.random.normal(k_x, (B, T, input_size), jnp.float32)

    out = lstm_forward(x, params)
    jax.block_until_ready(out)
    assert out.shape == (B, 1) and out.dtype == jnp.float32
    print("KERNEL_OK")
</pallas_src>

<mosaic_0001>
module attributes {stable_mosaic.version = 11 : i64} {
  func.func @_lstm_fc_kernel(%arg0: memref<16x4xf32, #tpu.memory_space<vmem>>, %arg1: memref<4x512xbf16, #tpu.memory_space<vmem>>, %arg2: memref<1x512xf32, #tpu.memory_space<vmem>>, %arg3: memref<256x1024xbf16, #tpu.memory_space<vmem>>, %arg4: memref<1x512xf32, #tpu.memory_space<vmem>>, %arg5: memref<1x128xf32, #tpu.memory_space<vmem>>, %arg6: memref<1x1xf32, #tpu.memory_space<vmem>>, %arg7: memref<2x1xf32, #tpu.memory_space<vmem>>, %arg8: memref<16x512xf32, #tpu.memory_space<vmem>>, %arg9: memref<2x256xbf16, #tpu.memory_space<vmem>>) attributes {dimension_semantics = [], scalar_prefetch = 0 : i64, scratch_operands = 2 : i64, tpu.core_type = #tpu.core_type<tc>} {
    %c0 = arith.constant 0 : index
    %c0_0 = arith.constant 0 : index
    %0 = vector.load %arg0[%c0, %c0_0] : memref<16x4xf32, #tpu.memory_space<vmem>>, vector<16x4xf32>
    %1 = arith.truncf %0 : vector<16x4xf32> to vector<16x4xbf16>
    %c0_1 = arith.constant 0 : index
    %c0_2 = arith.constant 0 : index
    %2 = vector.load %arg1[%c0_1, %c0_2] : memref<4x512xbf16, #tpu.memory_space<vmem>>, vector<4x512xbf16>
    %cst = arith.constant dense<0.000000e+00> : vector<16x512xf32>
    %3 = tpu.matmul %1, %2, %cst {dimension_numbers = #tpu.dot_dimension_numbers<[1], [0], [0], [1], [0, 0, 1, 1], [], []>} : vector<16x4xbf16>, vector<4x512xbf16>, vector<16x512xf32> -> vector<16x512xf32>
    %c0_3 = arith.constant 0 : index
    %c0_4 = arith.constant 0 : index
    %4 = vector.load %arg2[%c0_3, %c0_4] : memref<1x512xf32, #tpu.memory_space<vmem>>, vector<1x512xf32>
    %5 = vector.shape_cast %4 : vector<1x512xf32> to vector<1x512xf32>
    %6 = vector.broadcast %5 : vector<1x512xf32> to vector<16x512xf32>
    %7 = arith.addf %3, %6 : vector<16x512xf32>
    %c0_5 = arith.constant 0 : index
    %c0_6 = arith.constant 0 : index
    %8 = vector.load %arg8[%c0_5, %c0_6] : memref<16x512xf32, #tpu.memory_space<vmem>>, vector<16x512xf32>
    tpu.vector_store %arg8[%c0_5, %c0_6], %7 {strides = array<i32>} : memref<16x512xf32, #tpu.memory_space<vmem>>, vector<16x512xf32>,
    %c0_7 = arith.constant 0 : index
    %c0_8 = arith.constant 0 : index
    %9 = vector.load %arg3[%c0_7, %c0_8] : memref<256x1024xbf16, #tpu.memory_space<vmem>>, vector<256x1024xbf16>
    %c0_9 = arith.constant 0 : index
    %c0_10 = arith.constant 0 : index
    %10 = vector.load %arg4[%c0_9, %c0_10] : memref<1x512xf32, #tpu.memory_space<vmem>>, vector<1x512xf32>
    %11 = vector.shape_cast %10 : vector<1x512xf32> to vector<1x512xf32>
    %12 = vector.broadcast %11 : vector<1x512xf32> to vector<2x512xf32>
    %cst_11 = arith.constant 0.000000e+00 : f32
    %13 = vector.broadcast %cst_11 : f32 to vector<2x128xf32>
    %cst_12 = arith.constant 0.000000e+00 : f32
    %14 = vector.broadcast %cst_12 : f32 to vector<2x128xf32>
    %c0_13 = arith.constant 0 : index
    %c0_14 = arith.constant 0 : index
    %15 = vector.load %arg8[%c0_13, %c0_14] : memref<16x512xf32, #tpu.memory_space<vmem>>, vector<2x512xf32>
    %16 = vector.extract_strided_slice %15 {offsets = [0, 0], sizes = [2, 128], strides = [1, 1]} : vector<2x512xf32> to vector<2x128xf32>
    %17 = arith.negf %16 : vector<2x128xf32>
    %18 = math.exp %17 : vector<2x128xf32>
    %cst_15 = arith.constant 1.000000e+00 : f32
    %19 = vector.broadcast %cst_15 : f32 to vector<2x128xf32>
    %20 = arith.addf %19, %18 : vector<2x128xf32>
    %21 = arith.divf %19, %20 : vector<2x128xf32>
    %22 = vector.extract_strided_slice %15 {offsets = [0, 128], sizes = [2, 128], strides = [1, 1]} : vector<2x512xf32> to vector<2x128xf32>
    %23 = arith.negf %22 : vector<2x128xf32>
    %24 = math.exp %23 : vector<2x128xf32>
    %cst_16 = arith.constant 1.000000e+00 : f32
    %25 = vector.broadcast %cst_16 : f32 to vector<2x128xf32>
    %26 = arith.addf %25, %24 : vector<2x128xf32>
    %27 = arith.divf %25, %26 : vector<2x128xf32>
    %28 = vector.extract_strided_slice %15 {offsets = [0, 256], sizes = [2, 128], strides = [1, 1]} : vector<2x512xf32> to vector<2x128xf32>
    %29 = math.tanh %28 : vector<2x128xf32>
    %30 = vector.extract_strided_slice %15 {offsets = [0, 384], sizes = [2, 128], strides = [1, 1]} : vector<2x512xf32> to vector<2x128xf32>
    %31 = arith.negf %30 : vector<2x128xf32>
    %32 = math.exp %31 : vector<2x128xf32>
    %cst_17 = arith.constant 1.000000e+00 : f32
    %33 = vector.broadcast %cst_17 : f32 to vector<2x128xf32>
    %34 = arith.addf %33, %32 : vector<2x128xf32>
    %35 = arith.divf %33, %34 : vector<2x128xf32>
    %36 = arith.mulf %27, %13 : vector<2x128xf32>
    %37 = arith.mulf %21, %29 : vector<2x128xf32>
    %38 = arith.addf %36, %37 : vector<2x128xf32>
    %39 = math.tanh %38 : vector<2x128xf32>
    %40 = arith.mulf %35, %39 : vector<2x128xf32>
    %41 = arith.truncf %40 : vector<2x128xf32> to vector<2x128xbf16>
    %c0_18 = arith.constant 0 : index
    %c0_19 = arith.constant 0 : index
    %42 = vector.load %arg9[%c0_18, %c0_19] : memref<2x256xbf16, #tpu.memory_space<vmem>>, vector<2x128xbf16>
    tpu.vector_store %arg9[%c0_18, %c0_19], %41 {strides = array<i32>} : memref<2x256xbf16, #tpu.memory_space<vmem>>, vector<2x128xbf16>,
    %cst_20 = arith.constant 0.000000e+00 : bf16
    %43 = vector.broadcast %cst_20 : bf16 to vector<2x128xbf16>
    %c0_21 = arith.constant 0 : index
    %c128 = arith.constant 128 : index
    %44 = vector.load %arg9[%c0_21, %c128] : memref<2x256xbf16, #tpu.memory_space<vmem>>, vector<2x128xbf16>
    tpu.vector_store %arg9[%c0_21, %c128], %43 {strides = array<i32>} : memref<2x256xbf16, #tpu.memory_space<vmem>>, vector<2x128xbf16>,
    %c0_22 = arith.constant 0 : index
    %c0_23 = arith.constant 0 : index
    %45 = vector.load %arg9[%c0_22, %c0_23] : memref<2x256xbf16, #tpu.memory_space<vmem>>, vector<2x256xbf16>
    %cst_24 = arith.constant dense<0.000000e+00> : vector<2x1024xf32>
    %46 = tpu.matmul %45, %9, %cst_24 {dimension_numbers = #tpu.dot_dimension_numbers<[1], [0], [0], [1], [0, 0, 1, 1], [], []>} : vector<2x256xbf16>, vector<256x1024xbf16>, vector<2x1024xf32> -> vector<2x1024xf32>
    %47 = vector.extract_strided_slice %46 {offsets = [0, 512], sizes = [2, 512], strides = [1, 1]} : vector<2x1024xf32> to vector<2x512xf32>
    %48 = arith.addf %47, %12 : vector<2x512xf32>
    %49 = vector.extract_strided_slice %48 {offsets = [0, 0], sizes = [2, 128], strides = [1, 1]} : vector<2x512xf32> to vector<2x128xf32>
    %50 = arith.negf %49 : vector<2x128xf32>
    %51 = math.exp %50 : vector<2x128xf32>
    %cst_25 = arith.constant 1.000000e+00 : f32
    %52 = vector.broadcast %cst_25 : f32 to vector<2x128xf32>
    %53 = arith.addf %52, %51 : vector<2x128xf32>
    %54 = arith.divf %52, %53 : vector<2x128xf32>
    %55 = vector.extract_strided_slice %48 {offsets = [0, 128], sizes = [2, 128], strides = [1, 1]} : vector<2x512xf32> to vector<2x128xf32>
    %56 = arith.negf %55 : vector<2x128xf32>
    %57 = math.exp %56 : vector<2x128xf32>
    %cst_26 = arith.constant 1.000000e+00 : f32
    %58 = vector.broadcast %cst_26 : f32 to vector<2x128xf32>
    %59 = arith.addf %58, %57 : vector<2x128xf32>
    %60 = arith.divf %58, %59 : vector<2x128xf32>
    %61 = vector.extract_strided_slice %48 {offsets = [0, 256], sizes = [2, 128], strides = [1, 1]} : vector<2x512xf32> to vector<2x128xf32>
    %62 = math.tanh %61 : vector<2x128xf32>
    %63 = vector.extract_strided_slice %48 {offsets = [0, 384], sizes = [2, 128], strides = [1, 1]} : vector<2x512xf32> to vector<2x128xf32>
    %64 = arith.negf %63 : vector<2x128xf32>
    %65 = math.exp %64 : vector<2x128xf32>
    %cst_27 = arith.constant 1.000000e+00 : f32
    %66 = vector.broadcast %cst_27 : f32 to vector<2x128xf32>
    %67 = arith.addf %66, %65 : vector<2x128xf32>
    %68 = arith.divf %66, %67 : vector<2x128xf32>
    %69 = arith.mulf %60, %14 : vector<2x128xf32>
    %70 = arith.mulf %54, %62 : vector<2x128xf32>
    %71 = arith.addf %69, %70 : vector<2x128xf32>
    %72 = math.tanh %71 : vector<2x128xf32>
    %73 = arith.mulf %68, %72 : vector<2x128xf32>
    %74 = arith.truncf %73 : vector<2x128xf32> to vector<2x128xbf16>
    %c0_28 = arith.constant 0 : index
    %c128_29 = arith.constant 128 : index
    %75 = vector.load %arg9[%c0_28, %c128_29] : memref<2x256xbf16, #tpu.memory_space<vmem>>, vector<2x128xbf16>
    tpu.vector_store %arg9[%c0_28, %c128_29], %74 {strides = array<i32>} : memref<2x256xbf16, #tpu.memory_space<vmem>>, vector<2x128xbf16>,
    %c2 = arith.constant 2 : index
    %c0_30 = arith.constant 0 : index
    %76 = vector.load %arg8[%c2, %c0_30] : memref<16x512xf32, #tpu.memory_space<vmem>>, vector<2x512xf32>
    %77 = vector.extract_strided_slice %46 {offsets = [0, 0], sizes = [2, 512], strides = [1, 1]} : vector<2x1024xf32> to vector<2x512xf32>
    %78 = arith.addf %76, %77 : vector<2x512xf32>
    %79 = vector.extract_strided_slice %78 {offsets = [0, 0], sizes = [2, 128], strides = [1, 1]} : vector<2x512xf32> to vector<2x128xf32>
    %80 = arith.negf %79 : vector<2x128xf32>
    %81 = math.exp %80 : vector<2x128xf32>
    %cst_31 = arith.constant 1.000000e+00 : f32
    %82 = vector.broadcast %cst_31 : f32 to vector<2x128xf32>
    %83 = arith.addf %82, %81 : vector<2x128xf32>
    %84 = arith.divf %82, %83 : vector<2x128xf32>
    %85 = vector.extract_strided_slice %78 {offsets = [0, 128], sizes = [2, 128], strides = [1, 1]} : vector<2x512xf32> to vector<2x128xf32>
    %86 = arith.negf %85 : vector<2x128xf32>
    %87 = math.exp %86 : vector<2x128xf32>
    %cst_32 = arith.constant 1.000000e+00 : f32
    %88 = vector.broadcast %cst_32 : f32 to vector<2x128xf32>
    %89 = arith.addf %88, %87 : vector<2x128xf32>
    %90 = arith.divf %88, %89 : vector<2x128xf32>
    %91 = vector.extract_strided_slice %78 {offsets = [0, 256], sizes = [2, 128], strides = [1, 1]} : vector<2x512xf32> to vector<2x128xf32>
    %92 = math.tanh %91 : vector<2x128xf32>
    %93 = vector.extract_strided_slice %78 {offsets = [0, 384], sizes = [2, 128], strides = [1, 1]} : vector<2x512xf32> to vector<2x128xf32>
    %94 = arith.negf %93 : vector<2x128xf32>
    %95 = math.exp %94 : vector<2x128xf32>
    %cst_33 = arith.constant 1.000000e+00 : f32
    %96 = vector.broadcast %cst_33 : f32 to vector<2x128xf32>
    %97 = arith.addf %96, %95 : vector<2x128xf32>
    %98 = arith.divf %96, %97 : vector<2x128xf32>
    %99 = arith.mulf %90, %38 : vector<2x128xf32>
    %100 = arith.mulf %84, %92 : vector<2x128xf32>
    %101 = arith.addf %99, %100 : vector<2x128xf32>
    %102 = math.tanh %101 : vector<2x128xf32>
    %103 = arith.mulf %98, %102 : vector<2x128xf32>
    %104 = arith.truncf %103 : vector<2x128xf32> to vector<2x128xbf16>
    %c0_34 = arith.constant 0 : index
    %c0_35 = arith.constant 0 : index
    %105 = vector.load %arg9[%c0_34, %c0_35] : memref<2x256xbf16, #tpu.memory_space<vmem>>, vector<2x128xbf16>
    tpu.vector_store %arg9[%c0_34, %c0_35], %104 {strides = array<i32>} : memref<2x256xbf16, #tpu.memory_space<vmem>>, vector<2x128xbf16>,
    %c0_36 = arith.constant 0 : index
    %c0_37 = arith.constant 0 : index
    %106 = vector.load %arg9[%c0_36, %c0_37] : memref<2x256xbf16, #tpu.memory_space<vmem>>, vector<2x256xbf16>
    %cst_38 = arith.constant dense<0.000000e+00> : vector<2x1024xf32>
    %107 = tpu.matmul %106, %9, %cst_38 {dimension_numbers = #tpu.dot_dimension_numbers<[1], [0], [0], [1], [0, 0, 1, 1], [], []>} : vector<2x256xbf16>, vector<256x1024xbf16>, vector<2x1024xf32> -> vector<2x1024xf32>
    %108 = vector.extract_strided_slice %107 {offsets = [0, 512], sizes = [2, 512], strides = [1, 1]} : vector<2x1024xf32> to vector<2x512xf32>
    %109 = arith.addf %108, %12 : vector<2x512xf32>
    %110 = vector.extract_strided_slice %109 {offsets = [0, 0], sizes = [2, 128], strides = [1, 1]} : vector<2x512xf32> to vector<2x128xf32>
    %111 = arith.negf %110 : vector<2x128xf32>
    %112 = math.exp %111 : vector<2x128xf32>
    %cst_39 = arith.constant 1.000000e+00 : f32
    %113 = vector.broadcast %cst_39 : f32 to vector<2x128xf32>
    %114 = arith.addf %113, %112 : vector<2x128xf32>
    %115 = arith.divf %113, %114 : vector<2x128xf32>
    %116 = vector.extract_strided_slice %109 {offsets = [0, 128], sizes = [2, 128], strides = [1, 1]} : vector<2x512xf32> to vector<2x128xf32>
    %117 = arith.negf %116 : vector<2x128xf32>
    %118 = math.exp %117 : vector<2x128xf32>
    %cst_40 = arith.constant 1.000000e+00 : f32
    %119 = vector.broadcast %cst_40 : f32 to vector<2x128xf32>
    %120 = arith.addf %119, %118 : vector<2x128xf32>
    %121 = arith.divf %119, %120 : vector<2x128xf32>
    %122 = vector.extract_strided_slice %109 {offsets = [0, 256], sizes = [2, 128], strides = [1, 1]} : vector<2x512xf32> to vector<2x128xf32>
    %123 = math.tanh %122 : vector<2x128xf32>
    %124 = vector.extract_strided_slice %109 {offsets = [0, 384], sizes = [2, 128], strides = [1, 1]} : vector<2x512xf32> to vector<2x128xf32>
    %125 = arith.negf %124 : vector<2x128xf32>
    %126 = math.exp %125 : vector<2x128xf32>
    %cst_41 = arith.constant 1.000000e+00 : f32
    %127 = vector.broadcast %cst_41 : f32 to vector<2x128xf32>
    %128 = arith.addf %127, %126 : vector<2x128xf32>
    %129 = arith.divf %127, %128 : vector<2x128xf32>
    %130 = arith.mulf %121, %71 : vector<2x128xf32>
    %131 = arith.mulf %115, %123 : vector<2x128xf32>
    %132 = arith.addf %130, %131 : vector<2x128xf32>
    %133 = math.tanh %132 : vector<2x128xf32>
    %134 = arith.mulf %129, %133 : vector<2x128xf32>
    %135 = arith.truncf %134 : vector<2x128xf32> to vector<2x128xbf16>
    %c0_42 = arith.constant 0 : index
    %c128_43 = arith.constant 128 : index
    %136 = vector.load %arg9[%c0_42, %c128_43] : memref<2x256xbf16, #tpu.memory_space<vmem>>, vector<2x128xbf16>
    tpu.vector_store %arg9[%c0_42, %c128_43], %135 {strides = array<i32>} : memref<2x256xbf16, #tpu.memory_space<vmem>>, vector<2x128xbf16>,
    %c4 = arith.constant 4 : index
    %c0_44 = arith.constant 0 : index
    %137 = vector.load %arg8[%c4, %c0_44] : memref<16x512xf32, #tpu.memory_space<vmem>>, vector<2x512xf32>
    %138 = vector.extract_strided_slice %107 {offsets = [0, 0], sizes = [2, 512], strides = [1, 1]} : vector<2x1024xf32> to vector<2x512xf32>
    %139 = arith.addf %137, %138 : vector<2x512xf32>
    %140 = vector.extract_strided_slice %139 {offsets = [0, 0], sizes = [2, 128], strides = [1, 1]} : vector<2x512xf32> to vector<2x128xf32>
    %141 = arith.negf %140 : vector<2x128xf32>
    %142 = math.exp %141 : vector<2x128xf32>
    %cst_45 = arith.constant 1.000000e+00 : f32
    %143 = vector.broadcast %cst_45 : f32 to vector<2x128xf32>
    %144 = arith.addf %143, %142 : vector<2x128xf32>
    %145 = arith.divf %143, %144 : vector<2x128xf32>
    %146 = vector.extract_strided_slice %139 {offsets = [0, 128], sizes = [2, 128], strides = [1, 1]} : vector<2x512xf32> to vector<2x128xf32>
    %147 = arith.negf %146 : vector<2x128xf32>
    %148 = math.exp %147 : vector<2x128xf32>
    %cst_46 = arith.constant 1.000000e+00 : f32
    %149 = vector.broadcast %cst_46 : f32 to vector<2x128xf32>
    %150 = arith.addf %149, %148 : vector<2x128xf32>
    %151 = arith.divf %149, %150 : vector<2x128xf32>
    %152 = vector.extract_strided_slice %139 {offsets = [0, 256], sizes = [2, 128], strides = [1, 1]} : vector<2x512xf32> to vector<2x128xf32>
    %153 = math.tanh %152 : vector<2x128xf32>
    %154 = vector.extract_strided_slice %139 {offsets = [0, 384], sizes = [2, 128], strides = [1, 1]} : vector<2x512xf32> to vector<2x128xf32>
    %155 = arith.negf %154 : vector<2x128xf32>
    %156 = math.exp %155 : vector<2x128xf32>
    %cst_47 = arith.constant 1.000000e+00 : f32
    %157 = vector.broadcast %cst_47 : f32 to vector<2x128xf32>
    %158 = arith.addf %157, %156 : vector<2x128xf32>
    %159 = arith.divf %157, %158 : vector<2x128xf32>
    %160 = arith.mulf %151, %101 : vector<2x128xf32>
    %161 = arith.mulf %145, %153 : vector<2x128xf32>
    %162 = arith.addf %160, %161 : vector<2x128xf32>
    %163 = math.tanh %162 : vector<2x128xf32>
    %164 = arith.mulf %159, %163 : vector<2x128xf32>
    %165 = arith.truncf %164 : vector<2x128xf32> to vector<2x128xbf16>
    %c0_48 = arith.constant 0 : index
    %c0_49 = arith.constant 0 : index
    %166 = vector.load %arg9[%c0_48, %c0_49] : memref<2x256xbf16, #tpu.memory_space<vmem>>, vector<2x128xbf16>
    tpu.vector_store %arg9[%c0_48, %c0_49], %165 {strides = array<i32>} : memref<2x256xbf16, #tpu.memory_space<vmem>>, vector<2x128xbf16>,
    %c0_50 = arith.constant 0 : index
    %c0_51 = arith.constant 0 : index
    %167 = vector.load %arg9[%c0_50, %c0_51] : memref<2x256xbf16, #tpu.memory_space<vmem>>, vector<2x256xbf16>
    %cst_52 = arith.constant dense<0.000000e+00> : vector<2x1024xf32>
    %168 = tpu.matmul %167, %9, %cst_52 {dimension_numbers = #tpu.dot_dimension_numbers<[1], [0], [0], [1], [0, 0, 1, 1], [], []>} : vector<2x256xbf16>, vector<256x1024xbf16>, vector<2x1024xf32> -> vector<2x1024xf32>
    %169 = vector.extract_strided_slice %168 {offsets = [0, 512], sizes = [2, 512], strides = [1, 1]} : vector<2x1024xf32> to vector<2x512xf32>
    %170 = arith.addf %169, %12 : vector<2x512xf32>
    %171 = vector.extract_strided_slice %170 {offsets = [0, 0], sizes = [2, 128], strides = [1, 1]} : vector<2x512xf32> to vector<2x128xf32>
    %172 = arith.negf %171 : vector<2x128xf32>
    %173 = math.exp %172 : vector<2x128xf32>
    %cst_53 = arith.constant 1.000000e+00 : f32
    %174 = vector.broadcast %cst_53 : f32 to vector<2x128xf32>
    %175 = arith.addf %174, %173 : vector<2x128xf32>
    %176 = arith.divf %174, %175 : vector<2x128xf32>
    %177 = vector.extract_strided_slice %170 {offsets = [0, 128], sizes = [2, 128], strides = [1, 1]} : vector<2x512xf32> to vector<2x128xf32>
    %178 = arith.negf %177 : vector<2x128xf32>
    %179 = math.exp %178 : vector<2x128xf32>
    %cst_54 = arith.constant 1.000000e+00 : f32
    %180 = vector.broadcast %cst_54 : f32 to vector<2x128xf32>
    %181 = arith.addf %180, %179 : vector<2x128xf32>
    %182 = arith.divf %180, %181 : vector<2x128xf32>
    %183 = vector.extract_strided_slice %170 {offsets = [0, 256], sizes = [2, 128], strides = [1, 1]} : vector<2x512xf32> to vector<2x128xf32>
    %184 = math.tanh %183 : vector<2x128xf32>
    %185 = vector.extract_strided_slice %170 {offsets = [0, 384], sizes = [2, 128], strides = [1, 1]} : vector<2x512xf32> to vector<2x128xf32>
    %186 = arith.negf %185 : vector<2x128xf32>
    %187 = math.exp %186 : vector<2x128xf32>
    %cst_55 = arith.constant 1.000000e+00 : f32
    %188 = vector.broadcast %cst_55 : f32 to vector<2x128xf32>
    %189 = arith.addf %188, %187 : vector<2x128xf32>
    %190 = arith.divf %188, %189 : vector<2x128xf32>
    %191 = arith.mulf %182, %132 : vector<2x128xf32>
    %192 = arith.mulf %176, %184 : vector<2x128xf32>
    %193 = arith.addf %191, %192 : vector<2x128xf32>
    %194 = math.tanh %193 : vector<2x128xf32>
    %195 = arith.mulf %190, %194 : vector<2x128xf32>
    %196 = arith.truncf %195 : vector<2x128xf32> to vector<2x128xbf16>
    %c0_56 = arith.constant 0 : index
    %c128_57 = arith.constant 128 : index
    %197 = vector.load %arg9[%c0_56, %c128_57] : memref<2x256xbf16, #tpu.memory_space<vmem>>, vector<2x128xbf16>
    tpu.vector_store %arg9[%c0_56, %c128_57], %196 {strides = array<i32>} : memref<2x256xbf16, #tpu.memory_space<vmem>>, vector<2x128xbf16>,
    %c6 = arith.constant 6 : index
    %c0_58 = arith.constant 0 : index
    %198 = vector.load %arg8[%c6, %c0_58] : memref<16x512xf32, #tpu.memory_space<vmem>>, vector<2x512xf32>
    %199 = vector.extract_strided_slice %168 {offsets = [0, 0], sizes = [2, 512], strides = [1, 1]} : vector<2x1024xf32> to vector<2x512xf32>
    %200 = arith.addf %198, %199 : vector<2x512xf32>
    %201 = vector.extract_strided_slice %200 {offsets = [0, 0], sizes = [2, 128], strides = [1, 1]} : vector<2x512xf32> to vector<2x128xf32>
    %202 = arith.negf %201 : vector<2x128xf32>
    %203 = math.exp %202 : vector<2x128xf32>
    %cst_59 = arith.constant 1.000000e+00 : f32
    %204 = vector.broadcast %cst_59 : f32 to vector<2x128xf32>
    %205 = arith.addf %204, %203 : vector<2x128xf32>
    %206 = arith.divf %204, %205 : vector<2x128xf32>
    %207 = vector.extract_strided_slice %200 {offsets = [0, 128], sizes = [2, 128], strides = [1, 1]} : vector<2x512xf32> to vector<2x128xf32>
    %208 = arith.negf %207 : vector<2x128xf32>
    %209 = math.exp %208 : vector<2x128xf32>
    %cst_60 = arith.constant 1.000000e+00 : f32
    %210 = vector.broadcast %cst_60 : f32 to vector<2x128xf32>
    %211 = arith.addf %210, %209 : vector<2x128xf32>
    %212 = arith.divf %210, %211 : vector<2x128xf32>
    %213 = vector.extract_strided_slice %200 {offsets = [0, 256], sizes = [2, 128], strides = [1, 1]} : vector<2x512xf32> to vector<2x128xf32>
    %214 = math.tanh %213 : vector<2x128xf32>
    %215 = vector.extract_strided_slice %200 {offsets = [0, 384], sizes = [2, 128], strides = [1, 1]} : vector<2x512xf32> to vector<2x128xf32>
    %216 = arith.negf %215 : vector<2x128xf32>
    %217 = math.exp %216 : vector<2x128xf32>
    %cst_61 = arith.constant 1.000000e+00 : f32
    %218 = vector.broadcast %cst_61 : f32 to vector<2x128xf32>
    %219 = arith.addf %218, %217 : vector<2x128xf32>
    %220 = arith.divf %218, %219 : vector<2x128xf32>
    %221 = arith.mulf %212, %162 : vector<2x128xf32>
    %222 = arith.mulf %206, %214 : vector<2x128xf32>
    %223 = arith.addf %221, %222 : vector<2x128xf32>
    %224 = math.tanh %223 : vector<2x128xf32>
    %225 = arith.mulf %220, %224 : vector<2x128xf32>
    %226 = arith.truncf %225 : vector<2x128xf32> to vector<2x128xbf16>
    %c0_62 = arith.constant 0 : index
    %c0_63 = arith.constant 0 : index
    %227 = vector.load %arg9[%c0_62, %c0_63] : memref<2x256xbf16, #tpu.memory_space<vmem>>, vector<2x128xbf16>
    tpu.vector_store %arg9[%c0_62, %c0_63], %226 {strides = array<i32>} : memref<2x256xbf16, #tpu.memory_space<vmem>>, vector<2x128xbf16>,
    %c0_64 = arith.constant 0 : index
    %c0_65 = arith.constant 0 : index
    %228 = vector.load %arg9[%c0_64, %c0_65] : memref<2x256xbf16, #tpu.memory_space<vmem>>, vector<2x256xbf16>
    %cst_66 = arith.constant dense<0.000000e+00> : vector<2x1024xf32>
    %229 = tpu.matmul %228, %9, %cst_66 {dimension_numbers = #tpu.dot_dimension_numbers<[1], [0], [0], [1], [0, 0, 1, 1], [], []>} : vector<2x256xbf16>, vector<256x1024xbf16>, vector<2x1024xf32> -> vector<2x1024xf32>
    %230 = vector.extract_strided_slice %229 {offsets = [0, 512], sizes = [2, 512], strides = [1, 1]} : vector<2x1024xf32> to vector<2x512xf32>
    %231 = arith.addf %230, %12 : vector<2x512xf32>
    %232 = vector.extract_strided_slice %231 {offsets = [0, 0], sizes = [2, 128], strides = [1, 1]} : vector<2x512xf32> to vector<2x128xf32>
    %233 = arith.negf %232 : vector<2x128xf32>
    %234 = math.exp %233 : vector<2x128xf32>
    %cst_67 = arith.constant 1.000000e+00 : f32
    %235 = vector.broadcast %cst_67 : f32 to vector<2x128xf32>
    %236 = arith.addf %235, %234 : vector<2x128xf32>
    %237 = arith.divf %235, %236 : vector<2x128xf32>
    %238 = vector.extract_strided_slice %231 {offsets = [0, 128], sizes = [2, 128], strides = [1, 1]} : vector<2x512xf32> to vector<2x128xf32>
    %239 = arith.negf %238 : vector<2x128xf32>
    %240 = math.exp %239 : vector<2x128xf32>
    %cst_68 = arith.constant 1.000000e+00 : f32
    %241 = vector.broadcast %cst_68 : f32 to vector<2x128xf32>
    %242 = arith.addf %241, %240 : vector<2x128xf32>
    %243 = arith.divf %241, %242 : vector<2x128xf32>
    %244 = vector.extract_strided_slice %231 {offsets = [0, 256], sizes = [2, 128], strides = [1, 1]} : vector<2x512xf32> to vector<2x128xf32>
    %245 = math.tanh %244 : vector<2x128xf32>
    %246 = vector.extract_strided_slice %231 {offsets = [0, 384], sizes = [2, 128], strides = [1, 1]} : vector<2x512xf32> to vector<2x128xf32>
    %247 = arith.negf %246 : vector<2x128xf32>
    %248 = math.exp %247 : vector<2x128xf32>
    %cst_69 = arith.constant 1.000000e+00 : f32
    %249 = vector.broadcast %cst_69 : f32 to vector<2x128xf32>
    %250 = arith.addf %249, %248 : vector<2x128xf32>
    %251 = arith.divf %249, %250 : vector<2x128xf32>
    %252 = arith.mulf %243, %193 : vector<2x128xf32>
    %253 = arith.mulf %237, %245 : vector<2x128xf32>
    %254 = arith.addf %252, %253 : vector<2x128xf32>
    %255 = math.tanh %254 : vector<2x128xf32>
    %256 = arith.mulf %251, %255 : vector<2x128xf32>
    %257 = arith.truncf %256 : vector<2x128xf32> to vector<2x128xbf16>
    %c0_70 = arith.constant 0 : index
    %c128_71 = arith.constant 128 : index
    %258 = vector.load %arg9[%c0_70, %c128_71] : memref<2x256xbf16, #tpu.memory_space<vmem>>, vector<2x128xbf16>
    tpu.vector_store %arg9[%c0_70, %c128_71], %257 {strides = array<i32>} : memref<2x256xbf16, #tpu.memory_space<vmem>>, vector<2x128xbf16>,
    %c8 = arith.constant 8 : index
    %c0_72 = arith.constant 0 : index
    %259 = vector.load %arg8[%c8, %c0_72] : memref<16x512xf32, #tpu.memory_space<vmem>>, vector<2x512xf32>
    %260 = vector.extract_strided_slice %229 {offsets = [0, 0], sizes = [2, 512], strides = [1, 1]} : vector<2x1024xf32> to vector<2x512xf32>
    %261 = arith.addf %259, %260 : vector<2x512xf32>
    %262 = vector.extract_strided_slice %261 {offsets = [0, 0], sizes = [2, 128], strides = [1, 1]} : vector<2x512xf32> to vector<2x128xf32>
    %263 = arith.negf %262 : vector<2x128xf32>
    %264 = math.exp %263 : vector<2x128xf32>
    %cst_73 = arith.constant 1.000000e+00 : f32
    %265 = vector.broadcast %cst_73 : f32 to vector<2x128xf32>
    %266 = arith.addf %265, %264 : vector<2x128xf32>
    %267 = arith.divf %265, %266 : vector<2x128xf32>
    %268 = vector.extract_strided_slice %261 {offsets = [0, 128], sizes = [2, 128], strides = [1, 1]} : vector<2x512xf32> to vector<2x128xf32>
    %269 = arith.negf %268 : vector<2x128xf32>
    %270 = math.exp %269 : vector<2x128xf32>
    %cst_74 = arith.constant 1.000000e+00 : f32
    %271 = vector.broadcast %cst_74 : f32 to vector<2x128xf32>
    %272 = arith.addf %271, %270 : vector<2x128xf32>
    %273 = arith.divf %271, %272 : vector<2x128xf32>
    %274 = vector.extract_strided_slice %261 {offsets = [0, 256], sizes = [2, 128], strides = [1, 1]} : vector<2x512xf32> to vector<2x128xf32>
    %275 = math.tanh %274 : vector<2x128xf32>
    %276 = vector.extract_strided_slice %261 {offsets = [0, 384], sizes = [2, 128], strides = [1, 1]} : vector<2x512xf32> to vector<2x128xf32>
    %277 = arith.negf %276 : vector<2x128xf32>
    %278 = math.exp %277 : vector<2x128xf32>
    %cst_75 = arith.constant 1.000000e+00 : f32
    %279 = vector.broadcast %cst_75 : f32 to vector<2x128xf32>
    %280 = arith.addf %279, %278 : vector<2x128xf32>
    %281 = arith.divf %279, %280 : vector<2x128xf32>
    %282 = arith.mulf %273, %223 : vector<2x128xf32>
    %283 = arith.mulf %267, %275 : vector<2x128xf32>
    %284 = arith.addf %282, %283 : vector<2x128xf32>
    %285 = math.tanh %284 : vector<2x128xf32>
    %286 = arith.mulf %281, %285 : vector<2x128xf32>
    %287 = arith.truncf %286 : vector<2x128xf32> to vector<2x128xbf16>
    %c0_76 = arith.constant 0 : index
    %c0_77 = arith.constant 0 : index
    %288 = vector.load %arg9[%c0_76, %c0_77] : memref<2x256xbf16, #tpu.memory_space<vmem>>, vector<2x128xbf16>
    tpu.vector_store %arg9[%c0_76, %c0_77], %287 {strides = array<i32>} : memref<2x256xbf16, #tpu.memory_space<vmem>>, vector<2x128xbf16>,
    %c0_78 = arith.constant 0 : index
    %c0_79 = arith.constant 0 : index
    %289 = vector.load %arg9[%c0_78, %c0_79] : memref<2x256xbf16, #tpu.memory_space<vmem>>, vector<2x256xbf16>
    %cst_80 = arith.constant dense<0.000000e+00> : vector<2x1024xf32>
    %290 = tpu.matmul %289, %9, %cst_80 {dimension_numbers = #tpu.dot_dimension_numbers<[1], [0], [0], [1], [0, 0, 1, 1], [], []>} : vector<2x256xbf16>, vector<256x1024xbf16>, vector<2x1024xf32> -> vector<2x1024xf32>
    %291 = vector.extract_strided_slice %290 {offsets = [0, 512], sizes = [2, 512], strides = [1, 1]} : vector<2x1024xf32> to vector<2x512xf32>
    %292 = arith.addf %291, %12 : vector<2x512xf32>
    %293 = vector.extract_strided_slice %292 {offsets = [0, 0], sizes = [2, 128], strides = [1, 1]} : vector<2x512xf32> to vector<2x128xf32>
    %294 = arith.negf %293 : vector<2x128xf32>
    %295 = math.exp %294 : vector<2x128xf32>
    %cst_81 = arith.constant 1.000000e+00 : f32
    %296 = vector.broadcast %cst_81 : f32 to vector<2x128xf32>
    %297 = arith.addf %296, %295 : vector<2x128xf32>
    %298 = arith.divf %296, %297 : vector<2x128xf32>
    %299 = vector.extract_strided_slice %292 {offsets = [0, 128], sizes = [2, 128], strides = [1, 1]} : vector<2x512xf32> to vector<2x128xf32>
    %300 = arith.negf %299 : vector<2x128xf32>
    %301 = math.exp %300 : vector<2x128xf32>
    %cst_82 = arith.constant 1.000000e+00 : f32
    %302 = vector.broadcast %cst_82 : f32 to vector<2x128xf32>
    %303 = arith.addf %302, %301 : vector<2x128xf32>
    %304 = arith.divf %302, %303 : vector<2x128xf32>
    %305 = vector.extract_strided_slice %292 {offsets = [0, 256], sizes = [2, 128], strides = [1, 1]} : vector<2x512xf32> to vector<2x128xf32>
    %306 = math.tanh %305 : vector<2x128xf32>
    %307 = vector.extract_strided_slice %292 {offsets = [0, 384], sizes = [2, 128], strides = [1, 1]} : vector<2x512xf32> to vector<2x128xf32>
    %308 = arith.negf %307 : vector<2x128xf32>
    %309 = math.exp %308 : vector<2x128xf32>
    %cst_83 = arith.constant 1.000000e+00 : f32
    %310 = vector.broadcast %cst_83 : f32 to vector<2x128xf32>
    %311 = arith.addf %310, %309 : vector<2x128xf32>
    %312 = arith.divf %310, %311 : vector<2x128xf32>
    %313 = arith.mulf %304, %254 : vector<2x128xf32>
    %314 = arith.mulf %298, %306 : vector<2x128xf32>
    %315 = arith.addf %313, %314 : vector<2x128xf32>
    %316 = math.tanh %315 : vector<2x128xf32>
    %317 = arith.mulf %312, %316 : vector<2x128xf32>
    %318 = arith.truncf %317 : vector<2x128xf32> to vector<2x128xbf16>
    %c0_84 = arith.constant 0 : index
    %c128_85 = arith.constant 128 : index
    %319 = vector.load %arg9[%c0_84, %c128_85] : memref<2x256xbf16, #tpu.memory_space<vmem>>, vector<2x128xbf16>
    tpu.vector_store %arg9[%c0_84, %c128_85], %318 {strides = array<i32>} : memref<2x256xbf16, #tpu.memory_space<vmem>>, vector<2x128xbf16>,
    %c10 = arith.constant 10 : index
    %c0_86 = arith.constant 0 : index
    %320 = vector.load %arg8[%c10, %c0_86] : memref<16x512xf32, #tpu.memory_space<vmem>>, vector<2x512xf32>
    %321 = vector.extract_strided_slice %290 {offsets = [0, 0], sizes = [2, 512], strides = [1, 1]} : vector<2x1024xf32> to vector<2x512xf32>
    %322 = arith.addf %320, %321 : vector<2x512xf32>
    %323 = vector.extract_strided_slice %322 {offsets = [0, 0], sizes = [2, 128], strides = [1, 1]} : vector<2x512xf32> to vector<2x128xf32>
    %324 = arith.negf %323 : vector<2x128xf32>
    %325 = math.exp %324 : vector<2x128xf32>
    %cst_87 = arith.constant 1.000000e+00 : f32
    %326 = vector.broadcast %cst_87 : f32 to vector<2x128xf32>
    %327 = arith.addf %326, %325 : vector<2x128xf32>
    %328 = arith.divf %326, %327 : vector<2x128xf32>
    %329 = vector.extract_strided_slice %322 {offsets = [0, 128], sizes = [2, 128], strides = [1, 1]} : vector<2x512xf32> to vector<2x128xf32>
    %330 = arith.negf %329 : vector<2x128xf32>
    %331 = math.exp %330 : vector<2x128xf32>
    %cst_88 = arith.constant 1.000000e+00 : f32
    %332 = vector.broadcast %cst_88 : f32 to vector<2x128xf32>
    %333 = arith.addf %332, %331 : vector<2x128xf32>
    %334 = arith.divf %332, %333 : vector<2x128xf32>
    %335 = vector.extract_strided_slice %322 {offsets = [0, 256], sizes = [2, 128], strides = [1, 1]} : vector<2x512xf32> to vector<2x128xf32>
    %336 = math.tanh %335 : vector<2x128xf32>
    %337 = vector.extract_strided_slice %322 {offsets = [0, 384], sizes = [2, 128], strides = [1, 1]} : vector<2x512xf32> to vector<2x128xf32>
    %338 = arith.negf %337 : vector<2x128xf32>
    %339 = math.exp %338 : vector<2x128xf32>
    %cst_89 = arith.constant 1.000000e+00 : f32
    %340 = vector.broadcast %cst_89 : f32 to vector<2x128xf32>
    %341 = arith.addf %340, %339 : vector<2x128xf32>
    %342 = arith.divf %340, %341 : vector<2x128xf32>
    %343 = arith.mulf %334, %284 : vector<2x128xf32>
    %344 = arith.mulf %328, %336 : vector<2x128xf32>
    %345 = arith.addf %343, %344 : vector<2x128xf32>
    %346 = math.tanh %345 : vector<2x128xf32>
    %347 = arith.mulf %342, %346 : vector<2x128xf32>
    %348 = arith.truncf %347 : vector<2x128xf32> to vector<2x128xbf16>
    %c0_90 = arith.constant 0 : index
    %c0_91 = arith.constant 0 : index
    %349 = vector.load %arg9[%c0_90, %c0_91] : memref<2x256xbf16, #tpu.memory_space<vmem>>, vector<2x128xbf16>
    tpu.vector_store %arg9[%c0_90, %c0_91], %348 {strides = array<i32>} : memref<2x256xbf16, #tpu.memory_space<vmem>>, vector<2x128xbf16>,
    %c0_92 = arith.constant 0 : index
    %c0_93 = arith.constant 0 : index
    %350 = vector.load %arg9[%c0_92, %c0_93] : memref<2x256xbf16, #tpu.memory_space<vmem>>, vector<2x256xbf16>
    %cst_94 = arith.constant dense<0.000000e+00> : vector<2x1024xf32>
    %351 = tpu.matmul %350, %9, %cst_94 {dimension_numbers = #tpu.dot_dimension_numbers<[1], [0], [0], [1], [0, 0, 1, 1], [], []>} : vector<2x256xbf16>, vector<256x1024xbf16>, vector<2x1024xf32> -> vector<2x1024xf32>
    %352 = vector.extract_strided_slice %351 {offsets = [0, 512], sizes = [2, 512], strides = [1, 1]} : vector<2x1024xf32> to vector<2x512xf32>
    %353 = arith.addf %352, %12 : vector<2x512xf32>
    %354 = vector.extract_strided_slice %353 {offsets = [0, 0], sizes = [2, 128], strides = [1, 1]} : vector<2x512xf32> to vector<2x128xf32>
    %355 = arith.negf %354 : vector<2x128xf32>
    %356 = math.exp %355 : vector<2x128xf32>
    %cst_95 = arith.constant 1.000000e+00 : f32
    %357 = vector.broadcast %cst_95 : f32 to vector<2x128xf32>
    %358 = arith.addf %357, %356 : vector<2x128xf32>
    %359 = arith.divf %357, %358 : vector<2x128xf32>
    %360 = vector.extract_strided_slice %353 {offsets = [0, 128], sizes = [2, 128], strides = [1, 1]} : vector<2x512xf32> to vector<2x128xf32>
    %361 = arith.negf %360 : vector<2x128xf32>
    %362 = math.exp %361 : vector<2x128xf32>
    %cst_96 = arith.constant 1.000000e+00 : f32
    %363 = vector.broadcast %cst_96 : f32 to vector<2x128xf32>
    %364 = arith.addf %363, %362 : vector<2x128xf32>
    %365 = arith.divf %363, %364 : vector<2x128xf32>
    %366 = vector.extract_strided_slice %353 {offsets = [0, 256], sizes = [2, 128], strides = [1, 1]} : vector<2x512xf32> to vector<2x128xf32>
    %367 = math.tanh %366 : vector<2x128xf32>
    %368 = vector.extract_strided_slice %353 {offsets = [0, 384], sizes = [2, 128], strides = [1, 1]} : vector<2x512xf32> to vector<2x128xf32>
    %369 = arith.negf %368 : vector<2x128xf32>
    %370 = math.exp %369 : vector<2x128xf32>
    %cst_97 = arith.constant 1.000000e+00 : f32
    %371 = vector.broadcast %cst_97 : f32 to vector<2x128xf32>
    %372 = arith.addf %371, %370 : vector<2x128xf32>
    %373 = arith.divf %371, %372 : vector<2x128xf32>
    %374 = arith.mulf %365, %315 : vector<2x128xf32>
    %375 = arith.mulf %359, %367 : vector<2x128xf32>
    %376 = arith.addf %374, %375 : vector<2x128xf32>
    %377 = math.tanh %376 : vector<2x128xf32>
    %378 = arith.mulf %373, %377 : vector<2x128xf32>
    %379 = arith.truncf %378 : vector<2x128xf32> to vector<2x128xbf16>
    %c0_98 = arith.constant 0 : index
    %c128_99 = arith.constant 128 : index
    %380 = vector.load %arg9[%c0_98, %c128_99] : memref<2x256xbf16, #tpu.memory_space<vmem>>, vector<2x128xbf16>
    tpu.vector_store %arg9[%c0_98, %c128_99], %379 {strides = array<i32>} : memref<2x256xbf16, #tpu.memory_space<vmem>>, vector<2x128xbf16>,
    %c12 = arith.constant 12 : index
    %c0_100 = arith.constant 0 : index
    %381 = vector.load %arg8[%c12, %c0_100] : memref<16x512xf32, #tpu.memory_space<vmem>>, vector<2x512xf32>
    %382 = vector.extract_strided_slice %351 {offsets = [0, 0], sizes = [2, 512], strides = [1, 1]} : vector<2x1024xf32> to vector<2x512xf32>
    %383 = arith.addf %381, %382 : vector<2x512xf32>
    %384 = vector.extract_strided_slice %383 {offsets = [0, 0], sizes = [2, 128], strides = [1, 1]} : vector<2x512xf32> to vector<2x128xf32>
    %385 = arith.negf %384 : vector<2x128xf32>
    %386 = math.exp %385 : vector<2x128xf32>
    %cst_101 = arith.constant 1.000000e+00 : f32
    %387 = vector.broadcast %cst_101 : f32 to vector<2x128xf32>
    %388 = arith.addf %387, %386 : vector<2x128xf32>
    %389 = arith.divf %387, %388 : vector<2x128xf32>
    %390 = vector.extract_strided_slice %383 {offsets = [0, 128], sizes = [2, 128], strides = [1, 1]} : vector<2x512xf32> to vector<2x128xf32>
    %391 = arith.negf %390 : vector<2x128xf32>
    %392 = math.exp %391 : vector<2x128xf32>
    %cst_102 = arith.constant 1.000000e+00 : f32
    %393 = vector.broadcast %cst_102 : f32 to vector<2x128xf32>
    %394 = arith.addf %393, %392 : vector<2x128xf32>
    %395 = arith.divf %393, %394 : vector<2x128xf32>
    %396 = vector.extract_strided_slice %383 {offsets = [0, 256], sizes = [2, 128], strides = [1, 1]} : vector<2x512xf32> to vector<2x128xf32>
    %397 = math.tanh %396 : vector<2x128xf32>
    %398 = vector.extract_strided_slice %383 {offsets = [0, 384], sizes = [2, 128], strides = [1, 1]} : vector<2x512xf32> to vector<2x128xf32>
    %399 = arith.negf %398 : vector<2x128xf32>
    %400 = math.exp %399 : vector<2x128xf32>
    %cst_103 = arith.constant 1.000000e+00 : f32
    %401 = vector.broadcast %cst_103 : f32 to vector<2x128xf32>
    %402 = arith.addf %401, %400 : vector<2x128xf32>
    %403 = arith.divf %401, %402 : vector<2x128xf32>
    %404 = arith.mulf %395, %345 : vector<2x128xf32>
    %405 = arith.mulf %389, %397 : vector<2x128xf32>
    %406 = arith.addf %404, %405 : vector<2x128xf32>
    %407 = math.tanh %406 : vector<2x128xf32>
    %408 = arith.mulf %403, %407 : vector<2x128xf32>
    %409 = arith.truncf %408 : vector<2x128xf32> to vector<2x128xbf16>
    %c0_104 = arith.constant 0 : index
    %c0_105 = arith.constant 0 : index
    %410 = vector.load %arg9[%c0_104, %c0_105] : memref<2x256xbf16, #tpu.memory_space<vmem>>, vector<2x128xbf16>
    tpu.vector_store %arg9[%c0_104, %c0_105], %409 {strides = array<i32>} : memref<2x256xbf16, #tpu.memory_space<vmem>>, vector<2x128xbf16>,
    %c0_106 = arith.constant 0 : index
    %c0_107 = arith.constant 0 : index
    %411 = vector.load %arg9[%c0_106, %c0_107] : memref<2x256xbf16, #tpu.memory_space<vmem>>, vector<2x256xbf16>
    %cst_108 = arith.constant dense<0.000000e+00> : vector<2x1024xf32>
    %412 = tpu.matmul %411, %9, %cst_108 {dimension_numbers = #tpu.dot_dimension_numbers<[1], [0], [0], [1], [0, 0, 1, 1], [], []>} : vector<2x256xbf16>, vector<256x1024xbf16>, vector<2x1024xf32> -> vector<2x1024xf32>
    %413 = vector.extract_strided_slice %412 {offsets = [0, 512], sizes = [2, 512], strides = [1, 1]} : vector<2x1024xf32> to vector<2x512xf32>
    %414 = arith.addf %413, %12 : vector<2x512xf32>
    %415 = vector.extract_strided_slice %414 {offsets = [0, 0], sizes = [2, 128], strides = [1, 1]} : vector<2x512xf32> to vector<2x128xf32>
    %416 = arith.negf %415 : vector<2x128xf32>
    %417 = math.exp %416 : vector<2x128xf32>
    %cst_109 = arith.constant 1.000000e+00 : f32
    %418 = vector.broadcast %cst_109 : f32 to vector<2x128xf32>
    %419 = arith.addf %418, %417 : vector<2x128xf32>
    %420 = arith.divf %418, %419 : vector<2x128xf32>
    %421 = vector.extract_strided_slice %414 {offsets = [0, 128], sizes = [2, 128], strides = [1, 1]} : vector<2x512xf32> to vector<2x128xf32>
    %422 = arith.negf %421 : vector<2x128xf32>
    %423 = math.exp %422 : vector<2x128xf32>
    %cst_110 = arith.constant 1.000000e+00 : f32
    %424 = vector.broadcast %cst_110 : f32 to vector<2x128xf32>
    %425 = arith.addf %424, %423 : vector<2x128xf32>
    %426 = arith.divf %424, %425 : vector<2x128xf32>
    %427 = vector.extract_strided_slice %414 {offsets = [0, 256], sizes = [2, 128], strides = [1, 1]} : vector<2x512xf32> to vector<2x128xf32>
    %428 = math.tanh %427 : vector<2x128xf32>
    %429 = vector.extract_strided_slice %414 {offsets = [0, 384], sizes = [2, 128], strides = [1, 1]} : vector<2x512xf32> to vector<2x128xf32>
    %430 = arith.negf %429 : vector<2x128xf32>
    %431 = math.exp %430 : vector<2x128xf32>
    %cst_111 = arith.constant 1.000000e+00 : f32
    %432 = vector.broadcast %cst_111 : f32 to vector<2x128xf32>
    %433 = arith.addf %432, %431 : vector<2x128xf32>
    %434 = arith.divf %432, %433 : vector<2x128xf32>
    %435 = arith.mulf %426, %376 : vector<2x128xf32>
    %436 = arith.mulf %420, %428 : vector<2x128xf32>
    %437 = arith.addf %435, %436 : vector<2x128xf32>
    %438 = math.tanh %437 : vector<2x128xf32>
    %439 = arith.mulf %434, %438 : vector<2x128xf32>
    %440 = arith.truncf %439 : vector<2x128xf32> to vector<2x128xbf16>
    %c0_112 = arith.constant 0 : index
    %c128_113 = arith.constant 128 : index
    %441 = vector.load %arg9[%c0_112, %c128_113] : memref<2x256xbf16, #tpu.memory_space<vmem>>, vector<2x128xbf16>
    tpu.vector_store %arg9[%c0_112, %c128_113], %440 {strides = array<i32>} : memref<2x256xbf16, #tpu.memory_space<vmem>>, vector<2x128xbf16>,
    %c14 = arith.constant 14 : index
    %c0_114 = arith.constant 0 : index
    %442 = vector.load %arg8[%c14, %c0_114] : memref<16x512xf32, #tpu.memory_space<vmem>>, vector<2x512xf32>
    %443 = vector.extract_strided_slice %412 {offsets = [0, 0], sizes = [2, 512], strides = [1, 1]} : vector<2x1024xf32> to vector<2x512xf32>
    %444 = arith.addf %442, %443 : vector<2x512xf32>
    %445 = vector.extract_strided_slice %444 {offsets = [0, 0], sizes = [2, 128], strides = [1, 1]} : vector<2x512xf32> to vector<2x128xf32>
    %446 = arith.negf %445 : vector<2x128xf32>
    %447 = math.exp %446 : vector<2x128xf32>
    %cst_115 = arith.constant 1.000000e+00 : f32
    %448 = vector.broadcast %cst_115 : f32 to vector<2x128xf32>
    %449 = arith.addf %448, %447 : vector<2x128xf32>
    %450 = arith.divf %448, %449 : vector<2x128xf32>
    %451 = vector.extract_strided_slice %444 {offsets = [0, 128], sizes = [2, 128], strides = [1, 1]} : vector<2x512xf32> to vector<2x128xf32>
    %452 = arith.negf %451 : vector<2x128xf32>
    %453 = math.exp %452 : vector<2x128xf32>
    %cst_116 = arith.constant 1.000000e+00 : f32
    %454 = vector.broadcast %cst_116 : f32 to vector<2x128xf32>
    %455 = arith.addf %454, %453 : vector<2x128xf32>
    %456 = arith.divf %454, %455 : vector<2x128xf32>
    %457 = vector.extract_strided_slice %444 {offsets = [0, 256], sizes = [2, 128], strides = [1, 1]} : vector<2x512xf32> to vector<2x128xf32>
    %458 = math.tanh %457 : vector<2x128xf32>
    %459 = vector.extract_strided_slice %444 {offsets = [0, 384], sizes = [2, 128], strides = [1, 1]} : vector<2x512xf32> to vector<2x128xf32>
    %460 = arith.negf %459 : vector<2x128xf32>
    %461 = math.exp %460 : vector<2x128xf32>
    %cst_117 = arith.constant 1.000000e+00 : f32
    %462 = vector.broadcast %cst_117 : f32 to vector<2x128xf32>
    %463 = arith.addf %462, %461 : vector<2x128xf32>
    %464 = arith.divf %462, %463 : vector<2x128xf32>
    %465 = arith.mulf %456, %406 : vector<2x128xf32>
    %466 = arith.mulf %450, %458 : vector<2x128xf32>
    %467 = arith.addf %465, %466 : vector<2x128xf32>
    %468 = math.tanh %467 : vector<2x128xf32>
    %469 = arith.mulf %464, %468 : vector<2x128xf32>
    %470 = arith.truncf %469 : vector<2x128xf32> to vector<2x128xbf16>
    %c0_118 = arith.constant 0 : index
    %c0_119 = arith.constant 0 : index
    %471 = vector.load %arg9[%c0_118, %c0_119] : memref<2x256xbf16, #tpu.memory_space<vmem>>, vector<2x128xbf16>
    tpu.vector_store %arg9[%c0_118, %c0_119], %470 {strides = array<i32>} : memref<2x256xbf16, #tpu.memory_space<vmem>>, vector<2x128xbf16>,
    %c0_120 = arith.constant 0 : index
    %c0_121 = arith.constant 0 : index
    %472 = vector.load %arg9[%c0_120, %c0_121] : memref<2x256xbf16, #tpu.memory_space<vmem>>, vector<2x256xbf16>
    %cst_122 = arith.constant dense<0.000000e+00> : vector<2x1024xf32>
    %473 = tpu.matmul %472, %9, %cst_122 {dimension_numbers = #tpu.dot_dimension_numbers<[1], [0], [0], [1], [0, 0, 1, 1], [], []>} : vector<2x256xbf16>, vector<256x1024xbf16>, vector<2x1024xf32> -> vector<2x1024xf32>
    %474 = vector.extract_strided_slice %473 {offsets = [0, 512], sizes = [2, 512], strides = [1, 1]} : vector<2x1024xf32> to vector<2x512xf32>
    %475 = arith.addf %474, %12 : vector<2x512xf32>
    %476 = vector.extract_strided_slice %475 {offsets = [0, 0], sizes = [2, 128], strides = [1, 1]} : vector<2x512xf32> to vector<2x128xf32>
    %477 = arith.negf %476 : vector<2x128xf32>
    %478 = math.exp %477 : vector<2x128xf32>
    %cst_123 = arith.constant 1.000000e+00 : f32
    %479 = vector.broadcast %cst_123 : f32 to vector<2x128xf32>
    %480 = arith.addf %479, %478 : vector<2x128xf32>
    %481 = arith.divf %479, %480 : vector<2x128xf32>
    %482 = vector.extract_strided_slice %475 {offsets = [0, 128], sizes = [2, 128], strides = [1, 1]} : vector<2x512xf32> to vector<2x128xf32>
    %483 = arith.negf %482 : vector<2x128xf32>
    %484 = math.exp %483 : vector<2x128xf32>
    %cst_124 = arith.constant 1.000000e+00 : f32
    %485 = vector.broadcast %cst_124 : f32 to vector<2x128xf32>
    %486 = arith.addf %485, %484 : vector<2x128xf32>
    %487 = arith.divf %485, %486 : vector<2x128xf32>
    %488 = vector.extract_strided_slice %475 {offsets = [0, 256], sizes = [2, 128], strides = [1, 1]} : vector<2x512xf32> to vector<2x128xf32>
    %489 = math.tanh %488 : vector<2x128xf32>
    %490 = vector.extract_strided_slice %475 {offsets = [0, 384], sizes = [2, 128], strides = [1, 1]} : vector<2x512xf32> to vector<2x128xf32>
    %491 = arith.negf %490 : vector<2x128xf32>
    %492 = math.exp %491 : vector<2x128xf32>
    %cst_125 = arith.constant 1.000000e+00 : f32
    %493 = vector.broadcast %cst_125 : f32 to vector<2x128xf32>
    %494 = arith.addf %493, %492 : vector<2x128xf32>
    %495 = arith.divf %493, %494 : vector<2x128xf32>
    %496 = arith.mulf %487, %437 : vector<2x128xf32>
    %497 = arith.mulf %481, %489 : vector<2x128xf32>
    %498 = arith.addf %496, %497 : vector<2x128xf32>
    %499 = math.tanh %498 : vector<2x128xf32>
    %500 = arith.mulf %495, %499 : vector<2x128xf32>
    %501 = arith.truncf %500 : vector<2x128xf32> to vector<2x128xbf16>
    %c0_126 = arith.constant 0 : index
    %c128_127 = arith.constant 128 : index
    %502 = vector.load %arg9[%c0_126, %c128_127] : memref<2x256xbf16, #tpu.memory_space<vmem>>, vector<2x128xbf16>
    tpu.vector_store %arg9[%c0_126, %c128_127], %501 {strides = array<i32>} : memref<2x256xbf16, #tpu.memory_space<vmem>>, vector<2x128xbf16>,
    %c0_128 = arith.constant 0 : index
    %c0_129 = arith.constant 0 : index
    %503 = vector.load %arg5[%c0_128, %c0_129] : memref<1x128xf32, #tpu.memory_space<vmem>>, vector<1x128xf32>
    %504 = vector.shape_cast %503 : vector<1x128xf32> to vector<1x128xf32>
    %505 = vector.broadcast %504 : vector<1x128xf32> to vector<2x128xf32>
    %506 = arith.mulf %500, %505 : vector<2x128xf32>
    %cst_130 = arith.constant dense<0.000000e+00> : vector<2xf32>
    %507 = vector.multi_reduction <add>, %506, %cst_130 [1] : vector<2x128xf32> to vector<2xf32>
    %508 = vector.shape_cast %507 : vector<2xf32> to vector<2x1xf32>
    %c0_131 = arith.constant 0 : index
    %c0_132 = arith.constant 0 : index
    %509 = vector.load %arg6[%c0_131, %c0_132] : memref<1x1xf32, #tpu.memory_space<vmem>>, vector<1x1xf32>
    %510 = vector.broadcast %509 : vector<1x1xf32> to vector<2x1xf32>
    %511 = arith.addf %508, %510 : vector<2x1xf32>
    %c0_133 = arith.constant 0 : index
    %c0_134 = arith.constant 0 : index
    %512 = vector.load %arg7[%c0_133, %c0_134] : memref<2x1xf32, #tpu.memory_space<vmem>>, vector<2x1xf32>
    tpu.vector_store %arg7[%c0_133, %c0_134], %511 {strides = array<i32>} : memref<2x1xf32, #tpu.memory_space<vmem>>, vector<2x1xf32>,
    return
  }
}

</mosaic_0001>

<bundles_post_ra>
// kernel: tpu_custom_call.1
= control target key start
LH: loop header
LB: loop body
LE: loop exit
PB: predicated region body
PF: predicated region fallthrough
CT: control target
= control target key end

     0   :  { %s5126_s0 = inlined_call_operand.vmem [shape: f32[16,4], index: 0, kind: input, shape index: {}]   ;;  %s5127_s1 = inlined_call_operand.vmem [shape: bf16[4,512], index: 1, kind: input, shape index: {}]   ;;  %s5128_s2 = inlined_call_operand.vmem [shape: f32[1,512], index: 2, kind: input, shape index: {}]   ;;  %s5129_s3 = inlined_call_operand.hbm [shape: bf16[256,1024], index: 3, kind: input, shape index: {}]   ;;  %s5130_s4 = inlined_call_operand.vmem [shape: f32[1,512], index: 4, kind: input, shape index: {}]   ;;  %s5131_s5 = inlined_call_operand.vmem [shape: f32[1,128], index: 5, kind: input, shape index: {}]   ;;  %s5132_s6 = inlined_call_operand.<no memory space> [shape: f32[1,1], index: 6, kind: input, shape index: {}]   ;;  %s5133_s7 = inlined_call_operand.vmem [shape: f32[2,1], index: 7, kind: output, shape index: {}]  }
   0x1   :  { %v12_v0 = vstv %s5132_s6 }
   0x2   :  { %13 = vst [vmem:[#allocation4] sm:$0x1] %v12_v0 }
   0x3   :  { %14 = vsyncpa [#allocation6], 0  ;;  %s3637_s26 = smov [#allocation5]   ;;  %s3613_s30 = scalar_lea.hbm %s5129_s3, 16384 }
   0x4   :  { %s26_s27 = sshll.u32 %s3637_s26, 4  ;;  %p3614_p0 = scmp.ne.s32.totalorder %s5129_s3, %s3613_s30  ;;  %s27_s27 = int_to_ptr.vmem [resolvable:$true] %s26_s27 }
   0x5   :  { %p3617_p1 = scmp.lt.u32.totalorder %s3613_s30, %s5129_s3 }
   0x7   :  { %p3619_p2 = pnand %p3617_p1, %p3614_p0 }
   0x9   :  { %3622 = shalt.err (!%p3619_p2)
}
   0xa   :  { %s3623_s6 = scalar_lea.vmem %s27_s27, 16384  ;;  %p3628_p4 = scmp.lt.s32.totalorder %s27_s27, %s27_s27 }
   0xb   :  { %p3624_p3 = scmp.ne.s32.totalorder %s27_s27, %s3623_s6  ;;  %p3629_p5 = scmp.lt.s32.totalorder %s3623_s6, %s3623_s6 }
   0xd   :  { %p3630_p6 = por %p3629_p5, %p3628_p4 }
   0xf   :  { %p3631_p7 = pnand %p3630_p6, %p3624_p3 }
  0x11   :  { %3634 = shalt.err (!%p3631_p7)
}
  0x12   :  { %s3638_s12 = smov 512   ;;  %s3639_s13 = smov 32  }
  0x13   :  { %32 = dma.hbm_to_vmem [thread:$0]  %s5129_s3, 16384, %s27_s27, [#allocation6], %s3638_s12, %s3638_s12, %s3639_s13  }
  0x14   :  { %3635 = dma.done.wait [#allocation6], 16384  }
  0x15   :  { %3636 = vsyncadd [#allocation6], 4294950912  ;;  %v49_v1 = vlaneseq  ;;  %v3640_v2 = vmov 1983009808   ;;  %v3641_v4 = vmov 0   ;;  %v46_v8 = vld [vmem:[%s5127_s1] sm:$0xff] }
  0x16   :  { %v72_v3 = vunpack.c.l.s4 %v3640_v2  ;;  %136 = vmatprep.mubr.bf16.mxu0 %v3641_v4  ;;  %378 = vst [vmem:[#allocation3 + $0x1] sm:$0x1] %v3641_v4  ;;  %179 = vmatprep.mubr.bf16.mxu1 %v3641_v4  ;;  %vm91_vm0 = vcmask 1041408   ;;  %v70_v10 = vcombine.high %v46_v8, %v46_v8  ;;  %v43_v11 = vld [vmem:[%s5126_s0] sm:$0xff]  ;;  %v44_v12 = vld [vmem:[%s5126_s0 + $0x8] sm:$0xff]  ;;  %vm87_vm1 = vcmask 31744  }
  0x17   :  { %v3698_v5 = vshrl.u32 %v49_v1, 7  ;;  %v45_v16 = vpack.c.bf16 %v44_v12, %v43_v11  ;;  %v198_v19 = vld [vmem:[#allocation5] sm:$0xff]  ;;  %v199_v21 = vld [vmem:[#allocation5 + $0x8] sm:$0xff]  ;;  %vm3151_vm2 = vcmask 1024  }
  0x18   :  { %v73_v6 = vunpack.c.0.s8 %v72_v3  ;;  %v202_v20 = vld [vmem:[#allocation5 + $0x20] sm:$0xff]  ;;  %v203_v23 = vld [vmem:[#allocation5 + $0x28] sm:$0xff] }
  0x19   :  { %v3714_v22 = vcombine.high %v198_v19, %v202_v20  ;;  %v3716_v24 = vcombine.high %v199_v21, %v203_v23  ;;  %v3718_v25 = vcombine.low %v198_v19, %v202_v20  ;;  %v3720_v26 = vcombine.low %v199_v21, %v203_v23  ;;  %v206_v27 = vld [vmem:[#allocation5 + $0x40] sm:$0xff]  ;;  %v207_v29 = vld [vmem:[#allocation5 + $0x48] sm:$0xff] }
  0x1a   :  { %v76_v7 = vsub.s32 %v73_v6, %v3698_v5  ;;  %v210_v28 = vld [vmem:[#allocation5 + $0x60] sm:$0xff]  ;;  %v211_v31 = vld [vmem:[#allocation5 + $0x68] sm:$0xff] }
  0x1b   :  { %5422 = vst [vmem:[#allocation8_spill] sm:$0xff] %v3714_v22  ;;  %5423 = vst [vmem:[#allocation9_spill] sm:$0xff] %v3716_v24  ;;  %v3726_v30 = vcombine.high %v206_v27, %v210_v28  ;;  %v3728_v32 = vcombine.high %v207_v29, %v211_v31  ;;  %v3730_v33 = vcombine.low %v206_v27, %v210_v28  ;;  %v214_v35 = vld [vmem:[#allocation5 + $0x80] sm:$0xff]  ;;  %v215_v37 = vld [vmem:[#allocation5 + $0x88] sm:$0xff] }
  0x1c   :  { %v77_v9 = vrot.slane %v46_v8, %v76_v7  ;;  %v84_v15 = vrot.slane %v70_v10, %v76_v7  ;;  %5424 = vst [vmem:[#allocation10_spill] sm:$0xff] %v3718_v25  ;;  %5425 = vst [vmem:[#allocation11_spill] sm:$0xff] %v3720_v26  ;;  %v3732_v34 = vcombine.low %v207_v29, %v211_v31  ;;  %v218_v36 = vld [vmem:[#allocation5 + $0xa0] sm:$0xff]  ;;  %v219_v39 = vld [vmem:[#allocation5 + $0xa8] sm:$0xff] }
  0x1d   :  { %5426 = vst [vmem:[#allocation12_spill] sm:$0xff] %v3726_v30  ;;  %5427 = vst [vmem:[#allocation13_spill] sm:$0xff] %v3728_v32  ;;  %v3738_v38 = vcombine.high %v214_v35, %v218_v36  ;;  %v3740_v40 = vcombine.high %v215_v37, %v219_v39  ;;  %v3742_v41 = vcombine.low %v214_v35, %v218_v36  ;;  %v222_v43 = vld [vmem:[#allocation5 + $0xc0] sm:$0xff]  ;;  %v223_v45 = vld [vmem:[#allocation5 + $0xc8] sm:$0xff] }
  0x1e   :  { %v85_v13 = vcombine.high %v77_v9, %v77_v9  ;;  %v93_v14 = vsel %vm91_vm0, %v77_v9, 0  ;;  %v86_v17 = vcombine.high %v84_v15, %v84_v15  ;;  %v99_v18 = vsel %vm91_vm0, %v84_v15, 0  ;;  %5428 = vst [vmem:[#allocation14_spill] sm:$0xff] %v3730_v33  ;;  %5429 = vst [vmem:[#allocation15_spill] sm:$0xff] %v3732_v34  ;;  %v226_v44 = vld [vmem:[#allocation5 + $0xe0] sm:$0xff]  ;;  %v227_v47 = vld [vmem:[#allocation5 + $0xe8] sm:$0xff] }
  0x1f   :  { %5430 = vst [vmem:[#allocation16_spill] sm:$0xff] %v3738_v38  ;;  %5431 = vst [vmem:[#allocation17_spill] sm:$0xff] %v3740_v40  ;;  %v3745_v42 = vcombine.low %v215_v37, %v219_v39  ;;  %v3750_v46 = vcombine.high %v222_v43, %v226_v44  ;;  %v3752_v48 = vcombine.high %v223_v45, %v227_v47  ;;  %v230_v51 = vld [vmem:[#allocation5 + $0x100] sm:$0xff]  ;;  %v231_v53 = vld [vmem:[#allocation5 + $0x108] sm:$0xff] }
  0x20   :  { %3158 = vmatprep.subr.msk.bf16.mxu0 %vm91_vm0, %v85_v13  ;;  %3160 = vmatprep.subr.msk.bf16.mxu1 %vm91_vm0, %v86_v17  ;;  %5432 = vst [vmem:[#allocation18_spill] sm:$0xff] %v3742_v41  ;;  %v3754_v49 = vcombine.low %v222_v43, %v226_v44  ;;  %v3756_v50 = vcombine.low %v223_v45, %v227_v47  ;;  %v234_v52 = vld [vmem:[#allocation5 + $0x120] sm:$0xff]  ;;  %v235_v55 = vld [vmem:[#allocation5 + $0x128] sm:$0xff] }
  0x21   :  { %105 = vmatpush1.bf16.msra.mxu0 %v93_v14  ;;  %148 = vmatpush1.bf16.msra.mxu1 %v99_v18  ;;  %5433 = vst [vmem:[#allocation19_spill] sm:$0xff] %v3745_v42  ;;  %5434 = vst [vmem:[#allocation20_spill] sm:$0xff] %v3750_v46  ;;  %v3762_v54 = vcombine.high %v230_v51, %v234_v52  ;;  %v3764_v56 = vcombine.high %v231_v53, %v235_v55  ;;  %v238_v59 = vld [vmem:[#allocation5 + $0x140] sm:$0xff]  ;;  %v239_v61 = vld [vmem:[#allocation5 + $0x148] sm:$0xff] }
  0x22   :  { %1045 = vmatprep.subr.bf16.mxu0 %v3714_v22  ;;  %1086 = vmatprep.subr.bf16.mxu1 %v3716_v24  ;;  %5435 = vst [vmem:[#allocation21_spill] sm:$0xff] %v3752_v48  ;;  %5436 = vst [vmem:[#allocation22_spill] sm:$0xff] %v3754_v49  ;;  %v3766_v57 = vcombine.low %v230_v51, %v234_v52  ;;  %v3768_v58 = vcombine.low %v231_v53, %v235_v55  ;;  %v242_v60 = vld [vmem:[#allocation5 + $0x160] sm:$0xff]  ;;  %v243_v63 = vld [vmem:[#allocation5 + $0x168] sm:$0xff] }
  0x23   :  { %5437 = vst [vmem:[#allocation23_spill] sm:$0xff] %v3756_v50  ;;  %5438 = vst [vmem:[#allocation24_spill] sm:$0xff] %v3762_v54  ;;  %v3774_v62 = vcombine.high %v238_v59, %v242_v60  ;;  %v3776_v0 = vcombine.high %v239_v61, %v243_v63  ;;  %v3778_v1 = vcombine.low %v238_v59, %v242_v60  ;;  %v246_v3 = vld [vmem:[#allocation5 + $0x180] sm:$0xff]  ;;  %v247_v6 = vld [vmem:[#allocation5 + $0x188] sm:$0xff] }
  0x24   :  { %3159 = vmatmul.mubr.msk.bf16.vlgmr.msra.gmra.mrb[0].mxu0 %vm87_vm1, %v45_v16  ;;  %3161 = vmatmul.mubr.msk.bf16.vlgmr.msra.gmra.mrb[0].mxu1 %vm87_vm1, %v45_v16  ;;  %5439 = vst [vmem:[#allocation25_spill] sm:$0xff] %v3764_v56  ;;  %5440 = vst [vmem:[#allocation26_spill] sm:$0xff] %v3766_v57  ;;  %v3780_v2 = vcombine.low %v239_v61, %v243_v63  ;;  %v250_v4 = vld [vmem:[#allocation5 + $0x1a0] sm:$0xff]  ;;  %v251_v8 = vld [vmem:[#allocation5 + $0x1a8] sm:$0xff] }
  0x25   :  { %1046 = vmatpush1.bf16.msra.mxu0 %v3718_v25  ;;  %1087 = vmatpush1.bf16.msra.mxu1 %v3720_v26  ;;  %5441 = vst [vmem:[#allocation27_spill] sm:$0xff] %v3768_v58  ;;  %5442 = vst [vmem:[#allocation28_spill] sm:$0xff] %v3774_v62  ;;  %v3786_v7 = vcombine.high %v246_v3, %v250_v4  ;;  %v3788_v9 = vcombine.high %v247_v6, %v251_v8  ;;  %v254_v12 = vld [vmem:[#allocation5 + $0x1c0] sm:$0xff]  ;;  %v255_v14 = vld [vmem:[#allocation5 + $0x1c8] sm:$0xff] }
  0x26   :  { %1047 = vmatprep.subr.bf16.mxu0 %v3726_v30  ;;  %1088 = vmatprep.subr.bf16.mxu1 %v3728_v32  ;;  %5443 = vst [vmem:[#allocation29_spill] sm:$0xff] %v3776_v0  ;;  %5444 = vst [vmem:[#allocation30_spill] sm:$0xff] %v3778_v1  ;;  %v3790_v10 = vcombine.low %v246_v3, %v250_v4  ;;  %v3792_v11 = vcombine.low %v247_v6, %v251_v8  ;;  %v258_v13 = vld [vmem:[#allocation5 + $0x1e0] sm:$0xff]  ;;  %v259_v16 = vld [vmem:[#allocation5 + $0x1e8] sm:$0xff] }
  0x27   :  { %5445 = vst [vmem:[#allocation31_spill] sm:$0xff] %v3780_v2  ;;  %5446 = vst [vmem:[#allocation32_spill] sm:$0xff] %v3786_v7  ;;  %v3798_v15 = vcombine.high %v254_v12, %v258_v13  ;;  %v3800_v17 = vcombine.high %v255_v14, %v259_v16  ;;  %v3802_v18 = vcombine.low %v254_v12, %v258_v13  ;;  %v262_v20 = vld [vmem:[#allocation5 + $0x200] sm:$0xff]  ;;  %v263_v23 = vld [vmem:[#allocation5 + $0x208] sm:$0xff] }
  0x28   :  { %5447 = vst [vmem:[#allocation33_spill] sm:$0xff] %v3788_v9  ;;  %5448 = vst [vmem:[#allocation34_spill] sm:$0xff] %v3790_v10  ;;  %v3804_v19 = vcombine.low %v255_v14, %v259_v16  ;;  %v266_v21 = vld [vmem:[#allocation5 + $0x220] sm:$0xff]  ;;  %v267_v28 = vld [vmem:[#allocation5 + $0x228] sm:$0xff] }
  0x29   :  { %1048 = vmatpush1.bf16.msra.mxu0 %v3730_v33  ;;  %1089 = vmatpush1.bf16.msra.mxu1 %v3732_v34  ;;  %5449 = vst [vmem:[#allocation35_spill] sm:$0xff] %v3792_v11  ;;  %5450 = vst [vmem:[#allocation36_spill] sm:$0xff] %v3798_v15  ;;  %v3810_v27 = vcombine.high %v262_v20, %v266_v21  ;;  %v3812_v29 = vcombine.high %v263_v23, %v267_v28  ;;  %v270_v36 = vld [vmem:[#allocation5 + $0x240] sm:$0xff]  ;;  %v271_v39 = vld [vmem:[#allocation5 + $0x248] sm:$0xff] }
  0x2a   :  { %1049 = vmatprep.subr.bf16.mxu0 %v3738_v38  ;;  %1090 = vmatprep.subr.bf16.mxu1 %v3740_v40  ;;  %5451 = vst [vmem:[#allocation37_spill] sm:$0xff] %v3800_v17  ;;  %5452 = vst [vmem:[#allocation38_spill] sm:$0xff] %v3802_v18  ;;  %v3814_v31 = vcombine.low %v262_v20, %v266_v21  ;;  %v3816_v35 = vcombine.low %v263_v23, %v267_v28  ;;  %v274_v37 = vld [vmem:[#allocation5 + $0x260] sm:$0xff]  ;;  %v275_v44 = vld [vmem:[#allocation5 + $0x268] sm:$0xff] }
  0x2b   :  { %5453 = vst [vmem:[#allocation39_spill] sm:$0xff] %v3804_v19  ;;  %5454 = vst [vmem:[#allocation40_spill] sm:$0xff] %v3810_v27  ;;  %v3822_v43 = vcombine.high %v270_v36, %v274_v37  ;;  %v3824_v45 = vcombine.high %v271_v39, %v275_v44  ;;  %v3826_v47 = vcombine.low %v270_v36, %v274_v37  ;;  %v278_v52 = vld [vmem:[#allocation5 + $0x280] sm:$0xff]  ;;  %v279_v55 = vld [vmem:[#allocation5 + $0x288] sm:$0xff] }
  0x2c   :  { %5455 = vst [vmem:[#allocation41_spill] sm:$0xff] %v3812_v29  ;;  %5456 = vst [vmem:[#allocation42_spill] sm:$0xff] %v3814_v31  ;;  %v3828_v51 = vcombine.low %v271_v39, %v275_v44  ;;  %v282_v53 = vld [vmem:[#allocation5 + $0x2a0] sm:$0xff]  ;;  %v283_v60 = vld [vmem:[#allocation5 + $0x2a8] sm:$0xff] }
  0x2d   :  { %1050 = vmatpush1.bf16.msra.mxu0 %v3742_v41  ;;  %1091 = vmatpush1.bf16.msra.mxu1 %v3745_v42  ;;  %5457 = vst [vmem:[#allocation43_spill] sm:$0xff] %v3816_v35  ;;  %5458 = vst [vmem:[#allocation44_spill] sm:$0xff] %v3822_v43  ;;  %v3834_v59 = vcombine.high %v278_v52, %v282_v53  ;;  %v3836_v61 = vcombine.high %v279_v55, %v283_v60  ;;  %v286_v4 = vld [vmem:[#allocation5 + $0x2c0] sm:$0xff]  ;;  %v287_v8 = vld [vmem:[#allocation5 + $0x2c8] sm:$0xff] }
  0x2e   :  { %1051 = vmatprep.subr.bf16.mxu0 %v3750_v46  ;;  %1092 = vmatprep.subr.bf16.mxu1 %v3752_v48  ;;  %5459 = vst [vmem:[#allocation45_spill] sm:$0xff] %v3824_v45  ;;  %5460 = vst [vmem:[#allocation46_spill] sm:$0xff] %v3826_v47  ;;  %v3838_v63 = vcombine.low %v278_v52, %v282_v53  ;;  %v3840_v3 = vcombine.low %v279_v55, %v283_v60  ;;  %v290_v6 = vld [vmem:[#allocation5 + $0x2e0] sm:$0xff]  ;;  %v291_v13 = vld [vmem:[#allocation5 + $0x2e8] sm:$0xff] }
  0x2f   :  { %5461 = vst [vmem:[#allocation47_spill] sm:$0xff] %v3828_v51  ;;  %5462 = vst [vmem:[#allocation48_spill] sm:$0xff] %v3834_v59  ;;  %v3846_v12 = vcombine.high %v286_v4, %v290_v6  ;;  %v3848_v14 = vcombine.high %v287_v8, %v291_v13  ;;  %v3850_v16 = vcombine.low %v286_v4, %v290_v6  ;;  %v294_v21 = vld [vmem:[#allocation5 + $0x300] sm:$0xff]  ;;  %v295_v28 = vld [vmem:[#allocation5 + $0x308] sm:$0xff] }
  0x30   :  { %5463 = vst [vmem:[#allocation49_spill] sm:$0xff] %v3836_v61  ;;  %5464 = vst [vmem:[#allocation50_spill] sm:$0xff] %v3838_v63  ;;  %v3852_v20 = vcombine.low %v287_v8, %v291_v13  ;;  %v298_v23 = vld [vmem:[#allocation5 + $0x320] sm:$0xff]  ;;  %v299_v37 = vld [vmem:[#allocation5 + $0x328] sm:$0xff] }
  0x31   :  { %1052 = vmatpush1.bf16.msra.mxu0 %v3754_v49  ;;  %1093 = vmatpush1.bf16.msra.mxu1 %v3756_v50  ;;  %5465 = vst [vmem:[#allocation51_spill] sm:$0xff] %v3840_v3  ;;  %5466 = vst [vmem:[#allocation52_spill] sm:$0xff] %v3846_v12  ;;  %v3858_v36 = vcombine.high %v294_v21, %v298_v23  ;;  %v3860_v39 = vcombine.high %v295_v28, %v299_v37  ;;  %v302_v53 = vld [vmem:[#allocation5 + $0x340] sm:$0xff]  ;;  %v303_v60 = vld [vmem:[#allocation5 + $0x348] sm:$0xff] }
  0x32   :  { %1053 = vmatprep.subr.bf16.mxu0 %v3762_v54  ;;  %1094 = vmatprep.subr.bf16.mxu1 %v3764_v56  ;;  %5467 = vst [vmem:[#allocation53_spill] sm:$0xff] %v3848_v14  ;;  %5468 = vst [vmem:[#allocation54_spill] sm:$0xff] %v3850_v16  ;;  %v3862_v44 = vcombine.low %v294_v21, %v298_v23  ;;  %v3864_v52 = vcombine.low %v295_v28, %v299_v37  ;;  %v306_v55 = vld [vmem:[#allocation5 + $0x360] sm:$0xff]  ;;  %v307_v6 = vld [vmem:[#allocation5 + $0x368] sm:$0xff] }
  0x33   :  { %5469 = vst [vmem:[#allocation55_spill] sm:$0xff] %v3852_v20  ;;  %5470 = vst [vmem:[#allocation56_spill] sm:$0xff] %v3858_v36  ;;  %v3870_v4 = vcombine.high %v302_v53, %v306_v55  ;;  %v3872_v8 = vcombine.high %v303_v60, %v307_v6  ;;  %v3874_v13 = vcombine.low %v302_v53, %v306_v55  ;;  %v310_v23 = vld [vmem:[#allocation5 + $0x380] sm:$0xff]  ;;  %v311_v37 = vld [vmem:[#allocation5 + $0x388] sm:$0xff] }
  0x34   :  { %5471 = vst [vmem:[#allocation57_spill] sm:$0xff] %v3860_v39  ;;  %5472 = vst [vmem:[#allocation58_spill] sm:$0xff] %v3862_v44  ;;  %v3876_v21 = vcombine.low %v303_v60, %v307_v6  ;;  %v314_v28 = vld [vmem:[#allocation5 + $0x3a0] sm:$0xff]  ;;  %v319_v6 = vld [vmem:[#allocation5 + $0x3c8] sm:$0xff] }
  0x35   :  { %1054 = vmatpush1.bf16.msra.mxu0 %v3766_v57  ;;  %1095 = vmatpush1.bf16.msra.mxu1 %v3768_v58  ;;  %5473 = vst [vmem:[#allocation59_spill] sm:$0xff] %v3864_v52  ;;  %5474 = vst [vmem:[#allocation60_spill] sm:$0xff] %v3870_v4 }
  0x36   :  { %1055 = vmatprep.subr.bf16.mxu0 %v3774_v62  ;;  %1096 = vmatprep.subr.bf16.mxu1 %v3776_v0  ;;  %5475 = vst [vmem:[#allocation61_spill] sm:$0xff] %v3872_v8  ;;  %5476 = vst [vmem:[#allocation62_spill] sm:$0xff] %v3874_v13 }
  0x37   :  { %5477 = vst [vmem:[#allocation63_spill] sm:$0xff] %v3876_v21 }
  0x39   :  { %1056 = vmatpush1.bf16.msra.mxu0 %v3778_v1  ;;  %1097 = vmatpush1.bf16.msra.mxu1 %v3780_v2 }
  0x3a   :  { %1057 = vmatprep.subr.bf16.mxu0 %v3786_v7  ;;  %1098 = vmatprep.subr.bf16.mxu1 %v3788_v9 }
  0x3d   :  { %1058 = vmatpush1.bf16.msra.mxu0 %v3790_v10  ;;  %1099 = vmatpush1.bf16.msra.mxu1 %v3792_v11 }
  0x3e   :  { %1059 = vmatprep.subr.bf16.mxu0 %v3798_v15  ;;  %1100 = vmatprep.subr.bf16.mxu1 %v3800_v17 }
  0x41   :  { %1060 = vmatpush1.bf16.msra.mxu0 %v3802_v18  ;;  %1101 = vmatpush1.bf16.msra.mxu1 %v3804_v19 }
  0x42   :  { %1061 = vmatprep.subr.bf16.mxu0 %v3810_v27  ;;  %1102 = vmatprep.subr.bf16.mxu1 %v3812_v29 }
  0x45   :  { %1062 = vmatpush1.bf16.msra.mxu0 %v3814_v31  ;;  %1103 = vmatpush1.bf16.msra.mxu1 %v3816_v35 }
  0x46   :  { %1063 = vmatprep.subr.bf16.mxu0 %v3822_v43  ;;  %1104 = vmatprep.subr.bf16.mxu1 %v3824_v45 }
  0x49   :  { %1064 = vmatpush1.bf16.msra.mxu0 %v3826_v47  ;;  %1105 = vmatpush1.bf16.msra.mxu1 %v3828_v51 }
  0x4a   :  { %1065 = vmatprep.subr.bf16.mxu0 %v3834_v59  ;;  %1106 = vmatprep.subr.bf16.mxu1 %v3836_v61 }
  0x4d   :  { %1066 = vmatpush1.bf16.msra.mxu0 %v3838_v63  ;;  %1107 = vmatpush1.bf16.msra.mxu1 %v3840_v3 }
  0x4e   :  { %1067 = vmatprep.subr.bf16.mxu0 %v3846_v12  ;;  %1108 = vmatprep.subr.bf16.mxu1 %v3848_v14 }
  0x51   :  { %1068 = vmatpush1.bf16.msra.mxu0 %v3850_v16  ;;  %1109 = vmatpush1.bf16.msra.mxu1 %v3852_v20  ;;  %v322_v20 = vld [vmem:[#allocation5 + $0x3e0] sm:$0xff] }
  0x52   :  { %1069 = vmatprep.subr.bf16.mxu0 %v3858_v36  ;;  %1110 = vmatprep.subr.bf16.mxu1 %v3860_v39  ;;  %v3883_v39 = vcombine.low %v310_v23, %v314_v28  ;;  %v318_v36 = vld [vmem:[#allocation5 + $0x3c0] sm:$0xff] }
  0x53   :  { %v3890_v60 = vcombine.high %v318_v36, %v322_v20 }
  0x54   :  { %5479 = vst [vmem:[#allocation65_spill] sm:$0xff] %v3883_v39 }
  0x55   :  { %1070 = vmatpush1.bf16.msra.mxu0 %v3862_v44  ;;  %1111 = vmatpush1.bf16.msra.mxu1 %v3864_v52  ;;  %v3881_v44 = vcombine.high %v310_v23, %v314_v28  ;;  %v315_v52 = vld [vmem:[#allocation5 + $0x3a8] sm:$0xff]  ;;  %5482 = vst [vmem:[#allocation68_spill] sm:$0xff] %v3890_v60  ;;  %v3897_v23 = vcombine.low %v318_v36, %v322_v20  ;;  %v200_v28 = vld [vmem:[#allocation5 + $0x10] sm:$0xff] }
  0x56   :  { %1071 = vmatprep.subr.bf16.mxu0 %v3870_v4  ;;  %1112 = vmatprep.subr.bf16.mxu1 %v3872_v8  ;;  %v3886_v53 = vcombine.high %v311_v37, %v315_v52  ;;  %v3888_v55 = vcombine.low %v311_v37, %v315_v52  ;;  %v323_v4 = vld [vmem:[#allocation5 + $0x3e8] sm:$0xff]  ;;  %v204_v37 = vld [vmem:[#allocation5 + $0x30] sm:$0xff] }
  0x57   :  { %5478 = vst [vmem:[#allocation64_spill] sm:$0xff] %v3881_v44  ;;  %5484 = vst [vmem:[#allocation70_spill] sm:$0xff] %v3897_v23  ;;  %v3901_v52 = vcombine.low %v319_v6, %v323_v4  ;;  %v3910_v36 = vcombine.low %v200_v28, %v204_v37 }
  0x58   :  { %5480 = vst [vmem:[#allocation66_spill] sm:$0xff] %v3886_v53  ;;  %5481 = vst [vmem:[#allocation67_spill] sm:$0xff] %v3888_v55 }
  0x59   :  { %1072 = vmatpush1.bf16.msra.mxu0 %v3874_v13  ;;  %1113 = vmatpush1.bf16.msra.mxu1 %v3876_v21  ;;  %v3893_v13 = vcombine.high %v319_v6, %v323_v4  ;;  %5485 = vst [vmem:[#allocation71_spill] sm:$0xff] %v3901_v52  ;;  %5488 = vst [vmem:[#allocation74_spill] sm:$0xff] %v3910_v36  ;;  %v5180_v6 = vsub.s32 0, %v3698_v5 }
  0x5a   :  { %1073 = vmatprep.subr.bf16.mxu0 %v3881_v44  ;;  %1114 = vmatprep.subr.bf16.mxu1 %v3886_v53  ;;  %v201_v44 = vld [vmem:[#allocation5 + $0x18] sm:$0xff]  ;;  %v3906_v53 = vcombine.high %v200_v28, %v204_v37 }
  0x5b   :  { %5483 = vst [vmem:[#allocation69_spill] sm:$0xff] %v3893_v13 }
  0x5c   :  { %5486 = vst [vmem:[#allocation72_spill] sm:$0xff] %v3906_v53 }
  0x5d   :  { %1074 = vmatpush1.bf16.msra.mxu0 %v3883_v39  ;;  %1115 = vmatpush1.bf16.msra.mxu1 %v3888_v55  ;;  %v205_v39 = vld [vmem:[#allocation5 + $0x38] sm:$0xff] }
  0x5e   :  { %1075 = vmatprep.subr.bf16.mxu0 %v3890_v60  ;;  %1116 = vmatprep.subr.bf16.mxu1 %v3893_v13  ;;  %v3908_v20 = vcombine.high %v201_v44, %v205_v39  ;;  %v3913_v4 = vcombine.low %v201_v44, %v205_v39  ;;  %v5186_v13 = vsub.s32 2, %v3698_v5  ;;  %v5189_v60 = vsub.s32 3, %v3698_v5 }
  0x60   :  { %5487 = vst [vmem:[#allocation73_spill] sm:$0xff] %v3908_v20  ;;  %5489 = vst [vmem:[#allocation75_spill] sm:$0xff] %v3913_v4 }
  0x61   :  { %1076 = vmatpush1.bf16.msra.mxu0 %v3897_v23  ;;  %1117 = vmatpush1.bf16.msra.mxu1 %v3901_v52  ;;  %v47_v23 = vld [vmem:[%s5128_s2] sm:$0xf]  ;;  %v5183_v52 = vsub.s32 1, %v3698_v5 }
  0x62   :  { %1127 = vmatprep.subr.bf16.mxu0 %v3906_v53  ;;  %1168 = vmatprep.subr.bf16.mxu1 %v3908_v20  ;;  %v52_v28 = vrot.slane %v47_v23, %v5180_v6  ;;  %v60_v44 = vrot.slane %v47_v23, %v5186_v13  ;;  %v64_v20 = vrot.slane %v47_v23, %v5189_v60  ;;  %v225_v60 = vld [vmem:[#allocation5 + $0xd8] sm:$0xff] }
  0x63   :  { %v56_v39 = vrot.slane %v47_v23, %v5183_v52 }
  0xf7   :  { %v138_v37 = vpop.f32.mrb[0].mxu0  ;;  %v181_v16 = vpop.f32.mrb[0].mxu1 }
  0xf8   :  { %v139_v53 = vadd.f32 %v138_v37, %v52_v28  ;;  %v140_v55 = vpop.f32.mrb[1].mxu0  ;;  %v182_v3 = vadd.f32 %v181_v16, %v60_v44  ;;  %v183_v6 = vpop.f32.mrb[1].mxu1 }
  0xf9   :  { %v141_v21 = vadd.f32 %v140_v55, %v56_v39  ;;  %v142_v8 = vpop.f32.mrb[2].mxu0  ;;  %v184_v52 = vadd.f32 %v183_v6, %v64_v20  ;;  %v185_v61 = vpop.f32.mrb[2].mxu1 }
  0xfa   :  { %190 = vst [vmem:[#allocation2] sm:$0xff] %v139_v53  ;;  %v143_v14 = vadd.f32 %v142_v8, %v52_v28  ;;  %v144_v12 = vpop.f32.mrb[3].mxu0  ;;  %192 = vst [vmem:[#allocation2 + $0x10] sm:$0xff] %v182_v3  ;;  %v186_v13 = vadd.f32 %v185_v61, %v60_v44  ;;  %v187_v59 = vpop.f32.mrb[3].mxu1 }
  0xfb   :  { %191 = vst [vmem:[#allocation2 + $0x8] sm:$0xff] %v141_v21  ;;  %v145_v63 = vadd.f32 %v144_v12, %v56_v39  ;;  %193 = vst [vmem:[#allocation2 + $0x18] sm:$0xff] %v184_v52  ;;  %v188_v23 = vadd.f32 %v187_v59, %v64_v20 }
  0xfc   :  { %194 = vst [vmem:[#allocation2 + $0x20] sm:$0xff] %v143_v14  ;;  %196 = vst [vmem:[#allocation2 + $0x30] sm:$0xff] %v186_v13 }
  0xfd   :  { %195 = vst [vmem:[#allocation2 + $0x28] sm:$0xff] %v145_v63  ;;  %197 = vst [vmem:[#allocation2 + $0x38] sm:$0xff] %v188_v23 }
 0x101   :  { %v348_v55 = vld [vmem:[#allocation2] sm:$0x3]  ;;  %v350_v12 = vld [vmem:[#allocation2 + $0x10] sm:$0x3] }
 0x102   :  { %v3162_v37 = vmul.f32 -1.442695, %v348_v55  ;;  %v349_v53 = vld [vmem:[#allocation2 + $0x8] sm:$0x3]  ;;  %v351_v16 = vld [vmem:[#allocation2 + $0x18] sm:$0x3] }
 0x103   :  { %v3163_v8 = vmul.f32 -1.442695, %v349_v53  ;;  %v3164_v21 = vmul.f32 -1.442695, %v351_v16 }
 0x104   :  { %3357 = vpow2.f32 %v3162_v37 }
 0x105   :  { %3359 = vpow2.f32 %v3163_v8  ;;  %v3642_v8 = vmov 1966171168  }
 0x106   :  { %3361 = vpow2.f32 %v3164_v21  ;;  %v390_v16 = vunpack.c.l.s4 %v3642_v8 }
 0x107   :  { %3363 = vtanh.f32 %v350_v12 }
 0x108   :  { %v391_v21 = vunpack.c.0.s8 %v390_v16 }
 0x10a   :  { %v3935_v12 = vsub.s32 %v391_v21, %v3698_v5 }
 0x10c   :  { %5490 = vst [vmem:[#allocation76_spill] sm:$0xff] %v3935_v12 }
 0x10e   :  { %v3358_v6 = vpop.eup %3357 }
 0x10f   :  { %v3360_v14 = vpop.eup %3359  ;;  %v355_v3 = vadd.f32 1.0, %v3358_v6 }
 0x110   :  { %v361_v61 = vadd.f32 1.0, %v3360_v14  ;;  %v3362_v59 = vpop.eup %3361 }
 0x111   :  { %3365 = vrcp.f32 %v355_v3  ;;  %v3364_v63 = vpop.eup %3363  ;;  %v368_v52 = vadd.f32 1.0, %v3362_v59  ;;  %v208_v3 = vld [vmem:[#allocation5 + $0x50] sm:$0xff]  ;;  %v209_v59 = vld [vmem:[#allocation5 + $0x58] sm:$0xff] }
 0x112   :  { %3367 = vrcp.f32 %v361_v61  ;;  %v212_v61 = vld [vmem:[#allocation5 + $0x70] sm:$0xff] }
 0x113   :  { %3369 = vrcp.f32 %v368_v52 }
 0x11b   :  { %v3366_v13 = vpop.eup %3365 }
 0x11c   :  { %v3368_v20 = vpop.eup %3367  ;;  %v372_v28 = vmul.f32 %v3366_v13, %v3364_v63  ;;  %v213_v63 = vld [vmem:[#allocation5 + $0x78] sm:$0xff] }
 0x11d   :  { %v371_v39 = vmul.f32 0.0, %v3368_v20  ;;  %v3370_v23 = vpop.eup %3369  ;;  %v216_v20 = vld [vmem:[#allocation5 + $0x90] sm:$0xff]  ;;  %v3951_v8 = vcombine.low %v209_v59, %v213_v63 }
 0x11f   :  { %v3931_v44 = vadd.f32 %v372_v28, %v371_v39  ;;  %v3941_v28 = vcombine.high %v208_v3, %v212_v61  ;;  %v3943_v39 = vcombine.high %v209_v59, %v213_v63  ;;  %5494 = vst [vmem:[#allocation80_spill] sm:$0xff] %v3951_v8 }
 0x121   :  { %3371 = vtanh.f32 %v3931_v44  ;;  %5491 = vst [vmem:[#allocation77_spill] sm:$0xff] %v3941_v28  ;;  %5492 = vst [vmem:[#allocation78_spill] sm:$0xff] %v3943_v39 }
 0x12b   :  { %v3372_v55 = vpop.eup %3371 }
 0x12c   :  { %v375_v37 = vmul.f32 %v3372_v55, %v3370_v23  ;;  %v220_v23 = vld [vmem:[#allocation5 + $0xb0] sm:$0xff]  ;;  %v217_v55 = vld [vmem:[#allocation5 + $0x98] sm:$0xff] }
 0x12d   :  { %v3953_v16 = vcombine.high %v216_v20, %v220_v23 }
 0x12e   :  { %v376_v53 = vpack.c.bf16 %v375_v37, %v375_v37  ;;  %v221_v37 = vld [vmem:[#allocation5 + $0xb8] sm:$0xff] }
 0x12f   :  { %5495 = vst [vmem:[#allocation81_spill] sm:$0xff] %v3953_v16  ;;  %v3955_v21 = vcombine.high %v217_v55, %v221_v37 }
 0x130   :  { %377 = vst [vmem:[#allocation3] sm:$0x1] %v376_v53  ;;  %v3949_v53 = vcombine.low %v208_v3, %v212_v61  ;;  %v3961_v3 = vcombine.low %v216_v20, %v220_v23  ;;  %v3963_v61 = vcombine.low %v217_v55, %v221_v37 }
 0x131   :  { %5496 = vst [vmem:[#allocation82_spill] sm:$0xff] %v3955_v21 }
 0x132   :  { %5493 = vst [vmem:[#allocation79_spill] sm:$0xff] %v3949_v53  ;;  %5497 = vst [vmem:[#allocation83_spill] sm:$0xff] %v3961_v3 }
 0x133   :  { %5498 = vst [vmem:[#allocation84_spill] sm:$0xff] %v3963_v61 }
 0x137   :  { %v3165_v6 = vld.sshfl [vmem:[#allocation3] sm:$0x11 pattern:$0x75316420] }
 0x138   :  { %v388_v14 = vcombine.high %v3165_v6, %v3165_v6  ;;  %v3939_v52 = vrot.slane %v3165_v6, %v3935_v12  ;;  %v224_v6 = vld [vmem:[#allocation5 + $0xd0] sm:$0xff] }
 0x13a   :  { %v402_v13 = vrot.slane %v388_v14, %v3935_v12  ;;  %v228_v14 = vld [vmem:[#allocation5 + $0xf0] sm:$0xff] }
 0x13b   :  { %v3967_v59 = vcombine.high %v224_v6, %v228_v14  ;;  %v3973_v20 = vcombine.low %v224_v6, %v228_v14 }
 0x13c   :  { %1077 = vmatprep.mubr.bf16.mxu0 %v402_v13  ;;  %1118 = vmatprep.mubr.bf16.mxu1 %v402_v13 }
 0x13d   :  { %1078 = vmatmul.mubr.bf16.vlgmr.msra.gmra.mrb[4].mxu0 %v3939_v52  ;;  %1119 = vmatmul.mubr.bf16.vlgmr.msra.gmra.mrb[4].mxu1 %v3939_v52  ;;  %5499 = vst [vmem:[#allocation85_spill] sm:$0xff] %v3967_v59  ;;  %5501 = vst [vmem:[#allocation87_spill] sm:$0xff] %v3973_v20 }
 0x13e   :  { %1128 = vmatpush1.bf16.msra.mxu0 %v3910_v36  ;;  %1169 = vmatpush1.bf16.msra.mxu1 %v3913_v4  ;;  %v229_v36 = vld [vmem:[#allocation5 + $0xf8] sm:$0xff] }
 0x13f   :  { %1159 = vmatprep.mubr.bf16.mxu0 %v402_v13  ;;  %1200 = vmatprep.mubr.bf16.mxu1 %v402_v13  ;;  %v3969_v63 = vcombine.high %v225_v60, %v229_v36  ;;  %v232_v13 = vld [vmem:[#allocation5 + $0x110] sm:$0xff]  ;;  %v237_v4 = vld [vmem:[#allocation5 + $0x138] sm:$0xff]  ;;  %v3975_v23 = vcombine.low %v225_v60, %v229_v36 }
 0x140   :  { %1129 = vmatprep.subr.bf16.mxu0 %v3941_v28  ;;  %1170 = vmatprep.subr.bf16.mxu1 %v3943_v39  ;;  %v236_v39 = vld [vmem:[#allocation5 + $0x130] sm:$0xff]  ;;  %v233_v28 = vld [vmem:[#allocation5 + $0x118] sm:$0xff] }
 0x141   :  { %5500 = vst [vmem:[#allocation86_spill] sm:$0xff] %v3969_v63  ;;  %5502 = vst [vmem:[#allocation88_spill] sm:$0xff] %v3975_v23  ;;  %v3979_v55 = vcombine.high %v232_v13, %v236_v39  ;;  %v3981_v37 = vcombine.high %v233_v28, %v237_v4  ;;  %v3985_v6 = vcombine.low %v232_v13, %v236_v39 }
 0x142   :  { %1130 = vmatpush1.bf16.msra.mxu0 %v3949_v53  ;;  %1171 = vmatpush1.bf16.msra.mxu1 %v3951_v8  ;;  %v241_v8 = vld [vmem:[#allocation5 + $0x158] sm:$0xff]  ;;  %v3987_v60 = vcombine.low %v233_v28, %v237_v4 }
 0x143   :  { %1131 = vmatprep.subr.bf16.mxu0 %v3953_v16  ;;  %1172 = vmatprep.subr.bf16.mxu1 %v3955_v21  ;;  %5503 = vst [vmem:[#allocation89_spill] sm:$0xff] %v3979_v55  ;;  %5504 = vst [vmem:[#allocation90_spill] sm:$0xff] %v3981_v37  ;;  %v240_v21 = vld [vmem:[#allocation5 + $0x150] sm:$0xff]  ;;  %v245_v53 = vld [vmem:[#allocation5 + $0x178] sm:$0xff] }
 0x144   :  { %v244_v16 = vld [vmem:[#allocation5 + $0x170] sm:$0xff]  ;;  %5505 = vst [vmem:[#allocation91_spill] sm:$0xff] %v3985_v6  ;;  %5506 = vst [vmem:[#allocation92_spill] sm:$0xff] %v3987_v60  ;;  %v3993_v14 = vcombine.high %v241_v8, %v245_v53  ;;  %v3999_v4 = vcombine.low %v241_v8, %v245_v53 }
 0x145   :  { %v3991_v36 = vcombine.high %v240_v21, %v244_v16  ;;  %v3997_v39 = vcombine.low %v240_v21, %v244_v16 }
 0x146   :  { %1132 = vmatpush1.bf16.msra.mxu0 %v3961_v3  ;;  %1173 = vmatpush1.bf16.msra.mxu1 %v3963_v61  ;;  %5508 = vst [vmem:[#allocation94_spill] sm:$0xff] %v3993_v14  ;;  %v249_v61 = vld [vmem:[#allocation5 + $0x198] sm:$0xff]  ;;  %5510 = vst [vmem:[#allocation96_spill] sm:$0xff] %v3999_v4 }
 0x147   :  { %1133 = vmatprep.subr.bf16.mxu0 %v3967_v59  ;;  %1174 = vmatprep.subr.bf16.mxu1 %v3969_v63  ;;  %5507 = vst [vmem:[#allocation93_spill] sm:$0xff] %v3991_v36  ;;  %v248_v63 = vld [vmem:[#allocation5 + $0x190] sm:$0xff]  ;;  %v253_v3 = vld [vmem:[#allocation5 + $0x1b8] sm:$0xff]  ;;  %5509 = vst [vmem:[#allocation95_spill] sm:$0xff] %v3997_v39 }
 0x148   :  { %v252_v59 = vld [vmem:[#allocation5 + $0x1b0] sm:$0xff]  ;;  %v4005_v13 = vcombine.high %v249_v61, %v253_v3  ;;  %v4011_v53 = vcombine.low %v249_v61, %v253_v3 }
 0x149   :  { %v4003_v28 = vcombine.high %v248_v63, %v252_v59  ;;  %v4009_v16 = vcombine.low %v248_v63, %v252_v59 }
 0x14a   :  { %1134 = vmatpush1.bf16.msra.mxu0 %v3973_v20  ;;  %1175 = vmatpush1.bf16.msra.mxu1 %v3975_v23  ;;  %5512 = vst [vmem:[#allocation98_spill] sm:$0xff] %v4005_v13  ;;  %v257_v23 = vld [vmem:[#allocation5 + $0x1d8] sm:$0xff]  ;;  %5514 = vst [vmem:[#allocation100_spill] sm:$0xff] %v4011_v53 }
 0x14b   :  { %1135 = vmatprep.subr.bf16.mxu0 %v3979_v55  ;;  %1176 = vmatprep.subr.bf16.mxu1 %v3981_v37  ;;  %5511 = vst [vmem:[#allocation97_spill] sm:$0xff] %v4003_v28  ;;  %v256_v37 = vld [vmem:[#allocation5 + $0x1d0] sm:$0xff]  ;;  %v261_v20 = vld [vmem:[#allocation5 + $0x1f8] sm:$0xff]  ;;  %5513 = vst [vmem:[#allocation99_spill] sm:$0xff] %v4009_v16 }
 0x14c   :  { %v260_v55 = vld [vmem:[#allocation5 + $0x1f0] sm:$0xff]  ;;  %v4017_v21 = vcombine.high %v257_v23, %v261_v20  ;;  %v4023_v3 = vcombine.low %v257_v23, %v261_v20 }
 0x14d   :  { %v4015_v8 = vcombine.high %v256_v37, %v260_v55  ;;  %v4021_v59 = vcombine.low %v256_v37, %v260_v55 }
 0x14e   :  { %1136 = vmatpush1.bf16.msra.mxu0 %v3985_v6  ;;  %1177 = vmatpush1.bf16.msra.mxu1 %v3987_v60  ;;  %5516 = vst [vmem:[#allocation102_spill] sm:$0xff] %v4017_v21  ;;  %v265_v60 = vld [vmem:[#allocation5 + $0x218] sm:$0xff]  ;;  %5518 = vst [vmem:[#allocation104_spill] sm:$0xff] %v4023_v3 }
 0x14f   :  { %1137 = vmatprep.subr.bf16.mxu0 %v3991_v36  ;;  %1178 = vmatprep.subr.bf16.mxu1 %v3993_v14  ;;  %5515 = vst [vmem:[#allocation101_spill] sm:$0xff] %v4015_v8  ;;  %v264_v14 = vld [vmem:[#allocation5 + $0x210] sm:$0xff]  ;;  %v269_v6 = vld [vmem:[#allocation5 + $0x238] sm:$0xff]  ;;  %5517 = vst [vmem:[#allocation103_spill] sm:$0xff] %v4021_v59 }
 0x150   :  { %v268_v36 = vld [vmem:[#allocation5 + $0x230] sm:$0xff]  ;;  %v4029_v63 = vcombine.high %v265_v60, %v269_v6  ;;  %v4035_v20 = vcombine.low %v265_v60, %v269_v6 }
 0x151   :  { %v4027_v61 = vcombine.high %v264_v14, %v268_v36  ;;  %v4033_v55 = vcombine.low %v264_v14, %v268_v36 }
 0x152   :  { %1138 = vmatpush1.bf16.msra.mxu0 %v3997_v39  ;;  %1179 = vmatpush1.bf16.msra.mxu1 %v3999_v4  ;;  %5520 = vst [vmem:[#allocation106_spill] sm:$0xff] %v4029_v63  ;;  %v273_v4 = vld [vmem:[#allocation5 + $0x258] sm:$0xff]  ;;  %5522 = vst [vmem:[#allocation108_spill] sm:$0xff] %v4035_v20 }
 0x153   :  { %1139 = vmatprep.subr.bf16.mxu0 %v4003_v28  ;;  %1180 = vmatprep.subr.bf16.mxu1 %v4005_v13  ;;  %5519 = vst [vmem:[#allocation105_spill] sm:$0xff] %v4027_v61  ;;  %v272_v13 = vld [vmem:[#allocation5 + $0x250] sm:$0xff]  ;;  %v277_v39 = vld [vmem:[#allocation5 + $0x278] sm:$0xff]  ;;  %5521 = vst [vmem:[#allocation107_spill] sm:$0xff] %v4033_v55 }
 0x154   :  { %v276_v28 = vld [vmem:[#allocation5 + $0x270] sm:$0xff]  ;;  %v4041_v37 = vcombine.high %v273_v4, %v277_v39  ;;  %v4047_v6 = vcombine.low %v273_v4, %v277_v39 }
 0x155   :  { %v4039_v23 = vcombine.high %v272_v13, %v276_v28  ;;  %v4045_v36 = vcombine.low %v272_v13, %v276_v28 }
 0x156   :  { %1140 = vmatpush1.bf16.msra.mxu0 %v4009_v16  ;;  %1181 = vmatpush1.bf16.msra.mxu1 %v4011_v53  ;;  %5524 = vst [vmem:[#allocation110_spill] sm:$0xff] %v4041_v37  ;;  %v281_v53 = vld [vmem:[#allocation5 + $0x298] sm:$0xff]  ;;  %5526 = vst [vmem:[#allocation112_spill] sm:$0xff] %v4047_v6 }
 0x157   :  { %1141 = vmatprep.subr.bf16.mxu0 %v4015_v8  ;;  %1182 = vmatprep.subr.bf16.mxu1 %v4017_v21  ;;  %5523 = vst [vmem:[#allocation109_spill] sm:$0xff] %v4039_v23  ;;  %v280_v21 = vld [vmem:[#allocation5 + $0x290] sm:$0xff]  ;;  %v285_v16 = vld [vmem:[#allocation5 + $0x2b8] sm:$0xff]  ;;  %5525 = vst [vmem:[#allocation111_spill] sm:$0xff] %v4045_v36 }
 0x158   :  { %v284_v8 = vld [vmem:[#allocation5 + $0x2b0] sm:$0xff]  ;;  %v4053_v14 = vcombine.high %v281_v53, %v285_v16  ;;  %v4059_v39 = vcombine.low %v281_v53, %v285_v16 }
 0x159   :  { %v4051_v60 = vcombine.high %v280_v21, %v284_v8  ;;  %v4057_v28 = vcombine.low %v280_v21, %v284_v8 }
 0x15a   :  { %1142 = vmatpush1.bf16.msra.mxu0 %v4021_v59  ;;  %1183 = vmatpush1.bf16.msra.mxu1 %v4023_v3  ;;  %5528 = vst [vmem:[#allocation114_spill] sm:$0xff] %v4053_v14  ;;  %v289_v3 = vld [vmem:[#allocation5 + $0x2d8] sm:$0xff]  ;;  %5530 = vst [vmem:[#allocation116_spill] sm:$0xff] %v4059_v39 }
 0x15b   :  { %1143 = vmatprep.subr.bf16.mxu0 %v4027_v61  ;;  %1184 = vmatprep.subr.bf16.mxu1 %v4029_v63  ;;  %5527 = vst [vmem:[#allocation113_spill] sm:$0xff] %v4051_v60  ;;  %v288_v63 = vld [vmem:[#allocation5 + $0x2d0] sm:$0xff]  ;;  %v293_v59 = vld [vmem:[#allocation5 + $0x2f8] sm:$0xff]  ;;  %5529 = vst [vmem:[#allocation115_spill] sm:$0xff] %v4057_v28 }
 0x15c   :  { %v292_v61 = vld [vmem:[#allocation5 + $0x2f0] sm:$0xff]  ;;  %v4065_v13 = vcombine.high %v289_v3, %v293_v59  ;;  %v4071_v16 = vcombine.low %v289_v3, %v293_v59 }
 0x15d   :  { %v4063_v4 = vcombine.high %v288_v63, %v292_v61  ;;  %v4069_v8 = vcombine.low %v288_v63, %v292_v61 }
 0x15e   :  { %1144 = vmatpush1.bf16.msra.mxu0 %v4033_v55  ;;  %1185 = vmatpush1.bf16.msra.mxu1 %v4035_v20  ;;  %5532 = vst [vmem:[#allocation118_spill] sm:$0xff] %v4065_v13  ;;  %v297_v20 = vld [vmem:[#allocation5 + $0x318] sm:$0xff]  ;;  %5534 = vst [vmem:[#allocation120_spill] sm:$0xff] %v4071_v16 }
 0x15f   :  { %1145 = vmatprep.subr.bf16.mxu0 %v4039_v23  ;;  %1186 = vmatprep.subr.bf16.mxu1 %v4041_v37  ;;  %5531 = vst [vmem:[#allocation117_spill] sm:$0xff] %v4063_v4  ;;  %v296_v37 = vld [vmem:[#allocation5 + $0x310] sm:$0xff]  ;;  %v301_v55 = vld [vmem:[#allocation5 + $0x338] sm:$0xff]  ;;  %5533 = vst [vmem:[#allocation119_spill] sm:$0xff] %v4069_v8 }
 0x160   :  { %v300_v23 = vld [vmem:[#allocation5 + $0x330] sm:$0xff]  ;;  %v4077_v21 = vcombine.high %v297_v20, %v301_v55  ;;  %v4083_v59 = vcombine.low %v297_v20, %v301_v55 }
 0x161   :  { %v4075_v53 = vcombine.high %v296_v37, %v300_v23  ;;  %v4081_v61 = vcombine.low %v296_v37, %v300_v23 }
 0x162   :  { %1146 = vmatpush1.bf16.msra.mxu0 %v4045_v36  ;;  %1187 = vmatpush1.bf16.msra.mxu1 %v4047_v6  ;;  %5536 = vst [vmem:[#allocation122_spill] sm:$0xff] %v4077_v21  ;;  %v305_v6 = vld [vmem:[#allocation5 + $0x358] sm:$0xff]  ;;  %5538 = vst [vmem:[#allocation124_spill] sm:$0xff] %v4083_v59 }
 0x163   :  { %1147 = vmatprep.subr.bf16.mxu0 %v4051_v60  ;;  %1188 = vmatprep.subr.bf16.mxu1 %v4053_v14  ;;  %5535 = vst [vmem:[#allocation121_spill] sm:$0xff] %v4075_v53  ;;  %v304_v14 = vld [vmem:[#allocation5 + $0x350] sm:$0xff]  ;;  %v309_v36 = vld [vmem:[#allocation5 + $0x378] sm:$0xff]  ;;  %5537 = vst [vmem:[#allocation123_spill] sm:$0xff] %v4081_v61 }
 0x164   :  { %v308_v60 = vld [vmem:[#allocation5 + $0x370] sm:$0xff]  ;;  %v4089_v63 = vcombine.high %v305_v6, %v309_v36  ;;  %v4095_v55 = vcombine.low %v305_v6, %v309_v36 }
 0x165   :  { %v4087_v3 = vcombine.high %v304_v14, %v308_v60  ;;  %v4093_v23 = vcombine.low %v304_v14, %v308_v60 }
 0x166   :  { %1148 = vmatpush1.bf16.msra.mxu0 %v4057_v28  ;;  %1189 = vmatpush1.bf16.msra.mxu1 %v4059_v39  ;;  %5540 = vst [vmem:[#allocation126_spill] sm:$0xff] %v4089_v63  ;;  %v313_v39 = vld [vmem:[#allocation5 + $0x398] sm:$0xff]  ;;  %5542 = vst [vmem:[#allocation128_spill] sm:$0xff] %v4095_v55 }
 0x167   :  { %1149 = vmatprep.subr.bf16.mxu0 %v4063_v4  ;;  %1190 = vmatprep.subr.bf16.mxu1 %v4065_v13  ;;  %5539 = vst [vmem:[#allocation125_spill] sm:$0xff] %v4087_v3  ;;  %v312_v13 = vld [vmem:[#allocation5 + $0x390] sm:$0xff]  ;;  %v317_v28 = vld [vmem:[#allocation5 + $0x3b8] sm:$0xff]  ;;  %5541 = vst [vmem:[#allocation127_spill] sm:$0xff] %v4093_v23 }
 0x168   :  { %v316_v4 = vld [vmem:[#allocation5 + $0x3b0] sm:$0xff]  ;;  %v4101_v37 = vcombine.high %v313_v39, %v317_v28  ;;  %v4107_v36 = vcombine.low %v313_v39, %v317_v28  ;;  %v5552_v28 = vld [vmem:[#allocation49_spill] sm:$0xff] }
 0x169   :  { %v4099_v20 = vcombine.high %v312_v13, %v316_v4  ;;  %v4105_v60 = vcombine.low %v312_v13, %v316_v4  ;;  %v5553_v39 = vld [vmem:[#allocation50_spill] sm:$0xff]  ;;  %v5554_v4 = vld [vmem:[#allocation51_spill] sm:$0xff]  ;;  %v5555_v13 = vld [vmem:[#allocation52_spill] sm:$0xff] }
 0x16a   :  { %1150 = vmatpush1.bf16.msra.mxu0 %v4069_v8  ;;  %1191 = vmatpush1.bf16.msra.mxu1 %v4071_v16  ;;  %5544 = vst [vmem:[#allocation130_spill] sm:$0xff] %v4101_v37  ;;  %v321_v16 = vld [vmem:[#allocation5 + $0x3d8] sm:$0xff]  ;;  %5546 = vst [vmem:[#allocation132_spill] sm:$0xff] %v4107_v36 }
 0x16b   :  { %1151 = vmatprep.subr.bf16.mxu0 %v4075_v53  ;;  %1192 = vmatprep.subr.bf16.mxu1 %v4077_v21  ;;  %5543 = vst [vmem:[#allocation129_spill] sm:$0xff] %v4099_v20  ;;  %v320_v21 = vld [vmem:[#allocation5 + $0x3d0] sm:$0xff]  ;;  %v325_v8 = vld [vmem:[#allocation5 + $0x3f8] sm:$0xff]  ;;  %5545 = vst [vmem:[#allocation131_spill] sm:$0xff] %v4105_v60 }
 0x16c   :  { %v324_v53 = vld [vmem:[#allocation5 + $0x3f0] sm:$0xff]  ;;  %v4113_v14 = vcombine.high %v321_v16, %v325_v8 }
 0x16d   :  { %v4111_v6 = vcombine.high %v320_v21, %v324_v53 }
 0x16e   :  { %1152 = vmatpush1.bf16.msra.mxu0 %v4081_v61  ;;  %1193 = vmatpush1.bf16.msra.mxu1 %v4083_v59  ;;  %5548 = vst [vmem:[#allocation134_spill] sm:$0xff] %v4113_v14 }
 0x16f   :  { %1153 = vmatprep.subr.bf16.mxu0 %v4087_v3  ;;  %1194 = vmatprep.subr.bf16.mxu1 %v4089_v63  ;;  %5547 = vst [vmem:[#allocation133_spill] sm:$0xff] %v4111_v6  ;;  %v4117_v63 = vcombine.low %v320_v21, %v324_v53  ;;  %v5558_v53 = vld [vmem:[#allocation55_spill] sm:$0xff]  ;;  %v5559_v21 = vld [vmem:[#allocation56_spill] sm:$0xff] }
 0x171   :  { %5549 = vst [vmem:[#allocation135_spill] sm:$0xff] %v4117_v63 }
 0x172   :  { %1154 = vmatpush1.bf16.msra.mxu0 %v4093_v23  ;;  %1195 = vmatpush1.bf16.msra.mxu1 %v4095_v55  ;;  %v4119_v23 = vcombine.low %v321_v16, %v325_v8  ;;  %v5556_v8 = vld [vmem:[#allocation53_spill] sm:$0xff]  ;;  %v5557_v16 = vld [vmem:[#allocation54_spill] sm:$0xff] }
 0x173   :  { %1155 = vmatprep.subr.bf16.mxu0 %v4099_v20  ;;  %1196 = vmatprep.subr.bf16.mxu1 %v4101_v37 }
 0x174   :  { %5550 = vst [vmem:[#allocation136_spill] sm:$0xff] %v4119_v23 }
 0x176   :  { %1156 = vmatpush1.bf16.msra.mxu0 %v4105_v60  ;;  %1197 = vmatpush1.bf16.msra.mxu1 %v4107_v36 }
 0x177   :  { %1157 = vmatprep.subr.bf16.mxu0 %v4111_v6  ;;  %1198 = vmatprep.subr.bf16.mxu1 %v4113_v14 }
 0x17a   :  { %1158 = vmatpush1.bf16.msra.mxu0 %v4117_v63  ;;  %1199 = vmatpush1.bf16.msra.mxu1 %v4119_v23 }
 0x17b   :  { %1331 = vmatprep.subr.bf16.mxu0 %v3714_v22  ;;  %1372 = vmatprep.subr.bf16.mxu1 %v3716_v24 }
 0x17d   :  { %1160 = vmatmul.mubr.bf16.vlgmr.msra.gmra.mrb[8].mxu0 %v3939_v52  ;;  %1201 = vmatmul.mubr.bf16.vlgmr.msra.gmra.mrb[8].mxu1 %v3939_v52  ;;  %v5551_v52 = vld [vmem:[#allocation48_spill] sm:$0xff] }
 0x17e   :  { %1332 = vmatpush1.bf16.msra.mxu0 %v3718_v25  ;;  %1373 = vmatpush1.bf16.msra.mxu1 %v3720_v26 }
 0x17f   :  { %1333 = vmatprep.subr.bf16.mxu0 %v3726_v30  ;;  %1374 = vmatprep.subr.bf16.mxu1 %v3728_v32 }
 0x182   :  { %1334 = vmatpush1.bf16.msra.mxu0 %v3730_v33  ;;  %1375 = vmatpush1.bf16.msra.mxu1 %v3732_v34 }
 0x183   :  { %1335 = vmatprep.subr.bf16.mxu0 %v3738_v38  ;;  %1376 = vmatprep.subr.bf16.mxu1 %v3740_v40 }
 0x186   :  { %1336 = vmatpush1.bf16.msra.mxu0 %v3742_v41  ;;  %1377 = vmatpush1.bf16.msra.mxu1 %v3745_v42 }
 0x187   :  { %1337 = vmatprep.subr.bf16.mxu0 %v3750_v46  ;;  %1378 = vmatprep.subr.bf16.mxu1 %v3752_v48 }
 0x18a   :  { %1338 = vmatpush1.bf16.msra.mxu0 %v3754_v49  ;;  %1379 = vmatpush1.bf16.msra.mxu1 %v3756_v50 }
 0x18b   :  { %1339 = vmatprep.subr.bf16.mxu0 %v3762_v54  ;;  %1380 = vmatprep.subr.bf16.mxu1 %v3764_v56 }
 0x18e   :  { %1340 = vmatpush1.bf16.msra.mxu0 %v3766_v57  ;;  %1381 = vmatpush1.bf16.msra.mxu1 %v3768_v58 }
 0x18f   :  { %1341 = vmatprep.subr.bf16.mxu0 %v3774_v62  ;;  %1382 = vmatprep.subr.bf16.mxu1 %v3776_v0 }
 0x192   :  { %1342 = vmatpush1.bf16.msra.mxu0 %v3778_v1  ;;  %1383 = vmatpush1.bf16.msra.mxu1 %v3780_v2 }
 0x193   :  { %1343 = vmatprep.subr.bf16.mxu0 %v3786_v7  ;;  %1384 = vmatprep.subr.bf16.mxu1 %v3788_v9 }
 0x196   :  { %1344 = vmatpush1.bf16.msra.mxu0 %v3790_v10  ;;  %1385 = vmatpush1.bf16.msra.mxu1 %v3792_v11 }
 0x197   :  { %1345 = vmatprep.subr.bf16.mxu0 %v3798_v15  ;;  %1386 = vmatprep.subr.bf16.mxu1 %v3800_v17 }
 0x19a   :  { %1346 = vmatpush1.bf16.msra.mxu0 %v3802_v18  ;;  %1387 = vmatpush1.bf16.msra.mxu1 %v3804_v19 }
 0x19b   :  { %1347 = vmatprep.subr.bf16.mxu0 %v3810_v27  ;;  %1388 = vmatprep.subr.bf16.mxu1 %v3812_v29  ;;  %v1240_v29 = vld [vmem:[#allocation2 + $0x8] sm:$0xc] }
 0x19e   :  { %1348 = vmatpush1.bf16.msra.mxu0 %v3814_v31  ;;  %1389 = vmatpush1.bf16.msra.mxu1 %v3816_v35 }
 0x19f   :  { %1349 = vmatprep.subr.bf16.mxu0 %v3822_v43  ;;  %1390 = vmatprep.subr.bf16.mxu1 %v3824_v45 }
 0x1a2   :  { %1350 = vmatpush1.bf16.msra.mxu0 %v3826_v47  ;;  %1391 = vmatpush1.bf16.msra.mxu1 %v3828_v51  ;;  %v5560_v47 = vld [vmem:[#allocation57_spill] sm:$0xff]  ;;  %v5561_v51 = vld [vmem:[#allocation58_spill] sm:$0xff] }
 0x1a3   :  { %1351 = vmatprep.subr.bf16.mxu0 %v5551_v52  ;;  %1392 = vmatprep.subr.bf16.mxu1 %v5552_v28  ;;  %v5562_v52 = vld [vmem:[#allocation59_spill] sm:$0xff]  ;;  %v5563_v28 = vld [vmem:[#allocation60_spill] sm:$0xff] }
 0x1a6   :  { %1352 = vmatpush1.bf16.msra.mxu0 %v5553_v39  ;;  %1393 = vmatpush1.bf16.msra.mxu1 %v5554_v4  ;;  %v5564_v39 = vld [vmem:[#allocation61_spill] sm:$0xff]  ;;  %v5565_v4 = vld [vmem:[#allocation62_spill] sm:$0xff] }
 0x1a7   :  { %1353 = vmatprep.subr.bf16.mxu0 %v5555_v13  ;;  %1394 = vmatprep.subr.bf16.mxu1 %v5556_v8  ;;  %v5566_v13 = vld [vmem:[#allocation63_spill] sm:$0xff]  ;;  %v5567_v8 = vld [vmem:[#allocation64_spill] sm:$0xff] }
 0x1aa   :  { %1354 = vmatpush1.bf16.msra.mxu0 %v5557_v16  ;;  %1395 = vmatpush1.bf16.msra.mxu1 %v5558_v53  ;;  %v5568_v16 = vld [vmem:[#allocation66_spill] sm:$0xff]  ;;  %v5569_v53 = vld [vmem:[#allocation65_spill] sm:$0xff] }
 0x1ab   :  { %1355 = vmatprep.subr.bf16.mxu0 %v5559_v21  ;;  %1396 = vmatprep.subr.bf16.mxu1 %v5560_v47  ;;  %v5570_v21 = vld [vmem:[#allocation67_spill] sm:$0xff]  ;;  %v5571_v47 = vld [vmem:[#allocation68_spill] sm:$0xff] }
 0x1ae   :  { %1356 = vmatpush1.bf16.msra.mxu0 %v5561_v51  ;;  %1397 = vmatpush1.bf16.msra.mxu1 %v5562_v52  ;;  %v5572_v51 = vld [vmem:[#allocation69_spill] sm:$0xff]  ;;  %v5573_v52 = vld [vmem:[#allocation70_spill] sm:$0xff] }
 0x1af   :  { %1357 = vmatprep.subr.bf16.mxu0 %v5563_v28  ;;  %1398 = vmatprep.subr.bf16.mxu1 %v5564_v39  ;;  %v5574_v28 = vld [vmem:[#allocation71_spill] sm:$0xff]  ;;  %v5575_v39 = vld [vmem:[#allocation72_spill] sm:$0xff] }
 0x1b2   :  { %1358 = vmatpush1.bf16.msra.mxu0 %v5565_v4  ;;  %1399 = vmatpush1.bf16.msra.mxu1 %v5566_v13  ;;  %v5576_v4 = vld [vmem:[#allocation73_spill] sm:$0xff] }
 0x1b3   :  { %1359 = vmatprep.subr.bf16.mxu0 %v5567_v8  ;;  %1400 = vmatprep.subr.bf16.mxu1 %v5568_v16 }
 0x1b6   :  { %1360 = vmatpush1.bf16.msra.mxu0 %v5569_v53  ;;  %1401 = vmatpush1.bf16.msra.mxu1 %v5570_v21  ;;  %v1239_v53 = vld [vmem:[#allocation2] sm:$0xc] }
 0x1b7   :  { %1361 = vmatprep.subr.bf16.mxu0 %v5571_v47  ;;  %1402 = vmatprep.subr.bf16.mxu1 %v5572_v51 }
 0x1ba   :  { %1362 = vmatpush1.bf16.msra.mxu0 %v5573_v52  ;;  %1403 = vmatpush1.bf16.msra.mxu1 %v5574_v28 }
 0x1bb   :  { %1413 = vmatprep.subr.bf16.mxu0 %v5575_v39  ;;  %1454 = vmatprep.subr.bf16.mxu1 %v5576_v4  ;;  %v1242_v4 = vld [vmem:[#allocation2 + $0x18] sm:$0xc] }
 0x210   :  { %v1079_v13 = vpop.f32.mrb[4].mxu0  ;;  %v1120_v8 = vpop.f32.mrb[4].mxu1 }
 0x211   :  { %v1247_v45 = vrot.slane %v1079_v13, 6  ;;  %v1081_v16 = vpop.f32.mrb[5].mxu0  ;;  %v1122_v43 = vpop.f32.mrb[5].mxu1  ;;  %v1249_v17 = vrot.slane %v1120_v8, 6  ;;  %v1241_v13 = vld [vmem:[#allocation2 + $0x10] sm:$0xc] }
 0x212   :  { %v1248_v35 = vrot.slane %v1081_v16, 6  ;;  %v1083_v21 = vpop.f32.mrb[6].mxu0  ;;  %v1124_v31 = vpop.f32.mrb[6].mxu1  ;;  %v1250_v18 = vrot.slane %v1122_v43, 6  ;;  %v5579_v8 = vsub.s32 1, %v3698_v5 }
 0x213   :  { %v1255_v47 = vadd.f32 %v1247_v45, %v1239_v53  ;;  %v1084_v51 = vpop.f32.mrb[7].mxu0  ;;  %v1125_v27 = vpop.f32.mrb[7].mxu1  ;;  %v1257_v11 = vadd.f32 %v1249_v17, %v1241_v13 }
 0x214   :  { %v1256_v52 = vadd.f32 %v1248_v35, %v1240_v29  ;;  %v1258_v39 = vadd.f32 %v1250_v18, %v1242_v4 }
 0x215   :  { %v3297_v19 = vmul.f32 -1.442695, %v1255_v47 }
 0x216   :  { %v3298_v28 = vmul.f32 -1.442695, %v1256_v52  ;;  %v3299_v15 = vmul.f32 -1.442695, %v1258_v39  ;;  %v5577_v39 = vsub.s32 0, %v3698_v5 }
 0x217   :  { %3373 = vpow2.f32 %v3297_v19  ;;  %v1279_v19 = vrot.slane %v3931_v44, 6  ;;  %v326_v44 = vld [vmem:[%s5130_s4] sm:$0xf] }
 0x218   :  { %3375 = vpow2.f32 %v3298_v28  ;;  %v4203_v4 = vrot.slane %v326_v44, %v5577_v39  ;;  %v4207_v53 = vrot.slane %v326_v44, %v5579_v8 }
 0x219   :  { %3377 = vpow2.f32 %v3299_v15 }
 0x21a   :  { %3379 = vtanh.f32 %v1257_v11  ;;  %5578 = vst [vmem:[#allocation137_spill] sm:$0xff] %v4203_v4  ;;  %5580 = vst [vmem:[#allocation138_spill] sm:$0xff] %v4207_v53 }
 0x221   :  { %v3374_v10 = vpop.eup %3373 }
 0x222   :  { %v3376_v16 = vpop.eup %3375  ;;  %v1262_v21 = vadd.f32 1.0, %v3374_v10 }
 0x223   :  { %v1268_v31 = vadd.f32 1.0, %v3376_v16  ;;  %v3378_v27 = vpop.eup %3377 }
 0x224   :  { %3381 = vrcp.f32 %v1262_v21  ;;  %v3380_v29 = vpop.eup %3379  ;;  %v1275_v18 = vadd.f32 1.0, %v3378_v27 }
 0x225   :  { %3383 = vrcp.f32 %v1268_v31 }
 0x226   :  { %3385 = vrcp.f32 %v1275_v18 }
 0x22e   :  { %v3382_v35 = vpop.eup %3381 }
 0x22f   :  { %v3384_v43 = vpop.eup %3383  ;;  %v1282_v45 = vmul.f32 %v3382_v35, %v3380_v29 }
 0x230   :  { %v1281_v47 = vmul.f32 %v3384_v43, %v1279_v19  ;;  %v3386_v10 = vpop.eup %3385 }
 0x232   :  { %v4194_v51 = vadd.f32 %v1282_v45, %v1281_v47  ;;  %v5581_v47 = vsub.s32 3, %v3698_v5 }
 0x234   :  { %3387 = vtanh.f32 %v4194_v51 }
 0x23e   :  { %v3388_v15 = vpop.eup %3387 }
 0x23f   :  { %v1285_v11 = vmul.f32 %v3388_v15, %v3386_v10  ;;  %v4213_v10 = vrot.slane %v326_v44, %v5581_v47 }
 0x241   :  { %v1286_v17 = vpack.c.bf16 %v1285_v11, %v1285_v11  ;;  %5582 = vst [vmem:[#allocation139_spill] sm:$0xff] %v4213_v10 }
 0x243   :  { %v1294_v52 = vrot.slane %v1286_v17, %v3935_v12  ;;  %v5583_v17 = vsub.s32 2, %v3698_v5 }
 0x245   :  { %v1295_v28 = vcombine.high %v1294_v52, %v1294_v52  ;;  %v4218_v52 = vrot.slane %v326_v44, %v5583_v17 }
 0x247   :  { %3300 = vst.sshfl [vmem:[#allocation3] sm:$0x1 pattern:$0x73625140] %v1295_v28  ;;  %5584 = vst [vmem:[#allocation140_spill] sm:$0xff] %v4218_v52 }
 0x250   :  { %v1161_v13 = vpop.f32.mrb[8].mxu0  ;;  %v1202_v16 = vpop.f32.mrb[8].mxu1 }
 0x251   :  { %v1209_v21 = vadd.f32 %v1161_v13, %v4203_v4  ;;  %v1163_v31 = vpop.f32.mrb[9].mxu0  ;;  %v1204_v27 = vpop.f32.mrb[9].mxu1  ;;  %v1211_v39 = vadd.f32 %v1202_v16, %v4218_v52 }
 0x252   :  { %v1210_v29 = vadd.f32 %v1163_v31, %v4207_v53  ;;  %v1165_v35 = vpop.f32.mrb[10].mxu0  ;;  %v1206_v19 = vpop.f32.mrb[10].mxu1  ;;  %v1212_v11 = vadd.f32 %v1204_v27, %v4213_v10 }
 0x253   :  { %v3294_v43 = vmul.f32 -1.442695, %v1209_v21  ;;  %v1166_v45 = vpop.f32.mrb[11].mxu0  ;;  %v1207_v18 = vpop.f32.mrb[11].mxu1 }
 0x254   :  { %v3295_v15 = vmul.f32 -1.442695, %v1210_v29  ;;  %v3296_v28 = vmul.f32 -1.442695, %v1212_v11 }
 0x255   :  { %3389 = vpow2.f32 %v3294_v43 }
 0x256   :  { %3391 = vpow2.f32 %v3295_v15 }
 0x257   :  { %3393 = vpow2.f32 %v3296_v28 }
 0x258   :  { %3395 = vtanh.f32 %v1211_v39 }
 0x25f   :  { %v3390_v8 = vpop.eup %3389 }
 0x260   :  { %v3392_v13 = vpop.eup %3391  ;;  %v1216_v21 = vadd.f32 1.0, %v3390_v8  ;;  %v5585_v8 = vld [vmem:[#allocation74_spill] sm:$0xff] }
 0x261   :  { %v1222_v31 = vadd.f32 1.0, %v3392_v13  ;;  %v3394_v29 = vpop.eup %3393  ;;  %v5586_v13 = vld [vmem:[#allocation75_spill] sm:$0xff] }
 0x262   :  { %3397 = vrcp.f32 %v1216_v21  ;;  %v3396_v35 = vpop.eup %3395  ;;  %v1229_v45 = vadd.f32 1.0, %v3394_v29  ;;  %v5587_v21 = vld [vmem:[#allocation77_spill] sm:$0xff]  ;;  %v5589_v29 = vld [vmem:[#allocation79_spill] sm:$0xff] }
 0x263   :  { %3399 = vrcp.f32 %v1222_v31  ;;  %v5588_v31 = vld [vmem:[#allocation78_spill] sm:$0xff] }
 0x264   :  { %3401 = vrcp.f32 %v1229_v45  ;;  %v5594_v45 = vld [vmem:[#allocation84_spill] sm:$0xff] }
 0x26c   :  { %v3398_v19 = vpop.eup %3397 }
 0x26d   :  { %v3400_v43 = vpop.eup %3399  ;;  %v1233_v27 = vmul.f32 %v3398_v19, %v3396_v35  ;;  %v5590_v35 = vld [vmem:[#allocation80_spill] sm:$0xff]  ;;  %v5591_v19 = vld [vmem:[#allocation81_spill] sm:$0xff] }
 0x26e   :  { %v1232_v5 = vmul.f32 0.0, %v3400_v43  ;;  %v3402_v16 = vpop.eup %3401  ;;  %v5592_v43 = vld [vmem:[#allocation82_spill] sm:$0xff] }
 0x270   :  { %v4221_v44 = vadd.f32 %v1233_v27, %v1232_v5  ;;  %v5593_v27 = vld [vmem:[#allocation83_spill] sm:$0xff]  ;;  %v5595_v5 = vld [vmem:[#allocation85_spill] sm:$0xff] }
 0x272   :  { %3403 = vtanh.f32 %v4221_v44 }
 0x27c   :  { %v3404_v18 = vpop.eup %3403 }
 0x27d   :  { %v1236_v47 = vmul.f32 %v3404_v18, %v3402_v16  ;;  %v5596_v16 = vld [vmem:[#allocation86_spill] sm:$0xff]  ;;  %v5597_v18 = vld [vmem:[#allocation87_spill] sm:$0xff] }
 0x27f   :  { %v1237_v15 = vpack.c.bf16 %v1236_v47, %v1236_v47  ;;  %v5598_v47 = vld [vmem:[#allocation88_spill] sm:$0xff] }
 0x281   :  { %1238 = vst [vmem:[#allocation3 + $0x1] sm:$0x1] %v1237_v15  ;;  %v5599_v15 = vld [vmem:[#allocation89_spill] sm:$0xff] }
 0x288   :  { %v3301_v11 = vld.sshfl [vmem:[#allocation3] sm:$0x11 pattern:$0x75316420] }
 0x289   :  { %v1314_v17 = vcombine.high %v3301_v11, %v3301_v11  ;;  %v4226_v39 = vrot.slane %v3301_v11, %v3935_v12  ;;  %v5600_v11 = vld [vmem:[#allocation90_spill] sm:$0xff] }
 0x28b   :  { %v1328_v28 = vrot.slane %v1314_v17, %v3935_v12  ;;  %v5601_v17 = vld [vmem:[#allocation91_spill] sm:$0xff] }
 0x28d   :  { %1363 = vmatprep.mubr.bf16.mxu0 %v1328_v28  ;;  %1404 = vmatprep.mubr.bf16.mxu1 %v1328_v28 }
 0x28e   :  { %1364 = vmatmul.mubr.bf16.vlgmr.msra.gmra.mrb[12].mxu0 %v4226_v39  ;;  %1405 = vmatmul.mubr.bf16.vlgmr.msra.gmra.mrb[12].mxu1 %v4226_v39 }
 0x28f   :  { %1414 = vmatpush1.bf16.msra.mxu0 %v5585_v8  ;;  %1455 = vmatpush1.bf16.msra.mxu1 %v5586_v13 }
 0x290   :  { %1445 = vmatprep.mubr.bf16.mxu0 %v1328_v28  ;;  %1486 = vmatprep.mubr.bf16.mxu1 %v1328_v28  ;;  %v5602_v28 = vld [vmem:[#allocation92_spill] sm:$0xff] }
 0x291   :  { %1415 = vmatprep.subr.bf16.mxu0 %v5587_v21  ;;  %1456 = vmatprep.subr.bf16.mxu1 %v5588_v31 }
 0x293   :  { %1416 = vmatpush1.bf16.msra.mxu0 %v5589_v29  ;;  %1457 = vmatpush1.bf16.msra.mxu1 %v5590_v35 }
 0x294   :  { %1417 = vmatprep.subr.bf16.mxu0 %v5591_v19  ;;  %1458 = vmatprep.subr.bf16.mxu1 %v5592_v43  ;;  %v5603_v43 = vld [vmem:[#allocation93_spill] sm:$0xff] }
 0x297   :  { %1418 = vmatpush1.bf16.msra.mxu0 %v5593_v27  ;;  %1459 = vmatpush1.bf16.msra.mxu1 %v5594_v45  ;;  %v5604_v27 = vld [vmem:[#allocation94_spill] sm:$0xff]  ;;  %v5605_v45 = vld [vmem:[#allocation95_spill] sm:$0xff] }
 0x298   :  { %1419 = vmatprep.subr.bf16.mxu0 %v5595_v5  ;;  %1460 = vmatprep.subr.bf16.mxu1 %v5596_v16  ;;  %v5606_v5 = vld [vmem:[#allocation96_spill] sm:$0xff]  ;;  %v5607_v16 = vld [vmem:[#allocation97_spill] sm:$0xff] }
 0x29b   :  { %1420 = vmatpush1.bf16.msra.mxu0 %v5597_v18  ;;  %1461 = vmatpush1.bf16.msra.mxu1 %v5598_v47  ;;  %v5608_v18 = vld [vmem:[#allocation98_spill] sm:$0xff]  ;;  %v5609_v47 = vld [vmem:[#allocation99_spill] sm:$0xff] }
 0x29c   :  { %1421 = vmatprep.subr.bf16.mxu0 %v5599_v15  ;;  %1462 = vmatprep.subr.bf16.mxu1 %v5600_v11  ;;  %v5610_v15 = vld [vmem:[#allocation100_spill] sm:$0xff]  ;;  %v5611_v11 = vld [vmem:[#allocation101_spill] sm:$0xff] }
 0x29f   :  { %1422 = vmatpush1.bf16.msra.mxu0 %v5601_v17  ;;  %1463 = vmatpush1.bf16.msra.mxu1 %v5602_v28  ;;  %v5612_v17 = vld [vmem:[#allocation102_spill] sm:$0xff]  ;;  %v5613_v28 = vld [vmem:[#allocation103_spill] sm:$0xff] }
 0x2a0   :  { %1423 = vmatprep.subr.bf16.mxu0 %v5603_v43  ;;  %1464 = vmatprep.subr.bf16.mxu1 %v5604_v27  ;;  %v5614_v43 = vld [vmem:[#allocation104_spill] sm:$0xff]  ;;  %v5615_v27 = vld [vmem:[#allocation105_spill] sm:$0xff] }
 0x2a3   :  { %1424 = vmatpush1.bf16.msra.mxu0 %v5605_v45  ;;  %1465 = vmatpush1.bf16.msra.mxu1 %v5606_v5  ;;  %v5616_v45 = vld [vmem:[#allocation106_spill] sm:$0xff]  ;;  %v5617_v5 = vld [vmem:[#allocation107_spill] sm:$0xff] }
 0x2a4   :  { %1425 = vmatprep.subr.bf16.mxu0 %v5607_v16  ;;  %1466 = vmatprep.subr.bf16.mxu1 %v5608_v18  ;;  %v5618_v16 = vld [vmem:[#allocation108_spill] sm:$0xff]  ;;  %v5619_v18 = vld [vmem:[#allocation109_spill] sm:$0xff] }
 0x2a7   :  { %1426 = vmatpush1.bf16.msra.mxu0 %v5609_v47  ;;  %1467 = vmatpush1.bf16.msra.mxu1 %v5610_v15  ;;  %v5620_v47 = vld [vmem:[#allocation110_spill] sm:$0xff]  ;;  %v5621_v15 = vld [vmem:[#allocation111_spill] sm:$0xff] }
 0x2a8   :  { %1427 = vmatprep.subr.bf16.mxu0 %v5611_v11  ;;  %1468 = vmatprep.subr.bf16.mxu1 %v5612_v17  ;;  %v5622_v11 = vld [vmem:[#allocation112_spill] sm:$0xff]  ;;  %v5623_v17 = vld [vmem:[#allocation113_spill] sm:$0xff] }
 0x2ab   :  { %1428 = vmatpush1.bf16.msra.mxu0 %v5613_v28  ;;  %1469 = vmatpush1.bf16.msra.mxu1 %v5614_v43  ;;  %v5624_v28 = vld [vmem:[#allocation114_spill] sm:$0xff]  ;;  %v5625_v43 = vld [vmem:[#allocation115_spill] sm:$0xff] }
 0x2ac   :  { %1429 = vmatprep.subr.bf16.mxu0 %v5615_v27  ;;  %1470 = vmatprep.subr.bf16.mxu1 %v5616_v45  ;;  %v5626_v27 = vld [vmem:[#allocation116_spill] sm:$0xff]  ;;  %v5627_v45 = vld [vmem:[#allocation117_spill] sm:$0xff] }
 0x2af   :  { %1430 = vmatpush1.bf16.msra.mxu0 %v5617_v5  ;;  %1471 = vmatpush1.bf16.msra.mxu1 %v5618_v16  ;;  %v5628_v5 = vld [vmem:[#allocation118_spill] sm:$0xff]  ;;  %v5629_v16 = vld [vmem:[#allocation119_spill] sm:$0xff] }
 0x2b0   :  { %1431 = vmatprep.subr.bf16.mxu0 %v5619_v18  ;;  %1472 = vmatprep.subr.bf16.mxu1 %v5620_v47  ;;  %v5630_v18 = vld [vmem:[#allocation120_spill] sm:$0xff]  ;;  %v5631_v47 = vld [vmem:[#allocation121_spill] sm:$0xff] }
 0x2b3   :  { %1432 = vmatpush1.bf16.msra.mxu0 %v5621_v15  ;;  %1473 = vmatpush1.bf16.msra.mxu1 %v5622_v11  ;;  %v5632_v15 = vld [vmem:[#allocation122_spill] sm:$0xff] }
 0x2b4   :  { %1433 = vmatprep.subr.bf16.mxu0 %v5623_v17  ;;  %1474 = vmatprep.subr.bf16.mxu1 %v5624_v28 }
 0x2b7   :  { %1434 = vmatpush1.bf16.msra.mxu0 %v5625_v43  ;;  %1475 = vmatpush1.bf16.msra.mxu1 %v5626_v27  ;;  %v5633_v43 = vld [vmem:[#allocation126_spill] sm:$0xff]  ;;  %v5634_v27 = vld [vmem:[#allocation127_spill] sm:$0xff] }
 0x2b8   :  { %1435 = vmatprep.subr.bf16.mxu0 %v5627_v45  ;;  %1476 = vmatprep.subr.bf16.mxu1 %v5628_v5 }
 0x2bb   :  { %1436 = vmatpush1.bf16.msra.mxu0 %v5629_v16  ;;  %1477 = vmatpush1.bf16.msra.mxu1 %v5630_v18 }
 0x2bc   :  { %1437 = vmatprep.subr.bf16.mxu0 %v5631_v47  ;;  %1478 = vmatprep.subr.bf16.mxu1 %v5632_v15 }
 0x2bf   :  { %1438 = vmatpush1.bf16.msra.mxu0 %v4081_v61  ;;  %1479 = vmatpush1.bf16.msra.mxu1 %v4083_v59 }
 0x2c0   :  { %1439 = vmatprep.subr.bf16.mxu0 %v4087_v3  ;;  %1480 = vmatprep.subr.bf16.mxu1 %v5633_v43 }
 0x2c3   :  { %1440 = vmatpush1.bf16.msra.mxu0 %v5634_v27  ;;  %1481 = vmatpush1.bf16.msra.mxu1 %v4095_v55 }
 0x2c4   :  { %1441 = vmatprep.subr.bf16.mxu0 %v4099_v20  ;;  %1482 = vmatprep.subr.bf16.mxu1 %v4101_v37 }
 0x2c7   :  { %1442 = vmatpush1.bf16.msra.mxu0 %v4105_v60  ;;  %1483 = vmatpush1.bf16.msra.mxu1 %v4107_v36 }
 0x2c8   :  { %1443 = vmatprep.subr.bf16.mxu0 %v4111_v6  ;;  %1484 = vmatprep.subr.bf16.mxu1 %v4113_v14 }
 0x2cb   :  { %1444 = vmatpush1.bf16.msra.mxu0 %v4117_v63  ;;  %1485 = vmatpush1.bf16.msra.mxu1 %v4119_v23 }
 0x2cc   :  { %1617 = vmatprep.subr.bf16.mxu0 %v3714_v22  ;;  %1658 = vmatprep.subr.bf16.mxu1 %v3716_v24 }
 0x2ce   :  { %1446 = vmatmul.mubr.bf16.vlgmr.msra.gmra.mrb[16].mxu0 %v4226_v39  ;;  %1487 = vmatmul.mubr.bf16.vlgmr.msra.gmra.mrb[16].mxu1 %v4226_v39  ;;  %v5635_v39 = vld [vmem:[#allocation34_spill] sm:$0xff] }
 0x2cf   :  { %1618 = vmatpush1.bf16.msra.mxu0 %v3718_v25  ;;  %1659 = vmatpush1.bf16.msra.mxu1 %v3720_v26 }
 0x2d0   :  { %1619 = vmatprep.subr.bf16.mxu0 %v3726_v30  ;;  %1660 = vmatprep.subr.bf16.mxu1 %v3728_v32 }
 0x2d3   :  { %1620 = vmatpush1.bf16.msra.mxu0 %v3730_v33  ;;  %1661 = vmatpush1.bf16.msra.mxu1 %v3732_v34 }
 0x2d4   :  { %1621 = vmatprep.subr.bf16.mxu0 %v3738_v38  ;;  %1662 = vmatprep.subr.bf16.mxu1 %v3740_v40 }
 0x2d7   :  { %1622 = vmatpush1.bf16.msra.mxu0 %v3742_v41  ;;  %1663 = vmatpush1.bf16.msra.mxu1 %v3745_v42  ;;  %v1526_v42 = vld [vmem:[#allocation2 + $0x8] sm:$0x30] }
 0x2d8   :  { %1623 = vmatprep.subr.bf16.mxu0 %v3750_v46  ;;  %1664 = vmatprep.subr.bf16.mxu1 %v3752_v48 }
 0x2db   :  { %1624 = vmatpush1.bf16.msra.mxu0 %v3754_v49  ;;  %1665 = vmatpush1.bf16.msra.mxu1 %v3756_v50 }
 0x2dc   :  { %1625 = vmatprep.subr.bf16.mxu0 %v3762_v54  ;;  %1666 = vmatprep.subr.bf16.mxu1 %v3764_v56  ;;  %v5636_v54 = vld [vmem:[#allocation35_spill] sm:$0xff]  ;;  %v5637_v56 = vld [vmem:[#allocation36_spill] sm:$0xff] }
 0x2df   :  { %1626 = vmatpush1.bf16.msra.mxu0 %v3766_v57  ;;  %1667 = vmatpush1.bf16.msra.mxu1 %v3768_v58  ;;  %v5638_v57 = vld [vmem:[#allocation37_spill] sm:$0xff]  ;;  %v5639_v58 = vld [vmem:[#allocation38_spill] sm:$0xff] }
 0x2e0   :  { %1627 = vmatprep.subr.bf16.mxu0 %v3774_v62  ;;  %1668 = vmatprep.subr.bf16.mxu1 %v3776_v0  ;;  %v5640_v62 = vld [vmem:[#allocation39_spill] sm:$0xff]  ;;  %v5641_v0 = vld [vmem:[#allocation40_spill] sm:$0xff] }
 0x2e3   :  { %1628 = vmatpush1.bf16.msra.mxu0 %v3778_v1  ;;  %1669 = vmatpush1.bf16.msra.mxu1 %v3780_v2  ;;  %v5642_v1 = vld [vmem:[#allocation41_spill] sm:$0xff]  ;;  %v5643_v2 = vld [vmem:[#allocation42_spill] sm:$0xff] }
 0x2e4   :  { %1629 = vmatprep.subr.bf16.mxu0 %v3786_v7  ;;  %1670 = vmatprep.subr.bf16.mxu1 %v3788_v9  ;;  %v5644_v7 = vld [vmem:[#allocation43_spill] sm:$0xff]  ;;  %v5645_v9 = vld [vmem:[#allocation44_spill] sm:$0xff] }
 0x2e7   :  { %1630 = vmatpush1.bf16.msra.mxu0 %v5635_v39  ;;  %1671 = vmatpush1.bf16.msra.mxu1 %v5636_v54  ;;  %v5646_v39 = vld [vmem:[#allocation45_spill] sm:$0xff]  ;;  %v5647_v54 = vld [vmem:[#allocation46_spill] sm:$0xff] }
 0x2e8   :  { %1631 = vmatprep.subr.bf16.mxu0 %v5637_v56  ;;  %1672 = vmatprep.subr.bf16.mxu1 %v5638_v57  ;;  %v5648_v56 = vld [vmem:[#allocation47_spill] sm:$0xff]  ;;  %v5649_v57 = vld [vmem:[#allocation48_spill] sm:$0xff] }
 0x2eb   :  { %1632 = vmatpush1.bf16.msra.mxu0 %v5639_v58  ;;  %1673 = vmatpush1.bf16.msra.mxu1 %v5640_v62  ;;  %v5650_v58 = vld [vmem:[#allocation49_spill] sm:$0xff]  ;;  %v5651_v62 = vld [vmem:[#allocation50_spill] sm:$0xff] }
 0x2ec   :  { %1633 = vmatprep.subr.bf16.mxu0 %v5641_v0  ;;  %1674 = vmatprep.subr.bf16.mxu1 %v5642_v1  ;;  %v5652_v0 = vld [vmem:[#allocation51_spill] sm:$0xff]  ;;  %v5653_v1 = vld [vmem:[#allocation52_spill] sm:$0xff] }
 0x2ef   :  { %1634 = vmatpush1.bf16.msra.mxu0 %v5643_v2  ;;  %1675 = vmatpush1.bf16.msra.mxu1 %v5644_v7  ;;  %v5654_v2 = vld [vmem:[#allocation53_spill] sm:$0xff]  ;;  %v5655_v7 = vld [vmem:[#allocation54_spill] sm:$0xff] }
 0x2f0   :  { %1635 = vmatprep.subr.bf16.mxu0 %v5645_v9  ;;  %1676 = vmatprep.subr.bf16.mxu1 %v5646_v39  ;;  %v5656_v9 = vld [vmem:[#allocation55_spill] sm:$0xff]  ;;  %v5657_v39 = vld [vmem:[#allocation56_spill] sm:$0xff] }
 0x2f3   :  { %1636 = vmatpush1.bf16.msra.mxu0 %v5647_v54  ;;  %1677 = vmatpush1.bf16.msra.mxu1 %v5648_v56  ;;  %v5658_v54 = vld [vmem:[#allocation57_spill] sm:$0xff]  ;;  %v5659_v56 = vld [vmem:[#allocation58_spill] sm:$0xff] }
 0x2f4   :  { %1637 = vmatprep.subr.bf16.mxu0 %v5649_v57  ;;  %1678 = vmatprep.subr.bf16.mxu1 %v5650_v58  ;;  %v5660_v57 = vld [vmem:[#allocation59_spill] sm:$0xff]  ;;  %v5661_v58 = vld [vmem:[#allocation60_spill] sm:$0xff] }
 0x2f7   :  { %1638 = vmatpush1.bf16.msra.mxu0 %v5651_v62  ;;  %1679 = vmatpush1.bf16.msra.mxu1 %v5652_v0  ;;  %v5662_v62 = vld [vmem:[#allocation61_spill] sm:$0xff]  ;;  %v5663_v0 = vld [vmem:[#allocation62_spill] sm:$0xff] }
 0x2f8   :  { %1639 = vmatprep.subr.bf16.mxu0 %v5653_v1  ;;  %1680 = vmatprep.subr.bf16.mxu1 %v5654_v2  ;;  %v5664_v1 = vld [vmem:[#allocation63_spill] sm:$0xff]  ;;  %v5665_v2 = vld [vmem:[#allocation64_spill] sm:$0xff] }
 0x2fb   :  { %1640 = vmatpush1.bf16.msra.mxu0 %v5655_v7  ;;  %1681 = vmatpush1.bf16.msra.mxu1 %v5656_v9  ;;  %v5666_v7 = vld [vmem:[#allocation66_spill] sm:$0xff]  ;;  %v5667_v9 = vld [vmem:[#allocation65_spill] sm:$0xff] }
 0x2fc   :  { %1641 = vmatprep.subr.bf16.mxu0 %v5657_v39  ;;  %1682 = vmatprep.subr.bf16.mxu1 %v5658_v54  ;;  %v5668_v39 = vld [vmem:[#allocation67_spill] sm:$0xff]  ;;  %v5669_v54 = vld [vmem:[#allocation68_spill] sm:$0xff] }
 0x2ff   :  { %1642 = vmatpush1.bf16.msra.mxu0 %v5659_v56  ;;  %1683 = vmatpush1.bf16.msra.mxu1 %v5660_v57  ;;  %v5670_v56 = vld [vmem:[#allocation69_spill] sm:$0xff]  ;;  %v5671_v57 = vld [vmem:[#allocation70_spill] sm:$0xff] }
 0x300   :  { %1643 = vmatprep.subr.bf16.mxu0 %v5661_v58  ;;  %1684 = vmatprep.subr.bf16.mxu1 %v5662_v62  ;;  %v5672_v58 = vld [vmem:[#allocation71_spill] sm:$0xff]  ;;  %v5673_v62 = vld [vmem:[#allocation72_spill] sm:$0xff] }
 0x303   :  { %1644 = vmatpush1.bf16.msra.mxu0 %v5663_v0  ;;  %1685 = vmatpush1.bf16.msra.mxu1 %v5664_v1  ;;  %v5674_v0 = vld [vmem:[#allocation73_spill] sm:$0xff] }
 0x304   :  { %1645 = vmatprep.subr.bf16.mxu0 %v5665_v2  ;;  %1686 = vmatprep.subr.bf16.mxu1 %v5666_v7 }
 0x307   :  { %1646 = vmatpush1.bf16.msra.mxu0 %v5667_v9  ;;  %1687 = vmatpush1.bf16.msra.mxu1 %v5668_v39  ;;  %v1525_v9 = vld [vmem:[#allocation2] sm:$0x30] }
 0x308   :  { %1647 = vmatprep.subr.bf16.mxu0 %v5669_v54  ;;  %1688 = vmatprep.subr.bf16.mxu1 %v5670_v56 }
 0x30b   :  { %1648 = vmatpush1.bf16.msra.mxu0 %v5671_v57  ;;  %1689 = vmatpush1.bf16.msra.mxu1 %v5672_v58 }
 0x30c   :  { %1699 = vmatprep.subr.bf16.mxu0 %v5673_v62  ;;  %1740 = vmatprep.subr.bf16.mxu1 %v5674_v0  ;;  %v1528_v0 = vld [vmem:[#allocation2 + $0x18] sm:$0x30] }
 0x361   :  { %v1365_v1 = vpop.f32.mrb[12].mxu0  ;;  %v1406_v2 = vpop.f32.mrb[12].mxu1 }
 0x362   :  { %v1533_v50 = vrot.slane %v1365_v1, 4  ;;  %v1367_v7 = vpop.f32.mrb[13].mxu0  ;;  %v1408_v49 = vpop.f32.mrb[13].mxu1  ;;  %v1535_v34 = vrot.slane %v1406_v2, 4  ;;  %v1527_v1 = vld [vmem:[#allocation2 + $0x10] sm:$0x30] }
 0x363   :  { %v1534_v48 = vrot.slane %v1367_v7, 4  ;;  %v1369_v39 = vpop.f32.mrb[14].mxu0  ;;  %v1410_v46 = vpop.f32.mrb[14].mxu1  ;;  %v1536_v38 = vrot.slane %v1408_v49, 4 }
 0x364   :  { %v1541_v54 = vadd.f32 %v1533_v50, %v1525_v9  ;;  %v1370_v56 = vpop.f32.mrb[15].mxu0  ;;  %v1411_v41 = vpop.f32.mrb[15].mxu1  ;;  %v1543_v32 = vadd.f32 %v1535_v34, %v1527_v1 }
 0x365   :  { %v1542_v57 = vadd.f32 %v1534_v48, %v1526_v42  ;;  %v1544_v62 = vadd.f32 %v1536_v38, %v1528_v0 }
 0x366   :  { %v3305_v40 = vmul.f32 -1.442695, %v1541_v54 }
 0x367   :  { %v3306_v58 = vmul.f32 -1.442695, %v1542_v57  ;;  %v3307_v33 = vmul.f32 -1.442695, %v1544_v62 }
 0x368   :  { %3405 = vpow2.f32 %v3305_v40  ;;  %v1565_v40 = vrot.slane %v4194_v51, 6 }
 0x369   :  { %3407 = vpow2.f32 %v3306_v58 }
 0x36a   :  { %3409 = vpow2.f32 %v3307_v33 }
 0x36b   :  { %3411 = vtanh.f32 %v1543_v32 }
 0x372   :  { %v3406_v30 = vpop.eup %3405 }
 0x373   :  { %v3408_v7 = vpop.eup %3407  ;;  %v1548_v39 = vadd.f32 1.0, %v3406_v30 }
 0x374   :  { %v1554_v46 = vadd.f32 1.0, %v3408_v7  ;;  %v3410_v41 = vpop.eup %3409 }
 0x375   :  { %3413 = vrcp.f32 %v1548_v39  ;;  %v3412_v42 = vpop.eup %3411  ;;  %v1561_v38 = vadd.f32 1.0, %v3410_v41 }
 0x376   :  { %3415 = vrcp.f32 %v1554_v46 }
 0x377   :  { %3417 = vrcp.f32 %v1561_v38 }
 0x37f   :  { %v3414_v48 = vpop.eup %3413 }
 0x380   :  { %v3416_v49 = vpop.eup %3415  ;;  %v1568_v50 = vmul.f32 %v3414_v48, %v3412_v42 }
 0x381   :  { %v1567_v54 = vmul.f32 %v3416_v49, %v1565_v40  ;;  %v3418_v30 = vpop.eup %3417 }
 0x383   :  { %v4361_v56 = vadd.f32 %v1568_v50, %v1567_v54 }
 0x385   :  { %3419 = vtanh.f32 %v4361_v56 }
 0x38f   :  { %v3420_v33 = vpop.eup %3419 }
 0x390   :  { %v1571_v32 = vmul.f32 %v3420_v33, %v3418_v30 }
 0x392   :  { %v1572_v34 = vpack.c.bf16 %v1571_v32, %v1571_v32 }
 0x394   :  { %v1580_v57 = vrot.slane %v1572_v34, %v3935_v12 }
 0x396   :  { %v1587_v58 = vrot.slane %v1580_v57, %v3935_v12 }
 0x398   :  { %v1588_v62 = vcombine.high %v1587_v58, %v1587_v58 }
 0x39a   :  { %1590 = vst [vmem:[#allocation3] sm:$0x1] %v1588_v62 }
 0x3a1   :  { %v1447_v0 = vpop.f32.mrb[16].mxu0  ;;  %v1488_v2 = vpop.f32.mrb[16].mxu1 }
 0x3a2   :  { %v1495_v9 = vadd.f32 %v1447_v0, %v4203_v4  ;;  %v1449_v51 = vpop.f32.mrb[17].mxu0  ;;  %v1490_v1 = vpop.f32.mrb[17].mxu1  ;;  %v1497_v38 = vadd.f32 %v1488_v2, %v4218_v52 }
 0x3a3   :  { %v1496_v7 = vadd.f32 %v1449_v51, %v4207_v53  ;;  %v1451_v39 = vpop.f32.mrb[18].mxu0  ;;  %v1492_v46 = vpop.f32.mrb[18].mxu1  ;;  %v1498_v49 = vadd.f32 %v1490_v1, %v4213_v10 }
 0x3a4   :  { %v3302_v41 = vmul.f32 -1.442695, %v1495_v9  ;;  %v1452_v42 = vpop.f32.mrb[19].mxu0  ;;  %v1493_v48 = vpop.f32.mrb[19].mxu1 }
 0x3a5   :  { %v3303_v40 = vmul.f32 -1.442695, %v1496_v7  ;;  %v3304_v50 = vmul.f32 -1.442695, %v1498_v49  ;;  %v5676_v49 = vld [vmem:[#allocation83_spill] sm:$0xff] }
 0x3a6   :  { %3421 = vpow2.f32 %v3302_v41 }
 0x3a7   :  { %3423 = vpow2.f32 %v3303_v40 }
 0x3a8   :  { %3425 = vpow2.f32 %v3304_v50  ;;  %v5677_v50 = vld [vmem:[#allocation84_spill] sm:$0xff] }
 0x3a9   :  { %3427 = vtanh.f32 %v1497_v38  ;;  %v5678_v38 = vld [vmem:[#allocation85_spill] sm:$0xff] }
 0x3b0   :  { %v3422_v54 = vpop.eup %3421 }
 0x3b1   :  { %v3424_v30 = vpop.eup %3423  ;;  %v1502_v33 = vadd.f32 1.0, %v3422_v54  ;;  %v5679_v54 = vld [vmem:[#allocation86_spill] sm:$0xff] }
 0x3b2   :  { %v1508_v32 = vadd.f32 1.0, %v3424_v30  ;;  %v3426_v34 = vpop.eup %3425  ;;  %v5680_v30 = vld [vmem:[#allocation87_spill] sm:$0xff] }
 0x3b3   :  { %3429 = vrcp.f32 %v1502_v33  ;;  %v3428_v57 = vpop.eup %3427  ;;  %v1515_v9 = vadd.f32 1.0, %v3426_v34  ;;  %v5681_v33 = vld [vmem:[#allocation88_spill] sm:$0xff]  ;;  %v5683_v34 = vld [vmem:[#allocation90_spill] sm:$0xff] }
 0x3b4   :  { %3431 = vrcp.f32 %v1508_v32  ;;  %v5682_v32 = vld [vmem:[#allocation89_spill] sm:$0xff] }
 0x3b5   :  { %3433 = vrcp.f32 %v1515_v9  ;;  %v5688_v9 = vld [vmem:[#allocation95_spill] sm:$0xff] }
 0x3bd   :  { %v3430_v58 = vpop.eup %3429 }
 0x3be   :  { %v3432_v62 = vpop.eup %3431  ;;  %v1519_v0 = vmul.f32 %v3430_v58, %v3428_v57  ;;  %v5684_v57 = vld [vmem:[#allocation91_spill] sm:$0xff]  ;;  %v5685_v58 = vld [vmem:[#allocation92_spill] sm:$0xff] }
 0x3bf   :  { %v1518_v51 = vmul.f32 %v3432_v62, %v4221_v44  ;;  %v3434_v2 = vpop.eup %3433  ;;  %v5675_v44 = vld [vmem:[#allocation82_spill] sm:$0xff]  ;;  %v5686_v62 = vld [vmem:[#allocation93_spill] sm:$0xff] }
 0x3c1   :  { %v4371_v1 = vadd.f32 %v1519_v0, %v1518_v51  ;;  %v5687_v0 = vld [vmem:[#allocation94_spill] sm:$0xff]  ;;  %v5689_v51 = vld [vmem:[#allocation96_spill] sm:$0xff] }
 0x3c3   :  { %3435 = vtanh.f32 %v4371_v1 }
 0x3cd   :  { %v3436_v7 = vpop.eup %3435 }
 0x3ce   :  { %v1522_v39 = vmul.f32 %v3436_v7, %v3434_v2  ;;  %v5690_v2 = vld [vmem:[#allocation97_spill] sm:$0xff]  ;;  %v5691_v7 = vld [vmem:[#allocation98_spill] sm:$0xff] }
 0x3d0   :  { %v1523_v46 = vpack.c.bf16 %v1522_v39, %v1522_v39  ;;  %v5692_v39 = vld [vmem:[#allocation99_spill] sm:$0xff] }
 0x3d2   :  { %1524 = vst [vmem:[#allocation3 + $0x1] sm:$0x1] %v1523_v46  ;;  %v5693_v46 = vld [vmem:[#allocation100_spill] sm:$0xff] }
 0x3d9   :  { %v3308_v41 = vld.sshfl [vmem:[#allocation3] sm:$0x11 pattern:$0x75316420] }
 0x3da   :  { %v1600_v42 = vcombine.high %v3308_v41, %v3308_v41  ;;  %v4376_v40 = vrot.slane %v3308_v41, %v3935_v12  ;;  %v5694_v41 = vld [vmem:[#allocation101_spill] sm:$0xff] }
 0x3dc   :  { %v1614_v48 = vrot.slane %v1600_v42, %v3935_v12  ;;  %v5695_v42 = vld [vmem:[#allocation102_spill] sm:$0xff] }
 0x3de   :  { %1649 = vmatprep.mubr.bf16.mxu0 %v1614_v48  ;;  %1690 = vmatprep.mubr.bf16.mxu1 %v1614_v48 }
 0x3df   :  { %1650 = vmatmul.mubr.bf16.vlgmr.msra.gmra.mrb[20].mxu0 %v4376_v40  ;;  %1691 = vmatmul.mubr.bf16.vlgmr.msra.gmra.mrb[20].mxu1 %v4376_v40 }
 0x3e0   :  { %1700 = vmatpush1.bf16.msra.mxu0 %v5585_v8  ;;  %1741 = vmatpush1.bf16.msra.mxu1 %v5586_v13 }
 0x3e1   :  { %1731 = vmatprep.mubr.bf16.mxu0 %v1614_v48  ;;  %1772 = vmatprep.mubr.bf16.mxu1 %v1614_v48  ;;  %v5696_v48 = vld [vmem:[#allocation103_spill] sm:$0xff] }
 0x3e2   :  { %1701 = vmatprep.subr.bf16.mxu0 %v5587_v21  ;;  %1742 = vmatprep.subr.bf16.mxu1 %v5588_v31 }
 0x3e4   :  { %1702 = vmatpush1.bf16.msra.mxu0 %v5589_v29  ;;  %1743 = vmatpush1.bf16.msra.mxu1 %v5590_v35 }
 0x3e5   :  { %1703 = vmatprep.subr.bf16.mxu0 %v5591_v19  ;;  %1744 = vmatprep.subr.bf16.mxu1 %v5675_v44 }
 0x3e8   :  { %1704 = vmatpush1.bf16.msra.mxu0 %v5676_v49  ;;  %1745 = vmatpush1.bf16.msra.mxu1 %v5677_v50 }
 0x3e9   :  { %1705 = vmatprep.subr.bf16.mxu0 %v5678_v38  ;;  %1746 = vmatprep.subr.bf16.mxu1 %v5679_v54 }
 0x3ec   :  { %1706 = vmatpush1.bf16.msra.mxu0 %v5680_v30  ;;  %1747 = vmatpush1.bf16.msra.mxu1 %v5681_v33 }
 0x3ed   :  { %1707 = vmatprep.subr.bf16.mxu0 %v5682_v32  ;;  %1748 = vmatprep.subr.bf16.mxu1 %v5683_v34 }
 0x3f0   :  { %1708 = vmatpush1.bf16.msra.mxu0 %v5684_v57  ;;  %1749 = vmatpush1.bf16.msra.mxu1 %v5685_v58 }
 0x3f1   :  { %1709 = vmatprep.subr.bf16.mxu0 %v5686_v62  ;;  %1750 = vmatprep.subr.bf16.mxu1 %v5687_v0  ;;  %v5697_v62 = vld [vmem:[#allocation104_spill] sm:$0xff]  ;;  %v5698_v0 = vld [vmem:[#allocation105_spill] sm:$0xff] }
 0x3f4   :  { %1710 = vmatpush1.bf16.msra.mxu0 %v5688_v9  ;;  %1751 = vmatpush1.bf16.msra.mxu1 %v5689_v51  ;;  %v5699_v9 = vld [vmem:[#allocation106_spill] sm:$0xff]  ;;  %v5700_v51 = vld [vmem:[#allocation107_spill] sm:$0xff] }
 0x3f5   :  { %1711 = vmatprep.subr.bf16.mxu0 %v5690_v2  ;;  %1752 = vmatprep.subr.bf16.mxu1 %v5691_v7  ;;  %v5701_v2 = vld [vmem:[#allocation108_spill] sm:$0xff]  ;;  %v5702_v7 = vld [vmem:[#allocation109_spill] sm:$0xff] }
 0x3f8   :  { %1712 = vmatpush1.bf16.msra.mxu0 %v5692_v39  ;;  %1753 = vmatpush1.bf16.msra.mxu1 %v5693_v46  ;;  %v5703_v39 = vld [vmem:[#allocation110_spill] sm:$0xff]  ;;  %v5704_v46 = vld [vmem:[#allocation111_spill] sm:$0xff] }
 0x3f9   :  { %1713 = vmatprep.subr.bf16.mxu0 %v5694_v41  ;;  %1754 = vmatprep.subr.bf16.mxu1 %v5695_v42 }
 0x3fc   :  { %1714 = vmatpush1.bf16.msra.mxu0 %v5696_v48  ;;  %1755 = vmatpush1.bf16.msra.mxu1 %v5697_v62  ;;  %v5705_v62 = vld [vmem:[#allocation115_spill] sm:$0xff] }
 0x3fd   :  { %1715 = vmatprep.subr.bf16.mxu0 %v5698_v0  ;;  %1756 = vmatprep.subr.bf16.mxu1 %v5699_v9  ;;  %v5706_v0 = vld [vmem:[#allocation116_spill] sm:$0xff] }
 0x400   :  { %1716 = vmatpush1.bf16.msra.mxu0 %v5700_v51  ;;  %1757 = vmatpush1.bf16.msra.mxu1 %v5701_v2 }
 0x401   :  { %1717 = vmatprep.subr.bf16.mxu0 %v5702_v7  ;;  %1758 = vmatprep.subr.bf16.mxu1 %v5703_v39 }
 0x404   :  { %1718 = vmatpush1.bf16.msra.mxu0 %v5704_v46  ;;  %1759 = vmatpush1.bf16.msra.mxu1 %v5622_v11 }
 0x405   :  { %1719 = vmatprep.subr.bf16.mxu0 %v5623_v17  ;;  %1760 = vmatprep.subr.bf16.mxu1 %v5624_v28 }
 0x408   :  { %1720 = vmatpush1.bf16.msra.mxu0 %v5705_v62  ;;  %1761 = vmatpush1.bf16.msra.mxu1 %v5706_v0 }
 0x409   :  { %1721 = vmatprep.subr.bf16.mxu0 %v5627_v45  ;;  %1762 = vmatprep.subr.bf16.mxu1 %v5628_v5 }
 0x40c   :  { %1722 = vmatpush1.bf16.msra.mxu0 %v5629_v16  ;;  %1763 = vmatpush1.bf16.msra.mxu1 %v5630_v18 }
 0x40d   :  { %1723 = vmatprep.subr.bf16.mxu0 %v5631_v47  ;;  %1764 = vmatprep.subr.bf16.mxu1 %v5632_v15 }
 0x410   :  { %1724 = vmatpush1.bf16.msra.mxu0 %v4081_v61  ;;  %1765 = vmatpush1.bf16.msra.mxu1 %v4083_v59 }
 0x411   :  { %1725 = vmatprep.subr.bf16.mxu0 %v4087_v3  ;;  %1766 = vmatprep.subr.bf16.mxu1 %v5633_v43  ;;  %v1812_v43 = vld [vmem:[#allocation2 + $0x8] sm:$0xc0] }
 0x414   :  { %1726 = vmatpush1.bf16.msra.mxu0 %v5634_v27  ;;  %1767 = vmatpush1.bf16.msra.mxu1 %v4095_v55 }
 0x415   :  { %1727 = vmatprep.subr.bf16.mxu0 %v4099_v20  ;;  %1768 = vmatprep.subr.bf16.mxu1 %v4101_v37 }
 0x418   :  { %1728 = vmatpush1.bf16.msra.mxu0 %v4105_v60  ;;  %1769 = vmatpush1.bf16.msra.mxu1 %v4107_v36  ;;  %v5707_v36 = vld [vmem:[#allocation12_spill] sm:$0xff]  ;;  %v5714_v60 = vld [vmem:[#allocation19_spill] sm:$0xff] }
 0x419   :  { %1729 = vmatprep.subr.bf16.mxu0 %v4111_v6  ;;  %1770 = vmatprep.subr.bf16.mxu1 %v4113_v14  ;;  %v5708_v6 = vld [vmem:[#allocation13_spill] sm:$0xff]  ;;  %v5709_v14 = vld [vmem:[#allocation14_spill] sm:$0xff] }
 0x41c   :  { %1730 = vmatpush1.bf16.msra.mxu0 %v4117_v63  ;;  %1771 = vmatpush1.bf16.msra.mxu1 %v4119_v23  ;;  %v5710_v63 = vld [vmem:[#allocation15_spill] sm:$0xff]  ;;  %v5711_v23 = vld [vmem:[#allocation16_spill] sm:$0xff] }
 0x41d   :  { %1904 = vmatprep.subr.bf16.mxu0 %v3714_v22  ;;  %1945 = vmatprep.subr.bf16.mxu1 %v3716_v24  ;;  %v5712_v22 = vld [vmem:[#allocation17_spill] sm:$0xff]  ;;  %v5713_v24 = vld [vmem:[#allocation18_spill] sm:$0xff] }
 0x41f   :  { %1732 = vmatmul.mubr.bf16.vlgmr.msra.gmra.mrb[24].mxu0 %v4376_v40  ;;  %1773 = vmatmul.mubr.bf16.vlgmr.msra.gmra.mrb[24].mxu1 %v4376_v40  ;;  %v5715_v40 = vld [vmem:[#allocation20_spill] sm:$0xff] }
 0x420   :  { %1905 = vmatpush1.bf16.msra.mxu0 %v3718_v25  ;;  %1946 = vmatpush1.bf16.msra.mxu1 %v3720_v26  ;;  %v5716_v25 = vld [vmem:[#allocation21_spill] sm:$0xff]  ;;  %v5717_v26 = vld [vmem:[#allocation22_spill] sm:$0xff] }
 0x421   :  { %1906 = vmatprep.subr.bf16.mxu0 %v5707_v36  ;;  %1947 = vmatprep.subr.bf16.mxu1 %v5708_v6  ;;  %v5718_v36 = vld [vmem:[#allocation23_spill] sm:$0xff]  ;;  %v5719_v6 = vld [vmem:[#allocation24_spill] sm:$0xff] }
 0x424   :  { %1907 = vmatpush1.bf16.msra.mxu0 %v5709_v14  ;;  %1948 = vmatpush1.bf16.msra.mxu1 %v5710_v63  ;;  %v5720_v14 = vld [vmem:[#allocation25_spill] sm:$0xff]  ;;  %v5721_v63 = vld [vmem:[#allocation26_spill] sm:$0xff] }
 0x425   :  { %1908 = vmatprep.subr.bf16.mxu0 %v5711_v23  ;;  %1949 = vmatprep.subr.bf16.mxu1 %v5712_v22  ;;  %v5722_v23 = vld [vmem:[#allocation27_spill] sm:$0xff]  ;;  %v5723_v22 = vld [vmem:[#allocation28_spill] sm:$0xff] }
 0x428   :  { %1909 = vmatpush1.bf16.msra.mxu0 %v5713_v24  ;;  %1950 = vmatpush1.bf16.msra.mxu1 %v5714_v60  ;;  %v5724_v24 = vld [vmem:[#allocation29_spill] sm:$0xff]  ;;  %v5725_v60 = vld [vmem:[#allocation30_spill] sm:$0xff] }
 0x429   :  { %1910 = vmatprep.subr.bf16.mxu0 %v5715_v40  ;;  %1951 = vmatprep.subr.bf16.mxu1 %v5716_v25  ;;  %v5726_v40 = vld [vmem:[#allocation31_spill] sm:$0xff]  ;;  %v5727_v25 = vld [vmem:[#allocation32_spill] sm:$0xff] }
 0x42c   :  { %1911 = vmatpush1.bf16.msra.mxu0 %v5717_v26  ;;  %1952 = vmatpush1.bf16.msra.mxu1 %v5718_v36  ;;  %v5728_v26 = vld [vmem:[#allocation33_spill] sm:$0xff]  ;;  %v5729_v36 = vld [vmem:[#allocation34_spill] sm:$0xff] }
 0x42d   :  { %1912 = vmatprep.subr.bf16.mxu0 %v5719_v6  ;;  %1953 = vmatprep.subr.bf16.mxu1 %v5720_v14  ;;  %v5730_v6 = vld [vmem:[#allocation35_spill] sm:$0xff]  ;;  %v5731_v14 = vld [vmem:[#allocation36_spill] sm:$0xff] }
 0x430   :  { %1913 = vmatpush1.bf16.msra.mxu0 %v5721_v63  ;;  %1954 = vmatpush1.bf16.msra.mxu1 %v5722_v23  ;;  %v5732_v63 = vld [vmem:[#allocation37_spill] sm:$0xff]  ;;  %v5733_v23 = vld [vmem:[#allocation38_spill] sm:$0xff] }
 0x431   :  { %1914 = vmatprep.subr.bf16.mxu0 %v5723_v22  ;;  %1955 = vmatprep.subr.bf16.mxu1 %v5724_v24  ;;  %v5734_v22 = vld [vmem:[#allocation39_spill] sm:$0xff]  ;;  %v5735_v24 = vld [vmem:[#allocation40_spill] sm:$0xff] }
 0x434   :  { %1915 = vmatpush1.bf16.msra.mxu0 %v5725_v60  ;;  %1956 = vmatpush1.bf16.msra.mxu1 %v5726_v40  ;;  %v5736_v60 = vld [vmem:[#allocation41_spill] sm:$0xff]  ;;  %v5737_v40 = vld [vmem:[#allocation42_spill] sm:$0xff] }
 0x435   :  { %1916 = vmatprep.subr.bf16.mxu0 %v5727_v25  ;;  %1957 = vmatprep.subr.bf16.mxu1 %v5728_v26  ;;  %v5738_v25 = vld [vmem:[#allocation43_spill] sm:$0xff]  ;;  %v5739_v26 = vld [vmem:[#allocation44_spill] sm:$0xff] }
 0x438   :  { %1917 = vmatpush1.bf16.msra.mxu0 %v5729_v36  ;;  %1958 = vmatpush1.bf16.msra.mxu1 %v5730_v6  ;;  %v5740_v36 = vld [vmem:[#allocation45_spill] sm:$0xff]  ;;  %v5741_v6 = vld [vmem:[#allocation46_spill] sm:$0xff] }
 0x439   :  { %1918 = vmatprep.subr.bf16.mxu0 %v5731_v14  ;;  %1959 = vmatprep.subr.bf16.mxu1 %v5732_v63  ;;  %v5742_v14 = vld [vmem:[#allocation47_spill] sm:$0xff]  ;;  %v5743_v63 = vld [vmem:[#allocation48_spill] sm:$0xff] }
 0x43c   :  { %1919 = vmatpush1.bf16.msra.mxu0 %v5733_v23  ;;  %1960 = vmatpush1.bf16.msra.mxu1 %v5734_v22  ;;  %v5744_v23 = vld [vmem:[#allocation49_spill] sm:$0xff]  ;;  %v5745_v22 = vld [vmem:[#allocation50_spill] sm:$0xff] }
 0x43d   :  { %1920 = vmatprep.subr.bf16.mxu0 %v5735_v24  ;;  %1961 = vmatprep.subr.bf16.mxu1 %v5736_v60  ;;  %v5746_v24 = vld [vmem:[#allocation51_spill] sm:$0xff]  ;;  %v5747_v60 = vld [vmem:[#allocation52_spill] sm:$0xff] }
 0x440   :  { %1921 = vmatpush1.bf16.msra.mxu0 %v5737_v40  ;;  %1962 = vmatpush1.bf16.msra.mxu1 %v5738_v25  ;;  %v5748_v40 = vld [vmem:[#allocation53_spill] sm:$0xff]  ;;  %v5749_v25 = vld [vmem:[#allocation54_spill] sm:$0xff] }
 0x441   :  { %1922 = vmatprep.subr.bf16.mxu0 %v5739_v26  ;;  %1963 = vmatprep.subr.bf16.mxu1 %v5740_v36  ;;  %v5750_v26 = vld [vmem:[#allocation55_spill] sm:$0xff]  ;;  %v5751_v36 = vld [vmem:[#allocation56_spill] sm:$0xff] }
 0x444   :  { %1923 = vmatpush1.bf16.msra.mxu0 %v5741_v6  ;;  %1964 = vmatpush1.bf16.msra.mxu1 %v5742_v14  ;;  %v5752_v6 = vld [vmem:[#allocation57_spill] sm:$0xff]  ;;  %v5753_v14 = vld [vmem:[#allocation58_spill] sm:$0xff] }
 0x445   :  { %1924 = vmatprep.subr.bf16.mxu0 %v5743_v63  ;;  %1965 = vmatprep.subr.bf16.mxu1 %v5744_v23  ;;  %v5754_v63 = vld [vmem:[#allocation59_spill] sm:$0xff]  ;;  %v5755_v23 = vld [vmem:[#allocation60_spill] sm:$0xff] }
 0x448   :  { %1925 = vmatpush1.bf16.msra.mxu0 %v5745_v22  ;;  %1966 = vmatpush1.bf16.msra.mxu1 %v5746_v24  ;;  %v5756_v22 = vld [vmem:[#allocation61_spill] sm:$0xff]  ;;  %v5757_v24 = vld [vmem:[#allocation62_spill] sm:$0xff] }
 0x449   :  { %1926 = vmatprep.subr.bf16.mxu0 %v5747_v60  ;;  %1967 = vmatprep.subr.bf16.mxu1 %v5748_v40  ;;  %v5758_v60 = vld [vmem:[#allocation63_spill] sm:$0xff]  ;;  %v5759_v40 = vld [vmem:[#allocation64_spill] sm:$0xff] }
 0x44c   :  { %1927 = vmatpush1.bf16.msra.mxu0 %v5749_v25  ;;  %1968 = vmatpush1.bf16.msra.mxu1 %v5750_v26  ;;  %v5760_v25 = vld [vmem:[#allocation66_spill] sm:$0xff]  ;;  %v5761_v26 = vld [vmem:[#allocation65_spill] sm:$0xff] }
 0x44d   :  { %1928 = vmatprep.subr.bf16.mxu0 %v5751_v36  ;;  %1969 = vmatprep.subr.bf16.mxu1 %v5752_v6  ;;  %v5762_v36 = vld [vmem:[#allocation67_spill] sm:$0xff]  ;;  %v5763_v6 = vld [vmem:[#allocation68_spill] sm:$0xff] }
 0x450   :  { %1929 = vmatpush1.bf16.msra.mxu0 %v5753_v14  ;;  %1970 = vmatpush1.bf16.msra.mxu1 %v5754_v63  ;;  %v5764_v14 = vld [vmem:[#allocation69_spill] sm:$0xff]  ;;  %v5765_v63 = vld [vmem:[#allocation70_spill] sm:$0xff] }
 0x451   :  { %1930 = vmatprep.subr.bf16.mxu0 %v5755_v23  ;;  %1971 = vmatprep.subr.bf16.mxu1 %v5756_v22  ;;  %v5766_v23 = vld [vmem:[#allocation71_spill] sm:$0xff]  ;;  %v5767_v22 = vld [vmem:[#allocation72_spill] sm:$0xff] }
 0x454   :  { %1931 = vmatpush1.bf16.msra.mxu0 %v5757_v24  ;;  %1972 = vmatpush1.bf16.msra.mxu1 %v5758_v60  ;;  %v5768_v24 = vld [vmem:[#allocation73_spill] sm:$0xff] }
 0x455   :  { %1932 = vmatprep.subr.bf16.mxu0 %v5759_v40  ;;  %1973 = vmatprep.subr.bf16.mxu1 %v5760_v25 }
 0x458   :  { %1933 = vmatpush1.bf16.msra.mxu0 %v5761_v26  ;;  %1974 = vmatpush1.bf16.msra.mxu1 %v5762_v36  ;;  %v1811_v26 = vld [vmem:[#allocation2] sm:$0xc0] }
 0x459   :  { %1934 = vmatprep.subr.bf16.mxu0 %v5763_v6  ;;  %1975 = vmatprep.subr.bf16.mxu1 %v5764_v14 }
 0x45c   :  { %1935 = vmatpush1.bf16.msra.mxu0 %v5765_v63  ;;  %1976 = vmatpush1.bf16.msra.mxu1 %v5766_v23 }
 0x45d   :  { %1986 = vmatprep.subr.bf16.mxu0 %v5767_v22  ;;  %2027 = vmatprep.subr.bf16.mxu1 %v5768_v24  ;;  %v1814_v24 = vld [vmem:[#allocation2 + $0x18] sm:$0xc0] }
 0x4b2   :  { %v1651_v60 = vpop.f32.mrb[20].mxu0  ;;  %v1692_v40 = vpop.f32.mrb[20].mxu1 }
 0x4b3   :  { %v1819_v37 = vrot.slane %v1651_v60, 2  ;;  %v1653_v25 = vpop.f32.mrb[21].mxu0  ;;  %v1694_v20 = vpop.f32.mrb[21].mxu1  ;;  %v1821_v15 = vrot.slane %v1692_v40, 2  ;;  %v1813_v60 = vld [vmem:[#allocation2 + $0x10] sm:$0xc0] }
 0x4b4   :  { %v1820_v55 = vrot.slane %v1653_v25, 2  ;;  %v1655_v36 = vpop.f32.mrb[22].mxu0  ;;  %v1696_v27 = vpop.f32.mrb[22].mxu1  ;;  %v1822_v61 = vrot.slane %v1694_v20, 2 }
 0x4b5   :  { %v1827_v6 = vadd.f32 %v1819_v37, %v1811_v26  ;;  %v1656_v14 = vpop.f32.mrb[23].mxu0  ;;  %v1697_v3 = vpop.f32.mrb[23].mxu1  ;;  %v1829_v18 = vadd.f32 %v1821_v15, %v1813_v60 }
 0x4b6   :  { %v1828_v63 = vadd.f32 %v1820_v55, %v1812_v43  ;;  %v1830_v22 = vadd.f32 %v1822_v61, %v1814_v24 }
 0x4b7   :  { %v3312_v59 = vmul.f32 -1.442695, %v1827_v6 }
 0x4b8   :  { %v3313_v23 = vmul.f32 -1.442695, %v1828_v63  ;;  %v3314_v47 = vmul.f32 -1.442695, %v1830_v22 }
 0x4b9   :  { %3437 = vpow2.f32 %v3312_v59  ;;  %v1851_v59 = vrot.slane %v4361_v56, 6 }
 0x4ba   :  { %3439 = vpow2.f32 %v3313_v23 }
 0x4bb   :  { %3441 = vpow2.f32 %v3314_v47 }
 0x4bc   :  { %3443 = vtanh.f32 %v1829_v18 }
 0x4c3   :  { %v3438_v16 = vpop.eup %3437 }
 0x4c4   :  { %v3440_v25 = vpop.eup %3439  ;;  %v1834_v36 = vadd.f32 1.0, %v3438_v16 }
 0x4c5   :  { %v1840_v26 = vadd.f32 1.0, %v3440_v25  ;;  %v3442_v3 = vpop.eup %3441 }
 0x4c6   :  { %3445 = vrcp.f32 %v1834_v36  ;;  %v3444_v55 = vpop.eup %3443  ;;  %v1847_v24 = vadd.f32 1.0, %v3442_v3 }
 0x4c7   :  { %3447 = vrcp.f32 %v1840_v26 }
 0x4c8   :  { %3449 = vrcp.f32 %v1847_v24 }
 0x4d0   :  { %v3446_v63 = vpop.eup %3445 }
 0x4d1   :  { %v3448_v23 = vpop.eup %3447  ;;  %v1854_v20 = vmul.f32 %v3446_v63, %v3444_v55 }
 0x4d2   :  { %v1853_v61 = vmul.f32 %v3448_v23, %v1851_v59  ;;  %v3450_v22 = vpop.eup %3449 }
 0x4d4   :  { %v4511_v37 = vadd.f32 %v1854_v20, %v1853_v61 }
 0x4d6   :  { %3451 = vtanh.f32 %v4511_v37 }
 0x4e0   :  { %v3452_v6 = vpop.eup %3451 }
 0x4e1   :  { %v1857_v14 = vmul.f32 %v3452_v6, %v3450_v22 }
 0x4e3   :  { %v1858_v43 = vpack.c.bf16 %v1857_v14, %v1857_v14 }
 0x4e5   :  { %v1866_v27 = vrot.slane %v1858_v43, %v3935_v12 }
 0x4e7   :  { %v1867_v16 = vcombine.high %v1866_v27, %v1866_v27 }
 0x4e9   :  { %v1874_v18 = vrot.slane %v1867_v16, %v3935_v12 }
 0x4eb   :  { %v1875_v47 = vcombine.high %v1874_v18, %v1874_v18 }
 0x4ed   :  { %1877 = vst [vmem:[#allocation3] sm:$0x1] %v1875_v47 }
 0x4f2   :  { %v1733_v15 = vpop.f32.mrb[24].mxu0  ;;  %v1774_v56 = vpop.f32.mrb[24].mxu1 }
 0x4f3   :  { %v1781_v40 = vadd.f32 %v1733_v15, %v4203_v4  ;;  %v1735_v60 = vpop.f32.mrb[25].mxu0  ;;  %v1776_v25 = vpop.f32.mrb[25].mxu1  ;;  %v1783_v61 = vadd.f32 %v1774_v56, %v4218_v52 }
 0x4f4   :  { %v1782_v36 = vadd.f32 %v1735_v60, %v4207_v53  ;;  %v1737_v26 = vpop.f32.mrb[26].mxu0  ;;  %v1778_v3 = vpop.f32.mrb[26].mxu1  ;;  %v1784_v20 = vadd.f32 %v1776_v25, %v4213_v10 }
 0x4f5   :  { %v3309_v55 = vmul.f32 -1.442695, %v1781_v40  ;;  %v1738_v63 = vpop.f32.mrb[27].mxu0  ;;  %v1779_v59 = vpop.f32.mrb[27].mxu1 }
 0x4f6   :  { %v3310_v23 = vmul.f32 -1.442695, %v1782_v36  ;;  %v3311_v24 = vmul.f32 -1.442695, %v1784_v20  ;;  %v5770_v20 = vld [vmem:[#allocation94_spill] sm:$0xff] }
 0x4f7   :  { %3453 = vpow2.f32 %v3309_v55 }
 0x4f8   :  { %3455 = vpow2.f32 %v3310_v23 }
 0x4f9   :  { %3457 = vpow2.f32 %v3311_v24  ;;  %v5771_v24 = vld [vmem:[#allocation95_spill] sm:$0xff] }
 0x4fa   :  { %3459 = vtanh.f32 %v1783_v61  ;;  %v5772_v61 = vld [vmem:[#allocation96_spill] sm:$0xff] }
 0x501   :  { %v3454_v22 = vpop.eup %3453 }
 0x502   :  { %v3456_v6 = vpop.eup %3455  ;;  %v1788_v14 = vadd.f32 1.0, %v3454_v22  ;;  %v5773_v22 = vld [vmem:[#allocation97_spill] sm:$0xff] }
 0x503   :  { %v1794_v43 = vadd.f32 1.0, %v3456_v6  ;;  %v3458_v27 = vpop.eup %3457  ;;  %v5774_v6 = vld [vmem:[#allocation98_spill] sm:$0xff] }
 0x504   :  { %3461 = vrcp.f32 %v1788_v14  ;;  %v3460_v16 = vpop.eup %3459  ;;  %v1801_v40 = vadd.f32 1.0, %v3458_v27  ;;  %v5775_v14 = vld [vmem:[#allocation99_spill] sm:$0xff]  ;;  %v5777_v27 = vld [vmem:[#allocation104_spill] sm:$0xff] }
 0x505   :  { %3463 = vrcp.f32 %v1794_v43  ;;  %v5776_v43 = vld [vmem:[#allocation100_spill] sm:$0xff] }
 0x506   :  { %3465 = vrcp.f32 %v1801_v40  ;;  %v5782_v40 = vld [vmem:[#allocation122_spill] sm:$0xff] }
 0x50e   :  { %v3462_v18 = vpop.eup %3461 }
 0x50f   :  { %v3464_v47 = vpop.eup %3463  ;;  %v1805_v15 = vmul.f32 %v3462_v18, %v3460_v16  ;;  %v5778_v16 = vld [vmem:[#allocation105_spill] sm:$0xff]  ;;  %v5779_v18 = vld [vmem:[#allocation119_spill] sm:$0xff] }
 0x510   :  { %v1804_v60 = vmul.f32 %v3464_v47, %v4371_v1  ;;  %v3466_v56 = vpop.eup %3465  ;;  %v5769_v1 = vld [vmem:[#allocation93_spill] sm:$0xff]  ;;  %v5780_v47 = vld [vmem:[#allocation120_spill] sm:$0xff] }
 0x512   :  { %v4521_v25 = vadd.f32 %v1805_v15, %v1804_v60  ;;  %v5781_v15 = vld [vmem:[#allocation121_spill] sm:$0xff]  ;;  %v5783_v60 = vld [vmem:[#allocation123_spill] sm:$0xff] }
 0x514   :  { %3467 = vtanh.f32 %v4521_v25 }
 0x51e   :  { %v3468_v36 = vpop.eup %3467 }
 0x51f   :  { %v1808_v26 = vmul.f32 %v3468_v36, %v3466_v56  ;;  %v5784_v56 = vld [vmem:[#allocation124_spill] sm:$0xff]  ;;  %v5785_v36 = vld [vmem:[#allocation125_spill] sm:$0xff] }
 0x521   :  { %v1809_v3 = vpack.c.bf16 %v1808_v26, %v1808_v26  ;;  %v5786_v26 = vld [vmem:[#allocation126_spill] sm:$0xff] }
 0x523   :  { %1810 = vst [vmem:[#allocation3 + $0x1] sm:$0x1] %v1809_v3  ;;  %v5787_v3 = vld [vmem:[#allocation127_spill] sm:$0xff] }
 0x52a   :  { %v3315_v55 = vld.sshfl [vmem:[#allocation3] sm:$0x11 pattern:$0x75316420] }
 0x52b   :  { %v1887_v63 = vcombine.high %v3315_v55, %v3315_v55  ;;  %v4526_v23 = vrot.slane %v3315_v55, %v3935_v12  ;;  %v5788_v55 = vld [vmem:[#allocation128_spill] sm:$0xff] }
 0x52d   :  { %v1901_v59 = vrot.slane %v1887_v63, %v3935_v12  ;;  %v5789_v63 = vld [vmem:[#allocation129_spill] sm:$0xff] }
 0x52f   :  { %1936 = vmatprep.mubr.bf16.mxu0 %v1901_v59  ;;  %1977 = vmatprep.mubr.bf16.mxu1 %v1901_v59 }
 0x530   :  { %1937 = vmatmul.mubr.bf16.vlgmr.msra.gmra.mrb[28].mxu0 %v4526_v23  ;;  %1978 = vmatmul.mubr.bf16.vlgmr.msra.gmra.mrb[28].mxu1 %v4526_v23 }
 0x531   :  { %1987 = vmatpush1.bf16.msra.mxu0 %v5585_v8  ;;  %2028 = vmatpush1.bf16.msra.mxu1 %v5586_v13 }
 0x532   :  { %2018 = vmatprep.mubr.bf16.mxu0 %v1901_v59  ;;  %2059 = vmatprep.mubr.bf16.mxu1 %v1901_v59  ;;  %v5790_v59 = vld [vmem:[#allocation130_spill] sm:$0xff] }
 0x533   :  { %1988 = vmatprep.subr.bf16.mxu0 %v5587_v21  ;;  %2029 = vmatprep.subr.bf16.mxu1 %v5588_v31 }
 0x535   :  { %1989 = vmatpush1.bf16.msra.mxu0 %v5589_v29  ;;  %2030 = vmatpush1.bf16.msra.mxu1 %v5590_v35 }
 0x536   :  { %1990 = vmatprep.subr.bf16.mxu0 %v5591_v19  ;;  %2031 = vmatprep.subr.bf16.mxu1 %v5675_v44 }
 0x539   :  { %1991 = vmatpush1.bf16.msra.mxu0 %v5676_v49  ;;  %2032 = vmatpush1.bf16.msra.mxu1 %v5677_v50 }
 0x53a   :  { %1992 = vmatprep.subr.bf16.mxu0 %v5678_v38  ;;  %2033 = vmatprep.subr.bf16.mxu1 %v5679_v54 }
 0x53d   :  { %1993 = vmatpush1.bf16.msra.mxu0 %v5680_v30  ;;  %2034 = vmatpush1.bf16.msra.mxu1 %v5681_v33 }
 0x53e   :  { %1994 = vmatprep.subr.bf16.mxu0 %v5682_v32  ;;  %2035 = vmatprep.subr.bf16.mxu1 %v5683_v34 }
 0x541   :  { %1995 = vmatpush1.bf16.msra.mxu0 %v5684_v57  ;;  %2036 = vmatpush1.bf16.msra.mxu1 %v5685_v58 }
 0x542   :  { %1996 = vmatprep.subr.bf16.mxu0 %v5769_v1  ;;  %2037 = vmatprep.subr.bf16.mxu1 %v5770_v20 }
 0x545   :  { %1997 = vmatpush1.bf16.msra.mxu0 %v5771_v24  ;;  %2038 = vmatpush1.bf16.msra.mxu1 %v5772_v61 }
 0x546   :  { %1998 = vmatprep.subr.bf16.mxu0 %v5773_v22  ;;  %2039 = vmatprep.subr.bf16.mxu1 %v5774_v6 }
 0x549   :  { %1999 = vmatpush1.bf16.msra.mxu0 %v5775_v14  ;;  %2040 = vmatpush1.bf16.msra.mxu1 %v5776_v43 }
 0x54a   :  { %2000 = vmatprep.subr.bf16.mxu0 %v5694_v41  ;;  %2041 = vmatprep.subr.bf16.mxu1 %v5695_v42 }
 0x54d   :  { %2001 = vmatpush1.bf16.msra.mxu0 %v5696_v48  ;;  %2042 = vmatpush1.bf16.msra.mxu1 %v5777_v27 }
 0x54e   :  { %2002 = vmatprep.subr.bf16.mxu0 %v5778_v16  ;;  %2043 = vmatprep.subr.bf16.mxu1 %v5699_v9 }
 0x551   :  { %2003 = vmatpush1.bf16.msra.mxu0 %v5700_v51  ;;  %2044 = vmatpush1.bf16.msra.mxu1 %v5701_v2 }
 0x552   :  { %2004 = vmatprep.subr.bf16.mxu0 %v5702_v7  ;;  %2045 = vmatprep.subr.bf16.mxu1 %v5703_v39 }
 0x555   :  { %2005 = vmatpush1.bf16.msra.mxu0 %v5704_v46  ;;  %2046 = vmatpush1.bf16.msra.mxu1 %v5622_v11 }
 0x556   :  { %2006 = vmatprep.subr.bf16.mxu0 %v5623_v17  ;;  %2047 = vmatprep.subr.bf16.mxu1 %v5624_v28  ;;  %v2100_v28 = vld [vmem:[#allocation2 + $0x30] sm:$0x3] }
 0x559   :  { %2007 = vmatpush1.bf16.msra.mxu0 %v5705_v62  ;;  %2048 = vmatpush1.bf16.msra.mxu1 %v5706_v0 }
 0x55a   :  { %2008 = vmatprep.subr.bf16.mxu0 %v5627_v45  ;;  %2049 = vmatprep.subr.bf16.mxu1 %v5628_v5 }
 0x55d   :  { %2009 = vmatpush1.bf16.msra.mxu0 %v5779_v18  ;;  %2050 = vmatpush1.bf16.msra.mxu1 %v5780_v47  ;;  %v5791_v47 = vld [vmem:[#allocation131_spill] sm:$0xff] }
 0x55e   :  { %2010 = vmatprep.subr.bf16.mxu0 %v5781_v15  ;;  %2051 = vmatprep.subr.bf16.mxu1 %v5782_v40  ;;  %v5792_v15 = vld [vmem:[#allocation132_spill] sm:$0xff]  ;;  %v5793_v40 = vld [vmem:[#allocation133_spill] sm:$0xff] }
 0x561   :  { %2011 = vmatpush1.bf16.msra.mxu0 %v5783_v60  ;;  %2052 = vmatpush1.bf16.msra.mxu1 %v5784_v56  ;;  %v5794_v60 = vld [vmem:[#allocation134_spill] sm:$0xff]  ;;  %v5795_v56 = vld [vmem:[#allocation135_spill] sm:$0xff] }
 0x562   :  { %2012 = vmatprep.subr.bf16.mxu0 %v5785_v36  ;;  %2053 = vmatprep.subr.bf16.mxu1 %v5786_v26  ;;  %v5796_v36 = vld [vmem:[#allocation136_spill] sm:$0xff] }
 0x563   :  { %v5797_v26 = vld [vmem:[#allocation8_spill] sm:$0xff] }
 0x565   :  { %2013 = vmatpush1.bf16.msra.mxu0 %v5787_v3  ;;  %2054 = vmatpush1.bf16.msra.mxu1 %v5788_v55  ;;  %v5798_v3 = vld [vmem:[#allocation9_spill] sm:$0xff] }
 0x566   :  { %2014 = vmatprep.subr.bf16.mxu0 %v5789_v63  ;;  %2055 = vmatprep.subr.bf16.mxu1 %v5790_v59  ;;  %v5799_v59 = vld [vmem:[#allocation10_spill] sm:$0xff]  ;;  %v5808_v63 = vld [vmem:[#allocation19_spill] sm:$0xff] }
 0x569   :  { %2015 = vmatpush1.bf16.msra.mxu0 %v5791_v47  ;;  %2056 = vmatpush1.bf16.msra.mxu1 %v5792_v15  ;;  %v5800_v47 = vld [vmem:[#allocation11_spill] sm:$0xff]  ;;  %v5801_v15 = vld [vmem:[#allocation12_spill] sm:$0xff] }
 0x56a   :  { %2016 = vmatprep.subr.bf16.mxu0 %v5793_v40  ;;  %2057 = vmatprep.subr.bf16.mxu1 %v5794_v60  ;;  %v5802_v40 = vld [vmem:[#allocation13_spill] sm:$0xff]  ;;  %v5803_v60 = vld [vmem:[#allocation14_spill] sm:$0xff] }
 0x56d   :  { %2017 = vmatpush1.bf16.msra.mxu0 %v5795_v56  ;;  %2058 = vmatpush1.bf16.msra.mxu1 %v5796_v36  ;;  %v5804_v56 = vld [vmem:[#allocation15_spill] sm:$0xff]  ;;  %v5805_v36 = vld [vmem:[#allocation16_spill] sm:$0xff] }
 0x56e   :  { %2161 = vmatprep.subr.bf16.mxu0 %v5797_v26  ;;  %2202 = vmatprep.subr.bf16.mxu1 %v5798_v3  ;;  %v5806_v26 = vld [vmem:[#allocation17_spill] sm:$0xff]  ;;  %v5807_v3 = vld [vmem:[#allocation18_spill] sm:$0xff] }
 0x570   :  { %2019 = vmatmul.mubr.bf16.vlgmr.msra.gmra.mrb[32].mxu0 %v4526_v23  ;;  %2060 = vmatmul.mubr.bf16.vlgmr.msra.gmra.mrb[32].mxu1 %v4526_v23  ;;  %v5809_v23 = vld [vmem:[#allocation20_spill] sm:$0xff] }
 0x571   :  { %2162 = vmatpush1.bf16.msra.mxu0 %v5799_v59  ;;  %2203 = vmatpush1.bf16.msra.mxu1 %v5800_v47  ;;  %v5810_v59 = vld [vmem:[#allocation21_spill] sm:$0xff]  ;;  %v5811_v47 = vld [vmem:[#allocation22_spill] sm:$0xff] }
 0x572   :  { %2163 = vmatprep.subr.bf16.mxu0 %v5801_v15  ;;  %2204 = vmatprep.subr.bf16.mxu1 %v5802_v40  ;;  %v5812_v15 = vld [vmem:[#allocation23_spill] sm:$0xff]  ;;  %v5813_v40 = vld [vmem:[#allocation24_spill] sm:$0xff] }
 0x575   :  { %2164 = vmatpush1.bf16.msra.mxu0 %v5803_v60  ;;  %2205 = vmatpush1.bf16.msra.mxu1 %v5804_v56  ;;  %v5814_v60 = vld [vmem:[#allocation25_spill] sm:$0xff]  ;;  %v5815_v56 = vld [vmem:[#allocation26_spill] sm:$0xff] }
 0x576   :  { %2165 = vmatprep.subr.bf16.mxu0 %v5805_v36  ;;  %2206 = vmatprep.subr.bf16.mxu1 %v5806_v26  ;;  %v5816_v36 = vld [vmem:[#allocation27_spill] sm:$0xff]  ;;  %v5817_v26 = vld [vmem:[#allocation28_spill] sm:$0xff] }
 0x579   :  { %2166 = vmatpush1.bf16.msra.mxu0 %v5807_v3  ;;  %2207 = vmatpush1.bf16.msra.mxu1 %v5808_v63  ;;  %v5818_v3 = vld [vmem:[#allocation29_spill] sm:$0xff]  ;;  %v5819_v63 = vld [vmem:[#allocation30_spill] sm:$0xff] }
 0x57a   :  { %2167 = vmatprep.subr.bf16.mxu0 %v5809_v23  ;;  %2208 = vmatprep.subr.bf16.mxu1 %v5810_v59  ;;  %v5820_v23 = vld [vmem:[#allocation31_spill] sm:$0xff]  ;;  %v5821_v59 = vld [vmem:[#allocation32_spill] sm:$0xff] }
 0x57d   :  { %2168 = vmatpush1.bf16.msra.mxu0 %v5811_v47  ;;  %2209 = vmatpush1.bf16.msra.mxu1 %v5812_v15  ;;  %v5822_v47 = vld [vmem:[#allocation33_spill] sm:$0xff]  ;;  %v5823_v15 = vld [vmem:[#allocation34_spill] sm:$0xff] }
 0x57e   :  { %2169 = vmatprep.subr.bf16.mxu0 %v5813_v40  ;;  %2210 = vmatprep.subr.bf16.mxu1 %v5814_v60  ;;  %v5824_v40 = vld [vmem:[#allocation35_spill] sm:$0xff]  ;;  %v5825_v60 = vld [vmem:[#allocation36_spill] sm:$0xff] }
 0x581   :  { %2170 = vmatpush1.bf16.msra.mxu0 %v5815_v56  ;;  %2211 = vmatpush1.bf16.msra.mxu1 %v5816_v36  ;;  %v5826_v56 = vld [vmem:[#allocation37_spill] sm:$0xff]  ;;  %v5827_v36 = vld [vmem:[#allocation38_spill] sm:$0xff] }
 0x582   :  { %2171 = vmatprep.subr.bf16.mxu0 %v5817_v26  ;;  %2212 = vmatprep.subr.bf16.mxu1 %v5818_v3  ;;  %v5828_v26 = vld [vmem:[#allocation39_spill] sm:$0xff]  ;;  %v5829_v3 = vld [vmem:[#allocation40_spill] sm:$0xff] }
 0x585   :  { %2172 = vmatpush1.bf16.msra.mxu0 %v5819_v63  ;;  %2213 = vmatpush1.bf16.msra.mxu1 %v5820_v23  ;;  %v5830_v63 = vld [vmem:[#allocation41_spill] sm:$0xff]  ;;  %v5831_v23 = vld [vmem:[#allocation42_spill] sm:$0xff] }
 0x586   :  { %2173 = vmatprep.subr.bf16.mxu0 %v5821_v59  ;;  %2214 = vmatprep.subr.bf16.mxu1 %v5822_v47  ;;  %v5832_v59 = vld [vmem:[#allocation43_spill] sm:$0xff]  ;;  %v5833_v47 = vld [vmem:[#allocation44_spill] sm:$0xff] }
 0x589   :  { %2174 = vmatpush1.bf16.msra.mxu0 %v5823_v15  ;;  %2215 = vmatpush1.bf16.msra.mxu1 %v5824_v40  ;;  %v5834_v15 = vld [vmem:[#allocation45_spill] sm:$0xff]  ;;  %v5835_v40 = vld [vmem:[#allocation46_spill] sm:$0xff] }
 0x58a   :  { %2175 = vmatprep.subr.bf16.mxu0 %v5825_v60  ;;  %2216 = vmatprep.subr.bf16.mxu1 %v5826_v56  ;;  %v5836_v60 = vld [vmem:[#allocation47_spill] sm:$0xff]  ;;  %v5837_v56 = vld [vmem:[#allocation48_spill] sm:$0xff] }
 0x58d   :  { %2176 = vmatpush1.bf16.msra.mxu0 %v5827_v36  ;;  %2217 = vmatpush1.bf16.msra.mxu1 %v5828_v26  ;;  %v5838_v36 = vld [vmem:[#allocation49_spill] sm:$0xff]  ;;  %v5839_v26 = vld [vmem:[#allocation50_spill] sm:$0xff] }
 0x58e   :  { %2177 = vmatprep.subr.bf16.mxu0 %v5829_v3  ;;  %2218 = vmatprep.subr.bf16.mxu1 %v5830_v63  ;;  %v5840_v3 = vld [vmem:[#allocation51_spill] sm:$0xff]  ;;  %v5841_v63 = vld [vmem:[#allocation52_spill] sm:$0xff] }
 0x591   :  { %2178 = vmatpush1.bf16.msra.mxu0 %v5831_v23  ;;  %2219 = vmatpush1.bf16.msra.mxu1 %v5832_v59  ;;  %v5842_v23 = vld [vmem:[#allocation53_spill] sm:$0xff]  ;;  %v5843_v59 = vld [vmem:[#allocation54_spill] sm:$0xff] }
 0x592   :  { %2179 = vmatprep.subr.bf16.mxu0 %v5833_v47  ;;  %2220 = vmatprep.subr.bf16.mxu1 %v5834_v15  ;;  %v5844_v47 = vld [vmem:[#allocation55_spill] sm:$0xff]  ;;  %v5845_v15 = vld [vmem:[#allocation56_spill] sm:$0xff] }
 0x595   :  { %2180 = vmatpush1.bf16.msra.mxu0 %v5835_v40  ;;  %2221 = vmatpush1.bf16.msra.mxu1 %v5836_v60  ;;  %v5846_v40 = vld [vmem:[#allocation57_spill] sm:$0xff]  ;;  %v5847_v60 = vld [vmem:[#allocation58_spill] sm:$0xff] }
 0x596   :  { %2181 = vmatprep.subr.bf16.mxu0 %v5837_v56  ;;  %2222 = vmatprep.subr.bf16.mxu1 %v5838_v36  ;;  %v5848_v56 = vld [vmem:[#allocation59_spill] sm:$0xff]  ;;  %v5849_v36 = vld [vmem:[#allocation60_spill] sm:$0xff] }
 0x599   :  { %2182 = vmatpush1.bf16.msra.mxu0 %v5839_v26  ;;  %2223 = vmatpush1.bf16.msra.mxu1 %v5840_v3  ;;  %v5850_v26 = vld [vmem:[#allocation61_spill] sm:$0xff]  ;;  %v5851_v3 = vld [vmem:[#allocation62_spill] sm:$0xff] }
 0x59a   :  { %2183 = vmatprep.subr.bf16.mxu0 %v5841_v63  ;;  %2224 = vmatprep.subr.bf16.mxu1 %v5842_v23  ;;  %v5852_v63 = vld [vmem:[#allocation63_spill] sm:$0xff]  ;;  %v5853_v23 = vld [vmem:[#allocation64_spill] sm:$0xff] }
 0x59d   :  { %2184 = vmatpush1.bf16.msra.mxu0 %v5843_v59  ;;  %2225 = vmatpush1.bf16.msra.mxu1 %v5844_v47  ;;  %v5854_v59 = vld [vmem:[#allocation66_spill] sm:$0xff]  ;;  %v5855_v47 = vld [vmem:[#allocation65_spill] sm:$0xff] }
 0x59e   :  { %2185 = vmatprep.subr.bf16.mxu0 %v5845_v15  ;;  %2226 = vmatprep.subr.bf16.mxu1 %v5846_v40  ;;  %v5856_v15 = vld [vmem:[#allocation67_spill] sm:$0xff]  ;;  %v5857_v40 = vld [vmem:[#allocation68_spill] sm:$0xff] }
 0x5a1   :  { %2186 = vmatpush1.bf16.msra.mxu0 %v5847_v60  ;;  %2227 = vmatpush1.bf16.msra.mxu1 %v5848_v56  ;;  %v5858_v60 = vld [vmem:[#allocation69_spill] sm:$0xff]  ;;  %v5859_v56 = vld [vmem:[#allocation70_spill] sm:$0xff] }
 0x5a2   :  { %2187 = vmatprep.subr.bf16.mxu0 %v5849_v36  ;;  %2228 = vmatprep.subr.bf16.mxu1 %v5850_v26  ;;  %v5860_v36 = vld [vmem:[#allocation71_spill] sm:$0xff]  ;;  %v5861_v26 = vld [vmem:[#allocation72_spill] sm:$0xff] }
 0x5a5   :  { %2188 = vmatpush1.bf16.msra.mxu0 %v5851_v3  ;;  %2229 = vmatpush1.bf16.msra.mxu1 %v5852_v63  ;;  %v5862_v3 = vld [vmem:[#allocation73_spill] sm:$0xff] }
 0x5a6   :  { %2189 = vmatprep.subr.bf16.mxu0 %v5853_v23  ;;  %2230 = vmatprep.subr.bf16.mxu1 %v5854_v59  ;;  %v2098_v23 = vld [vmem:[#allocation2 + $0x20] sm:$0x3] }
 0x5a9   :  { %2190 = vmatpush1.bf16.msra.mxu0 %v5855_v47  ;;  %2231 = vmatpush1.bf16.msra.mxu1 %v5856_v15  ;;  %v2099_v47 = vld [vmem:[#allocation2 + $0x28] sm:$0x3] }
 0x5aa   :  { %2191 = vmatprep.subr.bf16.mxu0 %v5857_v40  ;;  %2232 = vmatprep.subr.bf16.mxu1 %v5858_v60 }
 0x5ad   :  { %2192 = vmatpush1.bf16.msra.mxu0 %v5859_v56  ;;  %2233 = vmatpush1.bf16.msra.mxu1 %v5860_v36  ;;  %v2101_v36 = vld [vmem:[#allocation2 + $0x38] sm:$0x3] }
 0x5ae   :  { %2243 = vmatprep.subr.bf16.mxu0 %v5861_v26  ;;  %2284 = vmatprep.subr.bf16.mxu1 %v5862_v3 }
 0x603   :  { %v1938_v63 = vpop.f32.mrb[28].mxu0  ;;  %v1979_v55 = vpop.f32.mrb[28].mxu1 }
 0x604   :  { %v2102_v59 = vadd.f32 %v2098_v23, %v1938_v63  ;;  %v1940_v18 = vpop.f32.mrb[29].mxu0  ;;  %v1981_v5 = vpop.f32.mrb[29].mxu1  ;;  %v2104_v17 = vadd.f32 %v2100_v28, %v1979_v55 }
 0x605   :  { %v2103_v15 = vadd.f32 %v2099_v47, %v1940_v18  ;;  %v1942_v45 = vpop.f32.mrb[30].mxu0  ;;  %v1983_v40 = vpop.f32.mrb[30].mxu1  ;;  %v2105_v26 = vadd.f32 %v2101_v36, %v1981_v5 }
 0x606   :  { %v3319_v0 = vmul.f32 -1.442695, %v2102_v59  ;;  %v1943_v60 = vpop.f32.mrb[31].mxu0  ;;  %v1984_v62 = vpop.f32.mrb[31].mxu1 }
 0x607   :  { %v3320_v56 = vmul.f32 -1.442695, %v2103_v15  ;;  %v3321_v3 = vmul.f32 -1.442695, %v2105_v26  ;;  %v2126_v62 = vrot.slane %v4511_v37, 6 }
 0x608   :  { %3469 = vpow2.f32 %v3319_v0 }
 0x609   :  { %3471 = vpow2.f32 %v3320_v56 }
 0x60a   :  { %3473 = vpow2.f32 %v3321_v3 }
 0x60b   :  { %3475 = vtanh.f32 %v2104_v17 }
 0x612   :  { %v3470_v11 = vpop.eup %3469 }
 0x613   :  { %v3472_v46 = vpop.eup %3471  ;;  %v2109_v63 = vadd.f32 1.0, %v3470_v11 }
 0x614   :  { %v2115_v23 = vadd.f32 1.0, %v3472_v46  ;;  %v3474_v45 = vpop.eup %3473 }
 0x615   :  { %3477 = vrcp.f32 %v2109_v63  ;;  %v3476_v18 = vpop.eup %3475  ;;  %v2122_v40 = vadd.f32 1.0, %v3474_v45 }
 0x616   :  { %3479 = vrcp.f32 %v2115_v23 }
 0x617   :  { %3481 = vrcp.f32 %v2122_v40 }
 0x61f   :  { %v3478_v47 = vpop.eup %3477 }
 0x620   :  { %v3480_v0 = vpop.eup %3479  ;;  %v2129_v15 = vmul.f32 %v3478_v47, %v3476_v18 }
 0x621   :  { %v2128_v5 = vmul.f32 %v3480_v0, %v2126_v62  ;;  %v3482_v11 = vpop.eup %3481 }
 0x623   :  { %v4661_v60 = vadd.f32 %v2129_v15, %v2128_v5 }
 0x625   :  { %3483 = vtanh.f32 %v4661_v60 }
 0x62f   :  { %v3484_v28 = vpop.eup %3483 }
 0x630   :  { %v2132_v17 = vmul.f32 %v3484_v28, %v3482_v11 }
 0x632   :  { %v2133_v46 = vpack.c.bf16 %v2132_v17, %v2132_v17 }
 0x634   :  { %2134 = vst [vmem:[#allocation3] sm:$0x1] %v2133_v46 }
 0x643   :  { %v2020_v56 = vpop.f32.mrb[32].mxu0  ;;  %v2061_v36 = vpop.f32.mrb[32].mxu1 }
 0x644   :  { %v2068_v26 = vadd.f32 %v2020_v56, %v4203_v4  ;;  %v2022_v3 = vpop.f32.mrb[33].mxu0  ;;  %v2063_v37 = vpop.f32.mrb[33].mxu1  ;;  %v2070_v15 = vadd.f32 %v2061_v36, %v4218_v52 }
 0x645   :  { %v2069_v55 = vadd.f32 %v2022_v3, %v4207_v53  ;;  %v2024_v59 = vpop.f32.mrb[34].mxu0  ;;  %v2065_v63 = vpop.f32.mrb[34].mxu1  ;;  %v2071_v62 = vadd.f32 %v2063_v37, %v4213_v10 }
 0x646   :  { %v3316_v23 = vmul.f32 -1.442695, %v2068_v26  ;;  %v2025_v45 = vpop.f32.mrb[35].mxu0  ;;  %v2066_v18 = vpop.f32.mrb[35].mxu1 }
 0x647   :  { %v3317_v47 = vmul.f32 -1.442695, %v2069_v55  ;;  %v3318_v0 = vmul.f32 -1.442695, %v2071_v62 }
 0x648   :  { %3485 = vpow2.f32 %v3316_v23 }
 0x649   :  { %3487 = vpow2.f32 %v3317_v47 }
 0x64a   :  { %3489 = vpow2.f32 %v3318_v0 }
 0x64b   :  { %3491 = vtanh.f32 %v2070_v15  ;;  %v5864_v15 = vld [vmem:[#allocation112_spill] sm:$0xff] }
 0x652   :  { %v3486_v40 = vpop.eup %3485 }
 0x653   :  { %v3488_v5 = vpop.eup %3487  ;;  %v2075_v11 = vadd.f32 1.0, %v3486_v40  ;;  %v5865_v40 = vld [vmem:[#allocation113_spill] sm:$0xff] }
 0x654   :  { %v2081_v28 = vadd.f32 1.0, %v3488_v5  ;;  %v3490_v17 = vpop.eup %3489  ;;  %v5866_v5 = vld [vmem:[#allocation114_spill] sm:$0xff] }
 0x655   :  { %3493 = vrcp.f32 %v2075_v11  ;;  %v3492_v46 = vpop.eup %3491  ;;  %v2088_v55 = vadd.f32 1.0, %v3490_v17  ;;  %v5867_v11 = vld [vmem:[#allocation115_spill] sm:$0xff]  ;;  %v5869_v17 = vld [vmem:[#allocation117_spill] sm:$0xff] }
 0x656   :  { %3495 = vrcp.f32 %v2081_v28  ;;  %v5868_v28 = vld [vmem:[#allocation116_spill] sm:$0xff] }
 0x657   :  { %3497 = vrcp.f32 %v2088_v55  ;;  %v5874_v55 = vld [vmem:[#allocation122_spill] sm:$0xff] }
 0x65f   :  { %v3494_v56 = vpop.eup %3493 }
 0x660   :  { %v3496_v26 = vpop.eup %3495  ;;  %v2092_v3 = vmul.f32 %v3494_v56, %v3492_v46  ;;  %v5870_v46 = vld [vmem:[#allocation118_spill] sm:$0xff]  ;;  %v5871_v56 = vld [vmem:[#allocation119_spill] sm:$0xff] }
 0x661   :  { %v2091_v59 = vmul.f32 %v3496_v26, %v4521_v25  ;;  %v3498_v36 = vpop.eup %3497  ;;  %v5863_v25 = vld [vmem:[#allocation111_spill] sm:$0xff]  ;;  %v5872_v26 = vld [vmem:[#allocation120_spill] sm:$0xff] }
 0x663   :  { %v4669_v37 = vadd.f32 %v2092_v3, %v2091_v59  ;;  %v5873_v3 = vld [vmem:[#allocation121_spill] sm:$0xff]  ;;  %v5875_v59 = vld [vmem:[#allocation123_spill] sm:$0xff] }
 0x665   :  { %3499 = vtanh.f32 %v4669_v37 }
 0x66f   :  { %v3500_v63 = vpop.eup %3499 }
 0x670   :  { %v2095_v23 = vmul.f32 %v3500_v63, %v3498_v36  ;;  %v5876_v36 = vld [vmem:[#allocation124_spill] sm:$0xff]  ;;  %v5877_v63 = vld [vmem:[#allocation125_spill] sm:$0xff] }
 0x672   :  { %v2096_v45 = vpack.c.bf16 %v2095_v23, %v2095_v23  ;;  %v5878_v23 = vld [vmem:[#allocation126_spill] sm:$0xff] }
 0x674   :  { %2097 = vst [vmem:[#allocation3 + $0x1] sm:$0x1] %v2096_v45  ;;  %v5879_v45 = vld [vmem:[#allocation127_spill] sm:$0xff] }
 0x67b   :  { %v3322_v18 = vld.sshfl [vmem:[#allocation3] sm:$0x11 pattern:$0x75316420] }
 0x67c   :  { %v2144_v47 = vcombine.high %v3322_v18, %v3322_v18  ;;  %v4674_v0 = vrot.slane %v3322_v18, %v3935_v12  ;;  %v5880_v18 = vld [vmem:[#allocation128_spill] sm:$0xff] }
 0x67e   :  { %v2158_v62 = vrot.slane %v2144_v47, %v3935_v12  ;;  %v5881_v47 = vld [vmem:[#allocation129_spill] sm:$0xff] }
 0x680   :  { %2193 = vmatprep.mubr.bf16.mxu0 %v2158_v62  ;;  %2234 = vmatprep.mubr.bf16.mxu1 %v2158_v62 }
 0x681   :  { %2194 = vmatmul.mubr.bf16.vlgmr.msra.gmra.mrb[36].mxu0 %v4674_v0  ;;  %2235 = vmatmul.mubr.bf16.vlgmr.msra.gmra.mrb[36].mxu1 %v4674_v0 }
 0x682   :  { %2244 = vmatpush1.bf16.msra.mxu0 %v5585_v8  ;;  %2285 = vmatpush1.bf16.msra.mxu1 %v5586_v13 }
 0x683   :  { %2275 = vmatprep.mubr.bf16.mxu0 %v2158_v62  ;;  %2316 = vmatprep.mubr.bf16.mxu1 %v2158_v62  ;;  %v5882_v62 = vld [vmem:[#allocation130_spill] sm:$0xff] }
 0x684   :  { %2245 = vmatprep.subr.bf16.mxu0 %v5587_v21  ;;  %2286 = vmatprep.subr.bf16.mxu1 %v5588_v31 }
 0x686   :  { %2246 = vmatpush1.bf16.msra.mxu0 %v5589_v29  ;;  %2287 = vmatpush1.bf16.msra.mxu1 %v5590_v35 }
 0x687   :  { %2247 = vmatprep.subr.bf16.mxu0 %v5591_v19  ;;  %2288 = vmatprep.subr.bf16.mxu1 %v5675_v44 }
 0x68a   :  { %2248 = vmatpush1.bf16.msra.mxu0 %v5676_v49  ;;  %2289 = vmatpush1.bf16.msra.mxu1 %v5677_v50 }
 0x68b   :  { %2249 = vmatprep.subr.bf16.mxu0 %v5678_v38  ;;  %2290 = vmatprep.subr.bf16.mxu1 %v5679_v54 }
 0x68e   :  { %2250 = vmatpush1.bf16.msra.mxu0 %v5680_v30  ;;  %2291 = vmatpush1.bf16.msra.mxu1 %v5681_v33 }
 0x68f   :  { %2251 = vmatprep.subr.bf16.mxu0 %v5682_v32  ;;  %2292 = vmatprep.subr.bf16.mxu1 %v5683_v34 }
 0x692   :  { %2252 = vmatpush1.bf16.msra.mxu0 %v5684_v57  ;;  %2293 = vmatpush1.bf16.msra.mxu1 %v5685_v58 }
 0x693   :  { %2253 = vmatprep.subr.bf16.mxu0 %v5769_v1  ;;  %2294 = vmatprep.subr.bf16.mxu1 %v5770_v20 }
 0x696   :  { %2254 = vmatpush1.bf16.msra.mxu0 %v5771_v24  ;;  %2295 = vmatpush1.bf16.msra.mxu1 %v5772_v61 }
 0x697   :  { %2255 = vmatprep.subr.bf16.mxu0 %v5773_v22  ;;  %2296 = vmatprep.subr.bf16.mxu1 %v5774_v6 }
 0x69a   :  { %2256 = vmatpush1.bf16.msra.mxu0 %v5775_v14  ;;  %2297 = vmatpush1.bf16.msra.mxu1 %v5776_v43 }
 0x69b   :  { %2257 = vmatprep.subr.bf16.mxu0 %v5694_v41  ;;  %2298 = vmatprep.subr.bf16.mxu1 %v5695_v42 }
 0x69e   :  { %2258 = vmatpush1.bf16.msra.mxu0 %v5696_v48  ;;  %2299 = vmatpush1.bf16.msra.mxu1 %v5777_v27 }
 0x69f   :  { %2259 = vmatprep.subr.bf16.mxu0 %v5778_v16  ;;  %2300 = vmatprep.subr.bf16.mxu1 %v5699_v9 }
 0x6a2   :  { %2260 = vmatpush1.bf16.msra.mxu0 %v5700_v51  ;;  %2301 = vmatpush1.bf16.msra.mxu1 %v5701_v2 }
 0x6a3   :  { %2261 = vmatprep.subr.bf16.mxu0 %v5702_v7  ;;  %2302 = vmatprep.subr.bf16.mxu1 %v5703_v39 }
 0x6a6   :  { %2262 = vmatpush1.bf16.msra.mxu0 %v5863_v25  ;;  %2303 = vmatpush1.bf16.msra.mxu1 %v5864_v15 }
 0x6a7   :  { %2263 = vmatprep.subr.bf16.mxu0 %v5865_v40  ;;  %2304 = vmatprep.subr.bf16.mxu1 %v5866_v5 }
 0x6aa   :  { %2264 = vmatpush1.bf16.msra.mxu0 %v5867_v11  ;;  %2305 = vmatpush1.bf16.msra.mxu1 %v5868_v28  ;;  %v2356_v28 = vld [vmem:[#allocation2 + $0x28] sm:$0xc] }
 0x6ab   :  { %2265 = vmatprep.subr.bf16.mxu0 %v5869_v17  ;;  %2306 = vmatprep.subr.bf16.mxu1 %v5870_v46 }
 0x6ae   :  { %2266 = vmatpush1.bf16.msra.mxu0 %v5871_v56  ;;  %2307 = vmatpush1.bf16.msra.mxu1 %v5872_v26  ;;  %v5883_v26 = vld [vmem:[#allocation131_spill] sm:$0xff] }
 0x6af   :  { %2267 = vmatprep.subr.bf16.mxu0 %v5873_v3  ;;  %2308 = vmatprep.subr.bf16.mxu1 %v5874_v55  ;;  %v5884_v3 = vld [vmem:[#allocation132_spill] sm:$0xff]  ;;  %v5885_v55 = vld [vmem:[#allocation133_spill] sm:$0xff] }
 0x6b2   :  { %2268 = vmatpush1.bf16.msra.mxu0 %v5875_v59  ;;  %2309 = vmatpush1.bf16.msra.mxu1 %v5876_v36  ;;  %v5886_v59 = vld [vmem:[#allocation134_spill] sm:$0xff]  ;;  %v5887_v36 = vld [vmem:[#allocation135_spill] sm:$0xff] }
 0x6b3   :  { %2269 = vmatprep.subr.bf16.mxu0 %v5877_v63  ;;  %2310 = vmatprep.subr.bf16.mxu1 %v5878_v23  ;;  %v5888_v63 = vld [vmem:[#allocation136_spill] sm:$0xff] }
 0x6b4   :  { %v5889_v23 = vld [vmem:[#allocation8_spill] sm:$0xff] }
 0x6b6   :  { %2270 = vmatpush1.bf16.msra.mxu0 %v5879_v45  ;;  %2311 = vmatpush1.bf16.msra.mxu1 %v5880_v18  ;;  %v5890_v45 = vld [vmem:[#allocation9_spill] sm:$0xff] }
 0x6b7   :  { %2271 = vmatprep.subr.bf16.mxu0 %v5881_v47  ;;  %2312 = vmatprep.subr.bf16.mxu1 %v5882_v62  ;;  %v5891_v62 = vld [vmem:[#allocation10_spill] sm:$0xff]  ;;  %v5900_v47 = vld [vmem:[#allocation19_spill] sm:$0xff] }
 0x6ba   :  { %2272 = vmatpush1.bf16.msra.mxu0 %v5883_v26  ;;  %2313 = vmatpush1.bf16.msra.mxu1 %v5884_v3  ;;  %v5892_v26 = vld [vmem:[#allocation11_spill] sm:$0xff]  ;;  %v5893_v3 = vld [vmem:[#allocation12_spill] sm:$0xff] }
 0x6bb   :  { %2273 = vmatprep.subr.bf16.mxu0 %v5885_v55  ;;  %2314 = vmatprep.subr.bf16.mxu1 %v5886_v59  ;;  %v5894_v55 = vld [vmem:[#allocation13_spill] sm:$0xff]  ;;  %v5895_v59 = vld [vmem:[#allocation14_spill] sm:$0xff] }
 0x6be   :  { %2274 = vmatpush1.bf16.msra.mxu0 %v5887_v36  ;;  %2315 = vmatpush1.bf16.msra.mxu1 %v5888_v63  ;;  %v5896_v36 = vld [vmem:[#allocation15_spill] sm:$0xff]  ;;  %v5897_v63 = vld [vmem:[#allocation16_spill] sm:$0xff] }
 0x6bf   :  { %2447 = vmatprep.subr.bf16.mxu0 %v5889_v23  ;;  %2488 = vmatprep.subr.bf16.mxu1 %v5890_v45  ;;  %v5898_v23 = vld [vmem:[#allocation17_spill] sm:$0xff]  ;;  %v5899_v45 = vld [vmem:[#allocation18_spill] sm:$0xff] }
 0x6c1   :  { %2276 = vmatmul.mubr.bf16.vlgmr.msra.gmra.mrb[40].mxu0 %v4674_v0  ;;  %2317 = vmatmul.mubr.bf16.vlgmr.msra.gmra.mrb[40].mxu1 %v4674_v0  ;;  %v5901_v0 = vld [vmem:[#allocation20_spill] sm:$0xff] }
 0x6c2   :  { %2448 = vmatpush1.bf16.msra.mxu0 %v5891_v62  ;;  %2489 = vmatpush1.bf16.msra.mxu1 %v5892_v26  ;;  %v5902_v62 = vld [vmem:[#allocation21_spill] sm:$0xff]  ;;  %v5903_v26 = vld [vmem:[#allocation22_spill] sm:$0xff] }
 0x6c3   :  { %2449 = vmatprep.subr.bf16.mxu0 %v5893_v3  ;;  %2490 = vmatprep.subr.bf16.mxu1 %v5894_v55  ;;  %v5904_v3 = vld [vmem:[#allocation23_spill] sm:$0xff]  ;;  %v5905_v55 = vld [vmem:[#allocation24_spill] sm:$0xff] }
 0x6c6   :  { %2450 = vmatpush1.bf16.msra.mxu0 %v5895_v59  ;;  %2491 = vmatpush1.bf16.msra.mxu1 %v5896_v36  ;;  %v5906_v59 = vld [vmem:[#allocation25_spill] sm:$0xff]  ;;  %v5907_v36 = vld [vmem:[#allocation26_spill] sm:$0xff] }
 0x6c7   :  { %2451 = vmatprep.subr.bf16.mxu0 %v5897_v63  ;;  %2492 = vmatprep.subr.bf16.mxu1 %v5898_v23  ;;  %v5908_v63 = vld [vmem:[#allocation27_spill] sm:$0xff]  ;;  %v5909_v23 = vld [vmem:[#allocation28_spill] sm:$0xff] }
 0x6ca   :  { %2452 = vmatpush1.bf16.msra.mxu0 %v5899_v45  ;;  %2493 = vmatpush1.bf16.msra.mxu1 %v5900_v47  ;;  %v5910_v45 = vld [vmem:[#allocation29_spill] sm:$0xff]  ;;  %v5911_v47 = vld [vmem:[#allocation30_spill] sm:$0xff] }
 0x6cb   :  { %2453 = vmatprep.subr.bf16.mxu0 %v5901_v0  ;;  %2494 = vmatprep.subr.bf16.mxu1 %v5902_v62  ;;  %v5912_v0 = vld [vmem:[#allocation31_spill] sm:$0xff]  ;;  %v5913_v62 = vld [vmem:[#allocation32_spill] sm:$0xff] }
 0x6ce   :  { %2454 = vmatpush1.bf16.msra.mxu0 %v5903_v26  ;;  %2495 = vmatpush1.bf16.msra.mxu1 %v5904_v3  ;;  %v5914_v26 = vld [vmem:[#allocation33_spill] sm:$0xff]  ;;  %v5915_v3 = vld [vmem:[#allocation34_spill] sm:$0xff] }
 0x6cf   :  { %2455 = vmatprep.subr.bf16.mxu0 %v5905_v55  ;;  %2496 = vmatprep.subr.bf16.mxu1 %v5906_v59  ;;  %v5916_v55 = vld [vmem:[#allocation35_spill] sm:$0xff]  ;;  %v5917_v59 = vld [vmem:[#allocation36_spill] sm:$0xff] }
 0x6d2   :  { %2456 = vmatpush1.bf16.msra.mxu0 %v5907_v36  ;;  %2497 = vmatpush1.bf16.msra.mxu1 %v5908_v63  ;;  %v5918_v36 = vld [vmem:[#allocation37_spill] sm:$0xff]  ;;  %v5919_v63 = vld [vmem:[#allocation38_spill] sm:$0xff] }
 0x6d3   :  { %2457 = vmatprep.subr.bf16.mxu0 %v5909_v23  ;;  %2498 = vmatprep.subr.bf16.mxu1 %v5910_v45  ;;  %v5920_v23 = vld [vmem:[#allocation39_spill] sm:$0xff]  ;;  %v5921_v45 = vld [vmem:[#allocation40_spill] sm:$0xff] }
 0x6d6   :  { %2458 = vmatpush1.bf16.msra.mxu0 %v5911_v47  ;;  %2499 = vmatpush1.bf16.msra.mxu1 %v5912_v0  ;;  %v5922_v47 = vld [vmem:[#allocation41_spill] sm:$0xff]  ;;  %v5923_v0 = vld [vmem:[#allocation42_spill] sm:$0xff] }
 0x6d7   :  { %2459 = vmatprep.subr.bf16.mxu0 %v5913_v62  ;;  %2500 = vmatprep.subr.bf16.mxu1 %v5914_v26  ;;  %v5924_v62 = vld [vmem:[#allocation43_spill] sm:$0xff]  ;;  %v5925_v26 = vld [vmem:[#allocation44_spill] sm:$0xff] }
 0x6da   :  { %2460 = vmatpush1.bf16.msra.mxu0 %v5915_v3  ;;  %2501 = vmatpush1.bf16.msra.mxu1 %v5916_v55  ;;  %v5926_v3 = vld [vmem:[#allocation45_spill] sm:$0xff]  ;;  %v5927_v55 = vld [vmem:[#allocation46_spill] sm:$0xff] }
 0x6db   :  { %2461 = vmatprep.subr.bf16.mxu0 %v5917_v59  ;;  %2502 = vmatprep.subr.bf16.mxu1 %v5918_v36  ;;  %v5928_v59 = vld [vmem:[#allocation47_spill] sm:$0xff]  ;;  %v5929_v36 = vld [vmem:[#allocation48_spill] sm:$0xff] }
 0x6de   :  { %2462 = vmatpush1.bf16.msra.mxu0 %v5919_v63  ;;  %2503 = vmatpush1.bf16.msra.mxu1 %v5920_v23  ;;  %v5930_v63 = vld [vmem:[#allocation49_spill] sm:$0xff]  ;;  %v5931_v23 = vld [vmem:[#allocation50_spill] sm:$0xff] }
 0x6df   :  { %2463 = vmatprep.subr.bf16.mxu0 %v5921_v45  ;;  %2504 = vmatprep.subr.bf16.mxu1 %v5922_v47  ;;  %v5932_v45 = vld [vmem:[#allocation51_spill] sm:$0xff]  ;;  %v5933_v47 = vld [vmem:[#allocation52_spill] sm:$0xff] }
 0x6e2   :  { %2464 = vmatpush1.bf16.msra.mxu0 %v5923_v0  ;;  %2505 = vmatpush1.bf16.msra.mxu1 %v5924_v62  ;;  %v5934_v0 = vld [vmem:[#allocation53_spill] sm:$0xff]  ;;  %v5935_v62 = vld [vmem:[#allocation54_spill] sm:$0xff] }
 0x6e3   :  { %2465 = vmatprep.subr.bf16.mxu0 %v5925_v26  ;;  %2506 = vmatprep.subr.bf16.mxu1 %v5926_v3  ;;  %v5936_v26 = vld [vmem:[#allocation55_spill] sm:$0xff]  ;;  %v5937_v3 = vld [vmem:[#allocation56_spill] sm:$0xff] }
 0x6e6   :  { %2466 = vmatpush1.bf16.msra.mxu0 %v5927_v55  ;;  %2507 = vmatpush1.bf16.msra.mxu1 %v5928_v59  ;;  %v5938_v55 = vld [vmem:[#allocation57_spill] sm:$0xff]  ;;  %v5939_v59 = vld [vmem:[#allocation58_spill] sm:$0xff] }
 0x6e7   :  { %2467 = vmatprep.subr.bf16.mxu0 %v5929_v36  ;;  %2508 = vmatprep.subr.bf16.mxu1 %v5930_v63  ;;  %v5940_v36 = vld [vmem:[#allocation59_spill] sm:$0xff]  ;;  %v5941_v63 = vld [vmem:[#allocation60_spill] sm:$0xff] }
 0x6ea   :  { %2468 = vmatpush1.bf16.msra.mxu0 %v5931_v23  ;;  %2509 = vmatpush1.bf16.msra.mxu1 %v5932_v45  ;;  %v5942_v23 = vld [vmem:[#allocation61_spill] sm:$0xff]  ;;  %v5943_v45 = vld [vmem:[#allocation62_spill] sm:$0xff] }
 0x6eb   :  { %2469 = vmatprep.subr.bf16.mxu0 %v5933_v47  ;;  %2510 = vmatprep.subr.bf16.mxu1 %v5934_v0  ;;  %v5944_v47 = vld [vmem:[#allocation63_spill] sm:$0xff]  ;;  %v5945_v0 = vld [vmem:[#allocation64_spill] sm:$0xff] }
 0x6ee   :  { %2470 = vmatpush1.bf16.msra.mxu0 %v5935_v62  ;;  %2511 = vmatpush1.bf16.msra.mxu1 %v5936_v26  ;;  %v5946_v62 = vld [vmem:[#allocation66_spill] sm:$0xff]  ;;  %v5947_v26 = vld [vmem:[#allocation65_spill] sm:$0xff] }
 0x6ef   :  { %2471 = vmatprep.subr.bf16.mxu0 %v5937_v3  ;;  %2512 = vmatprep.subr.bf16.mxu1 %v5938_v55  ;;  %v5948_v3 = vld [vmem:[#allocation67_spill] sm:$0xff]  ;;  %v5949_v55 = vld [vmem:[#allocation68_spill] sm:$0xff] }
 0x6f2   :  { %2472 = vmatpush1.bf16.msra.mxu0 %v5939_v59  ;;  %2513 = vmatpush1.bf16.msra.mxu1 %v5940_v36  ;;  %v5950_v59 = vld [vmem:[#allocation69_spill] sm:$0xff]  ;;  %v5951_v36 = vld [vmem:[#allocation70_spill] sm:$0xff] }
 0x6f3   :  { %2473 = vmatprep.subr.bf16.mxu0 %v5941_v63  ;;  %2514 = vmatprep.subr.bf16.mxu1 %v5942_v23  ;;  %v5952_v63 = vld [vmem:[#allocation71_spill] sm:$0xff]  ;;  %v5953_v23 = vld [vmem:[#allocation72_spill] sm:$0xff] }
 0x6f6   :  { %2474 = vmatpush1.bf16.msra.mxu0 %v5943_v45  ;;  %2515 = vmatpush1.bf16.msra.mxu1 %v5944_v47  ;;  %v5954_v45 = vld [vmem:[#allocation73_spill] sm:$0xff] }
 0x6f7   :  { %2475 = vmatprep.subr.bf16.mxu0 %v5945_v0  ;;  %2516 = vmatprep.subr.bf16.mxu1 %v5946_v62 }
 0x6fa   :  { %2476 = vmatpush1.bf16.msra.mxu0 %v5947_v26  ;;  %2517 = vmatpush1.bf16.msra.mxu1 %v5948_v3  ;;  %v2355_v26 = vld [vmem:[#allocation2 + $0x20] sm:$0xc] }
 0x6fb   :  { %2477 = vmatprep.subr.bf16.mxu0 %v5949_v55  ;;  %2518 = vmatprep.subr.bf16.mxu1 %v5950_v59 }
 0x6fe   :  { %2478 = vmatpush1.bf16.msra.mxu0 %v5951_v36  ;;  %2519 = vmatpush1.bf16.msra.mxu1 %v5952_v63 }
 0x6ff   :  { %2529 = vmatprep.subr.bf16.mxu0 %v5953_v23  ;;  %2570 = vmatprep.subr.bf16.mxu1 %v5954_v45  ;;  %v2358_v45 = vld [vmem:[#allocation2 + $0x38] sm:$0xc] }
 0x754   :  { %v2195_v47 = vpop.f32.mrb[36].mxu0  ;;  %v2236_v0 = vpop.f32.mrb[36].mxu1 }
 0x755   :  { %v2363_v18 = vrot.slane %v2195_v47, 6  ;;  %v2197_v62 = vpop.f32.mrb[37].mxu0  ;;  %v2238_v56 = vpop.f32.mrb[37].mxu1  ;;  %v2365_v15 = vrot.slane %v2236_v0, 6  ;;  %v2357_v47 = vld [vmem:[#allocation2 + $0x30] sm:$0xc] }
 0x756   :  { %v2364_v46 = vrot.slane %v2197_v62, 6  ;;  %v2199_v3 = vpop.f32.mrb[38].mxu0  ;;  %v2240_v17 = vpop.f32.mrb[38].mxu1  ;;  %v2366_v40 = vrot.slane %v2238_v56, 6 }
 0x757   :  { %v2371_v55 = vadd.f32 %v2363_v18, %v2355_v26  ;;  %v2200_v59 = vpop.f32.mrb[39].mxu0  ;;  %v2241_v11 = vpop.f32.mrb[39].mxu1  ;;  %v2373_v39 = vadd.f32 %v2365_v15, %v2357_v47 }
 0x758   :  { %v2372_v36 = vadd.f32 %v2364_v46, %v2356_v28  ;;  %v2374_v23 = vadd.f32 %v2366_v40, %v2358_v45 }
 0x759   :  { %v3326_v5 = vmul.f32 -1.442695, %v2371_v55 }
 0x75a   :  { %v3327_v63 = vmul.f32 -1.442695, %v2372_v36  ;;  %v3328_v25 = vmul.f32 -1.442695, %v2374_v23 }
 0x75b   :  { %3501 = vpow2.f32 %v3326_v5  ;;  %v2395_v5 = vrot.slane %v4661_v60, 6 }
 0x75c   :  { %3503 = vpow2.f32 %v3327_v63 }
 0x75d   :  { %3505 = vpow2.f32 %v3328_v25 }
 0x75e   :  { %3507 = vtanh.f32 %v2373_v39 }
 0x765   :  { %v3502_v7 = vpop.eup %3501 }
 0x766   :  { %v3504_v62 = vpop.eup %3503  ;;  %v2378_v3 = vadd.f32 1.0, %v3502_v7 }
 0x767   :  { %v2384_v17 = vadd.f32 1.0, %v3504_v62  ;;  %v3506_v11 = vpop.eup %3505 }
 0x768   :  { %3509 = vrcp.f32 %v2378_v3  ;;  %v3508_v28 = vpop.eup %3507  ;;  %v2391_v40 = vadd.f32 1.0, %v3506_v11 }
 0x769   :  { %3511 = vrcp.f32 %v2384_v17 }
 0x76a   :  { %3513 = vrcp.f32 %v2391_v40 }
 0x772   :  { %v3510_v46 = vpop.eup %3509 }
 0x773   :  { %v3512_v56 = vpop.eup %3511  ;;  %v2398_v26 = vmul.f32 %v3510_v46, %v3508_v28 }
 0x774   :  { %v2397_v55 = vmul.f32 %v3512_v56, %v2395_v5  ;;  %v3514_v7 = vpop.eup %3513 }
 0x776   :  { %v4809_v59 = vadd.f32 %v2398_v26, %v2397_v55 }
 0x778   :  { %3515 = vtanh.f32 %v4809_v59 }
 0x782   :  { %v3516_v25 = vpop.eup %3515 }
 0x783   :  { %v2401_v39 = vmul.f32 %v3516_v25, %v3514_v7 }
 0x785   :  { %v2402_v15 = vpack.c.bf16 %v2401_v39, %v2401_v39 }
 0x787   :  { %v2410_v36 = vrot.slane %v2402_v15, %v3935_v12 }
 0x789   :  { %v2411_v63 = vcombine.high %v2410_v36, %v2410_v36 }
 0x78b   :  { %3329 = vst.sshfl [vmem:[#allocation3] sm:$0x1 pattern:$0x73625140] %v2411_v63 }
 0x794   :  { %v2277_v23 = vpop.f32.mrb[40].mxu0  ;;  %v2318_v45 = vpop.f32.mrb[40].mxu1 }
 0x795   :  { %v2325_v60 = vadd.f32 %v2277_v23, %v4203_v4  ;;  %v2279_v18 = vpop.f32.mrb[41].mxu0  ;;  %v2320_v0 = vpop.f32.mrb[41].mxu1  ;;  %v2327_v26 = vadd.f32 %v2318_v45, %v4218_v52 }
 0x796   :  { %v2326_v47 = vadd.f32 %v2279_v18, %v4207_v53  ;;  %v2281_v62 = vpop.f32.mrb[42].mxu0  ;;  %v2322_v3 = vpop.f32.mrb[42].mxu1  ;;  %v2328_v5 = vadd.f32 %v2320_v0, %v4213_v10 }
 0x797   :  { %v3323_v17 = vmul.f32 -1.442695, %v2325_v60  ;;  %v2282_v11 = vpop.f32.mrb[43].mxu0  ;;  %v2323_v28 = vpop.f32.mrb[43].mxu1 }
 0x798   :  { %v3324_v46 = vmul.f32 -1.442695, %v2326_v47  ;;  %v3325_v56 = vmul.f32 -1.442695, %v2328_v5  ;;  %v5956_v5 = vld [vmem:[#allocation110_spill] sm:$0xff] }
 0x799   :  { %3517 = vpow2.f32 %v3323_v17 }
 0x79a   :  { %3519 = vpow2.f32 %v3324_v46 }
 0x79b   :  { %3521 = vpow2.f32 %v3325_v56  ;;  %v5957_v56 = vld [vmem:[#allocation111_spill] sm:$0xff] }
 0x79c   :  { %3523 = vtanh.f32 %v2327_v26  ;;  %v5958_v26 = vld [vmem:[#allocation112_spill] sm:$0xff] }
 0x7a3   :  { %v3518_v40 = vpop.eup %3517 }
 0x7a4   :  { %v3520_v55 = vpop.eup %3519  ;;  %v2332_v7 = vadd.f32 1.0, %v3518_v40  ;;  %v5959_v40 = vld [vmem:[#allocation113_spill] sm:$0xff] }
 0x7a5   :  { %v2338_v25 = vadd.f32 1.0, %v3520_v55  ;;  %v3522_v39 = vpop.eup %3521  ;;  %v5960_v55 = vld [vmem:[#allocation114_spill] sm:$0xff] }
 0x7a6   :  { %3525 = vrcp.f32 %v2332_v7  ;;  %v3524_v15 = vpop.eup %3523  ;;  %v2345_v60 = vadd.f32 1.0, %v3522_v39  ;;  %v5961_v7 = vld [vmem:[#allocation115_spill] sm:$0xff]  ;;  %v5963_v39 = vld [vmem:[#allocation117_spill] sm:$0xff] }
 0x7a7   :  { %3527 = vrcp.f32 %v2338_v25  ;;  %v5962_v25 = vld [vmem:[#allocation116_spill] sm:$0xff] }
 0x7a8   :  { %3529 = vrcp.f32 %v2345_v60  ;;  %v5968_v60 = vld [vmem:[#allocation122_spill] sm:$0xff] }
 0x7b0   :  { %v3526_v36 = vpop.eup %3525 }
 0x7b1   :  { %v3528_v63 = vpop.eup %3527  ;;  %v2349_v23 = vmul.f32 %v3526_v36, %v3524_v15  ;;  %v5964_v15 = vld [vmem:[#allocation118_spill] sm:$0xff]  ;;  %v5965_v36 = vld [vmem:[#allocation119_spill] sm:$0xff] }
 0x7b2   :  { %v2348_v18 = vmul.f32 %v3528_v63, %v4669_v37  ;;  %v3530_v45 = vpop.eup %3529  ;;  %v5955_v37 = vld [vmem:[#allocation109_spill] sm:$0xff]  ;;  %v5966_v63 = vld [vmem:[#allocation120_spill] sm:$0xff] }
 0x7b4   :  { %v4818_v0 = vadd.f32 %v2349_v23, %v2348_v18  ;;  %v5967_v23 = vld [vmem:[#allocation121_spill] sm:$0xff]  ;;  %v5969_v18 = vld [vmem:[#allocation123_spill] sm:$0xff] }
 0x7b6   :  { %3531 = vtanh.f32 %v4818_v0 }
 0x7c0   :  { %v3532_v47 = vpop.eup %3531 }
 0x7c1   :  { %v2352_v62 = vmul.f32 %v3532_v47, %v3530_v45  ;;  %v5970_v45 = vld [vmem:[#allocation124_spill] sm:$0xff]  ;;  %v5971_v47 = vld [vmem:[#allocation125_spill] sm:$0xff] }
 0x7c3   :  { %v2353_v3 = vpack.c.bf16 %v2352_v62, %v2352_v62  ;;  %v5972_v62 = vld [vmem:[#allocation126_spill] sm:$0xff] }
 0x7c5   :  { %2354 = vst [vmem:[#allocation3 + $0x1] sm:$0x1] %v2353_v3  ;;  %v5973_v3 = vld [vmem:[#allocation127_spill] sm:$0xff] }
 0x7cc   :  { %v3330_v17 = vld.sshfl [vmem:[#allocation3] sm:$0x11 pattern:$0x75316420] }
 0x7cd   :  { %v2430_v11 = vcombine.high %v3330_v17, %v3330_v17  ;;  %v4823_v46 = vrot.slane %v3330_v17, %v3935_v12  ;;  %v5974_v17 = vld [vmem:[#allocation128_spill] sm:$0xff] }
 0x7cf   :  { %v2444_v28 = vrot.slane %v2430_v11, %v3935_v12  ;;  %v5975_v11 = vld [vmem:[#allocation129_spill] sm:$0xff] }
 0x7d1   :  { %2479 = vmatprep.mubr.bf16.mxu0 %v2444_v28  ;;  %2520 = vmatprep.mubr.bf16.mxu1 %v2444_v28 }
 0x7d2   :  { %2480 = vmatmul.mubr.bf16.vlgmr.msra.gmra.mrb[44].mxu0 %v4823_v46  ;;  %2521 = vmatmul.mubr.bf16.vlgmr.msra.gmra.mrb[44].mxu1 %v4823_v46 }
 0x7d3   :  { %2530 = vmatpush1.bf16.msra.mxu0 %v5585_v8  ;;  %2571 = vmatpush1.bf16.msra.mxu1 %v5586_v13 }
 0x7d4   :  { %2561 = vmatprep.mubr.bf16.mxu0 %v2444_v28  ;;  %2602 = vmatprep.mubr.bf16.mxu1 %v2444_v28  ;;  %v5976_v28 = vld [vmem:[#allocation130_spill] sm:$0xff] }
 0x7d5   :  { %2531 = vmatprep.subr.bf16.mxu0 %v5587_v21  ;;  %2572 = vmatprep.subr.bf16.mxu1 %v5588_v31 }
 0x7d7   :  { %2532 = vmatpush1.bf16.msra.mxu0 %v5589_v29  ;;  %2573 = vmatpush1.bf16.msra.mxu1 %v5590_v35 }
 0x7d8   :  { %2533 = vmatprep.subr.bf16.mxu0 %v5591_v19  ;;  %2574 = vmatprep.subr.bf16.mxu1 %v5675_v44 }
 0x7db   :  { %2534 = vmatpush1.bf16.msra.mxu0 %v5676_v49  ;;  %2575 = vmatpush1.bf16.msra.mxu1 %v5677_v50 }
 0x7dc   :  { %2535 = vmatprep.subr.bf16.mxu0 %v5678_v38  ;;  %2576 = vmatprep.subr.bf16.mxu1 %v5679_v54 }
 0x7df   :  { %2536 = vmatpush1.bf16.msra.mxu0 %v5680_v30  ;;  %2577 = vmatpush1.bf16.msra.mxu1 %v5681_v33 }
 0x7e0   :  { %2537 = vmatprep.subr.bf16.mxu0 %v5682_v32  ;;  %2578 = vmatprep.subr.bf16.mxu1 %v5683_v34 }
 0x7e3   :  { %2538 = vmatpush1.bf16.msra.mxu0 %v5684_v57  ;;  %2579 = vmatpush1.bf16.msra.mxu1 %v5685_v58 }
 0x7e4   :  { %2539 = vmatprep.subr.bf16.mxu0 %v5769_v1  ;;  %2580 = vmatprep.subr.bf16.mxu1 %v5770_v20 }
 0x7e7   :  { %2540 = vmatpush1.bf16.msra.mxu0 %v5771_v24  ;;  %2581 = vmatpush1.bf16.msra.mxu1 %v5772_v61 }
 0x7e8   :  { %2541 = vmatprep.subr.bf16.mxu0 %v5773_v22  ;;  %2582 = vmatprep.subr.bf16.mxu1 %v5774_v6 }
 0x7eb   :  { %2542 = vmatpush1.bf16.msra.mxu0 %v5775_v14  ;;  %2583 = vmatpush1.bf16.msra.mxu1 %v5776_v43 }
 0x7ec   :  { %2543 = vmatprep.subr.bf16.mxu0 %v5694_v41  ;;  %2584 = vmatprep.subr.bf16.mxu1 %v5695_v42 }
 0x7ef   :  { %2544 = vmatpush1.bf16.msra.mxu0 %v5696_v48  ;;  %2585 = vmatpush1.bf16.msra.mxu1 %v5777_v27 }
 0x7f0   :  { %2545 = vmatprep.subr.bf16.mxu0 %v5778_v16  ;;  %2586 = vmatprep.subr.bf16.mxu1 %v5699_v9 }
 0x7f3   :  { %2546 = vmatpush1.bf16.msra.mxu0 %v5700_v51  ;;  %2587 = vmatpush1.bf16.msra.mxu1 %v5701_v2 }
 0x7f4   :  { %2547 = vmatprep.subr.bf16.mxu0 %v5955_v37  ;;  %2588 = vmatprep.subr.bf16.mxu1 %v5956_v5 }
 0x7f7   :  { %2548 = vmatpush1.bf16.msra.mxu0 %v5957_v56  ;;  %2589 = vmatpush1.bf16.msra.mxu1 %v5958_v26 }
 0x7f8   :  { %2549 = vmatprep.subr.bf16.mxu0 %v5959_v40  ;;  %2590 = vmatprep.subr.bf16.mxu1 %v5960_v55 }
 0x7fb   :  { %2550 = vmatpush1.bf16.msra.mxu0 %v5961_v7  ;;  %2591 = vmatpush1.bf16.msra.mxu1 %v5962_v25  ;;  %v2642_v25 = vld [vmem:[#allocation2 + $0x28] sm:$0x30] }
 0x7fc   :  { %2551 = vmatprep.subr.bf16.mxu0 %v5963_v39  ;;  %2592 = vmatprep.subr.bf16.mxu1 %v5964_v15 }
 0x7ff   :  { %2552 = vmatpush1.bf16.msra.mxu0 %v5965_v36  ;;  %2593 = vmatpush1.bf16.msra.mxu1 %v5966_v63  ;;  %v5977_v63 = vld [vmem:[#allocation131_spill] sm:$0xff] }
 0x800   :  { %2553 = vmatprep.subr.bf16.mxu0 %v5967_v23  ;;  %2594 = vmatprep.subr.bf16.mxu1 %v5968_v60  ;;  %v5978_v23 = vld [vmem:[#allocation132_spill] sm:$0xff]  ;;  %v5979_v60 = vld [vmem:[#allocation133_spill] sm:$0xff] }
 0x803   :  { %2554 = vmatpush1.bf16.msra.mxu0 %v5969_v18  ;;  %2595 = vmatpush1.bf16.msra.mxu1 %v5970_v45  ;;  %v5980_v18 = vld [vmem:[#allocation134_spill] sm:$0xff]  ;;  %v5981_v45 = vld [vmem:[#allocation135_spill] sm:$0xff] }
 0x804   :  { %2555 = vmatprep.subr.bf16.mxu0 %v5971_v47  ;;  %2596 = vmatprep.subr.bf16.mxu1 %v5972_v62  ;;  %v5982_v47 = vld [vmem:[#allocation136_spill] sm:$0xff] }
 0x805   :  { %v5983_v62 = vld [vmem:[#allocation8_spill] sm:$0xff] }
 0x807   :  { %2556 = vmatpush1.bf16.msra.mxu0 %v5973_v3  ;;  %2597 = vmatpush1.bf16.msra.mxu1 %v5974_v17  ;;  %v5984_v3 = vld [vmem:[#allocation9_spill] sm:$0xff] }
 0x808   :  { %2557 = vmatprep.subr.bf16.mxu0 %v5975_v11  ;;  %2598 = vmatprep.subr.bf16.mxu1 %v5976_v28  ;;  %v5985_v28 = vld [vmem:[#allocation10_spill] sm:$0xff]  ;;  %v5994_v11 = vld [vmem:[#allocation19_spill] sm:$0xff] }
 0x80b   :  { %2558 = vmatpush1.bf16.msra.mxu0 %v5977_v63  ;;  %2599 = vmatpush1.bf16.msra.mxu1 %v5978_v23  ;;  %v5986_v63 = vld [vmem:[#allocation11_spill] sm:$0xff]  ;;  %v5987_v23 = vld [vmem:[#allocation12_spill] sm:$0xff] }
 0x80c   :  { %2559 = vmatprep.subr.bf16.mxu0 %v5979_v60  ;;  %2600 = vmatprep.subr.bf16.mxu1 %v5980_v18  ;;  %v5988_v60 = vld [vmem:[#allocation13_spill] sm:$0xff]  ;;  %v5989_v18 = vld [vmem:[#allocation14_spill] sm:$0xff] }
 0x80f   :  { %2560 = vmatpush1.bf16.msra.mxu0 %v5981_v45  ;;  %2601 = vmatpush1.bf16.msra.mxu1 %v5982_v47  ;;  %v5990_v45 = vld [vmem:[#allocation15_spill] sm:$0xff]  ;;  %v5991_v47 = vld [vmem:[#allocation16_spill] sm:$0xff] }
 0x810   :  { %2733 = vmatprep.subr.bf16.mxu0 %v5983_v62  ;;  %2774 = vmatprep.subr.bf16.mxu1 %v5984_v3  ;;  %v5992_v62 = vld [vmem:[#allocation17_spill] sm:$0xff]  ;;  %v5993_v3 = vld [vmem:[#allocation18_spill] sm:$0xff] }
 0x812   :  { %2562 = vmatmul.mubr.bf16.vlgmr.msra.gmra.mrb[48].mxu0 %v4823_v46  ;;  %2603 = vmatmul.mubr.bf16.vlgmr.msra.gmra.mrb[48].mxu1 %v4823_v46  ;;  %v5995_v46 = vld [vmem:[#allocation20_spill] sm:$0xff] }
 0x813   :  { %2734 = vmatpush1.bf16.msra.mxu0 %v5985_v28  ;;  %2775 = vmatpush1.bf16.msra.mxu1 %v5986_v63  ;;  %v5996_v28 = vld [vmem:[#allocation21_spill] sm:$0xff]  ;;  %v5997_v63 = vld [vmem:[#allocation22_spill] sm:$0xff] }
 0x814   :  { %2735 = vmatprep.subr.bf16.mxu0 %v5987_v23  ;;  %2776 = vmatprep.subr.bf16.mxu1 %v5988_v60  ;;  %v5998_v23 = vld [vmem:[#allocation23_spill] sm:$0xff]  ;;  %v5999_v60 = vld [vmem:[#allocation24_spill] sm:$0xff] }
 0x817   :  { %2736 = vmatpush1.bf16.msra.mxu0 %v5989_v18  ;;  %2777 = vmatpush1.bf16.msra.mxu1 %v5990_v45  ;;  %v6000_v18 = vld [vmem:[#allocation25_spill] sm:$0xff]  ;;  %v6001_v45 = vld [vmem:[#allocation26_spill] sm:$0xff] }
 0x818   :  { %2737 = vmatprep.subr.bf16.mxu0 %v5991_v47  ;;  %2778 = vmatprep.subr.bf16.mxu1 %v5992_v62  ;;  %v6002_v47 = vld [vmem:[#allocation27_spill] sm:$0xff]  ;;  %v6003_v62 = vld [vmem:[#allocation28_spill] sm:$0xff] }
 0x81b   :  { %2738 = vmatpush1.bf16.msra.mxu0 %v5993_v3  ;;  %2779 = vmatpush1.bf16.msra.mxu1 %v5994_v11  ;;  %v6004_v3 = vld [vmem:[#allocation29_spill] sm:$0xff]  ;;  %v6005_v11 = vld [vmem:[#allocation30_spill] sm:$0xff] }
 0x81c   :  { %2739 = vmatprep.subr.bf16.mxu0 %v5995_v46  ;;  %2780 = vmatprep.subr.bf16.mxu1 %v5996_v28  ;;  %v6006_v46 = vld [vmem:[#allocation31_spill] sm:$0xff]  ;;  %v6007_v28 = vld [vmem:[#allocation32_spill] sm:$0xff] }
 0x81f   :  { %2740 = vmatpush1.bf16.msra.mxu0 %v5997_v63  ;;  %2781 = vmatpush1.bf16.msra.mxu1 %v5998_v23  ;;  %v6008_v63 = vld [vmem:[#allocation33_spill] sm:$0xff]  ;;  %v6009_v23 = vld [vmem:[#allocation34_spill] sm:$0xff] }
 0x820   :  { %2741 = vmatprep.subr.bf16.mxu0 %v5999_v60  ;;  %2782 = vmatprep.subr.bf16.mxu1 %v6000_v18  ;;  %v6010_v60 = vld [vmem:[#allocation35_spill] sm:$0xff]  ;;  %v6011_v18 = vld [vmem:[#allocation36_spill] sm:$0xff] }
 0x823   :  { %2742 = vmatpush1.bf16.msra.mxu0 %v6001_v45  ;;  %2783 = vmatpush1.bf16.msra.mxu1 %v6002_v47  ;;  %v6012_v45 = vld [vmem:[#allocation37_spill] sm:$0xff]  ;;  %v6013_v47 = vld [vmem:[#allocation38_spill] sm:$0xff] }
 0x824   :  { %2743 = vmatprep.subr.bf16.mxu0 %v6003_v62  ;;  %2784 = vmatprep.subr.bf16.mxu1 %v6004_v3  ;;  %v6014_v62 = vld [vmem:[#allocation39_spill] sm:$0xff]  ;;  %v6015_v3 = vld [vmem:[#allocation40_spill] sm:$0xff] }
 0x827   :  { %2744 = vmatpush1.bf16.msra.mxu0 %v6005_v11  ;;  %2785 = vmatpush1.bf16.msra.mxu1 %v6006_v46  ;;  %v6016_v11 = vld [vmem:[#allocation41_spill] sm:$0xff]  ;;  %v6017_v46 = vld [vmem:[#allocation42_spill] sm:$0xff] }
 0x828   :  { %2745 = vmatprep.subr.bf16.mxu0 %v6007_v28  ;;  %2786 = vmatprep.subr.bf16.mxu1 %v6008_v63  ;;  %v6018_v28 = vld [vmem:[#allocation43_spill] sm:$0xff]  ;;  %v6019_v63 = vld [vmem:[#allocation44_spill] sm:$0xff] }
 0x82b   :  { %2746 = vmatpush1.bf16.msra.mxu0 %v6009_v23  ;;  %2787 = vmatpush1.bf16.msra.mxu1 %v6010_v60  ;;  %v6020_v23 = vld [vmem:[#allocation45_spill] sm:$0xff]  ;;  %v6021_v60 = vld [vmem:[#allocation46_spill] sm:$0xff] }
 0x82c   :  { %2747 = vmatprep.subr.bf16.mxu0 %v6011_v18  ;;  %2788 = vmatprep.subr.bf16.mxu1 %v6012_v45  ;;  %v6022_v18 = vld [vmem:[#allocation47_spill] sm:$0xff]  ;;  %v6023_v45 = vld [vmem:[#allocation48_spill] sm:$0xff] }
 0x82f   :  { %2748 = vmatpush1.bf16.msra.mxu0 %v6013_v47  ;;  %2789 = vmatpush1.bf16.msra.mxu1 %v6014_v62  ;;  %v6024_v47 = vld [vmem:[#allocation49_spill] sm:$0xff]  ;;  %v6025_v62 = vld [vmem:[#allocation50_spill] sm:$0xff] }
 0x830   :  { %2749 = vmatprep.subr.bf16.mxu0 %v6015_v3  ;;  %2790 = vmatprep.subr.bf16.mxu1 %v6016_v11  ;;  %v6026_v3 = vld [vmem:[#allocation51_spill] sm:$0xff]  ;;  %v6027_v11 = vld [vmem:[#allocation52_spill] sm:$0xff] }
 0x833   :  { %2750 = vmatpush1.bf16.msra.mxu0 %v6017_v46  ;;  %2791 = vmatpush1.bf16.msra.mxu1 %v6018_v28  ;;  %v6028_v46 = vld [vmem:[#allocation53_spill] sm:$0xff]  ;;  %v6029_v28 = vld [vmem:[#allocation54_spill] sm:$0xff] }
 0x834   :  { %2751 = vmatprep.subr.bf16.mxu0 %v6019_v63  ;;  %2792 = vmatprep.subr.bf16.mxu1 %v6020_v23  ;;  %v6030_v63 = vld [vmem:[#allocation55_spill] sm:$0xff]  ;;  %v6031_v23 = vld [vmem:[#allocation56_spill] sm:$0xff] }
 0x837   :  { %2752 = vmatpush1.bf16.msra.mxu0 %v6021_v60  ;;  %2793 = vmatpush1.bf16.msra.mxu1 %v6022_v18  ;;  %v6032_v60 = vld [vmem:[#allocation57_spill] sm:$0xff]  ;;  %v6033_v18 = vld [vmem:[#allocation58_spill] sm:$0xff] }
 0x838   :  { %2753 = vmatprep.subr.bf16.mxu0 %v6023_v45  ;;  %2794 = vmatprep.subr.bf16.mxu1 %v6024_v47  ;;  %v6034_v45 = vld [vmem:[#allocation59_spill] sm:$0xff]  ;;  %v6035_v47 = vld [vmem:[#allocation60_spill] sm:$0xff] }
 0x83b   :  { %2754 = vmatpush1.bf16.msra.mxu0 %v6025_v62  ;;  %2795 = vmatpush1.bf16.msra.mxu1 %v6026_v3  ;;  %v6036_v62 = vld [vmem:[#allocation61_spill] sm:$0xff]  ;;  %v6037_v3 = vld [vmem:[#allocation62_spill] sm:$0xff] }
 0x83c   :  { %2755 = vmatprep.subr.bf16.mxu0 %v6027_v11  ;;  %2796 = vmatprep.subr.bf16.mxu1 %v6028_v46  ;;  %v6038_v11 = vld [vmem:[#allocation63_spill] sm:$0xff]  ;;  %v6039_v46 = vld [vmem:[#allocation64_spill] sm:$0xff] }
 0x83f   :  { %2756 = vmatpush1.bf16.msra.mxu0 %v6029_v28  ;;  %2797 = vmatpush1.bf16.msra.mxu1 %v6030_v63  ;;  %v6040_v28 = vld [vmem:[#allocation66_spill] sm:$0xff]  ;;  %v6041_v63 = vld [vmem:[#allocation65_spill] sm:$0xff] }
 0x840   :  { %2757 = vmatprep.subr.bf16.mxu0 %v6031_v23  ;;  %2798 = vmatprep.subr.bf16.mxu1 %v6032_v60  ;;  %v6042_v23 = vld [vmem:[#allocation67_spill] sm:$0xff]  ;;  %v6043_v60 = vld [vmem:[#allocation68_spill] sm:$0xff] }
 0x843   :  { %2758 = vmatpush1.bf16.msra.mxu0 %v6033_v18  ;;  %2799 = vmatpush1.bf16.msra.mxu1 %v6034_v45  ;;  %v6044_v18 = vld [vmem:[#allocation69_spill] sm:$0xff]  ;;  %v6045_v45 = vld [vmem:[#allocation70_spill] sm:$0xff] }
 0x844   :  { %2759 = vmatprep.subr.bf16.mxu0 %v6035_v47  ;;  %2800 = vmatprep.subr.bf16.mxu1 %v6036_v62  ;;  %v6046_v47 = vld [vmem:[#allocation71_spill] sm:$0xff]  ;;  %v6047_v62 = vld [vmem:[#allocation72_spill] sm:$0xff] }
 0x847   :  { %2760 = vmatpush1.bf16.msra.mxu0 %v6037_v3  ;;  %2801 = vmatpush1.bf16.msra.mxu1 %v6038_v11  ;;  %v6048_v3 = vld [vmem:[#allocation73_spill] sm:$0xff] }
 0x848   :  { %2761 = vmatprep.subr.bf16.mxu0 %v6039_v46  ;;  %2802 = vmatprep.subr.bf16.mxu1 %v6040_v28 }
 0x84b   :  { %2762 = vmatpush1.bf16.msra.mxu0 %v6041_v63  ;;  %2803 = vmatpush1.bf16.msra.mxu1 %v6042_v23  ;;  %v2641_v63 = vld [vmem:[#allocation2 + $0x20] sm:$0x30] }
 0x84c   :  { %2763 = vmatprep.subr.bf16.mxu0 %v6043_v60  ;;  %2804 = vmatprep.subr.bf16.mxu1 %v6044_v18 }
 0x84f   :  { %2764 = vmatpush1.bf16.msra.mxu0 %v6045_v45  ;;  %2805 = vmatpush1.bf16.msra.mxu1 %v6046_v47 }
 0x850   :  { %2815 = vmatprep.subr.bf16.mxu0 %v6047_v62  ;;  %2856 = vmatprep.subr.bf16.mxu1 %v6048_v3  ;;  %v2644_v3 = vld [vmem:[#allocation2 + $0x38] sm:$0x30] }
 0x8a5   :  { %v2481_v11 = vpop.f32.mrb[44].mxu0  ;;  %v2522_v46 = vpop.f32.mrb[44].mxu1 }
 0x8a6   :  { %v2649_v17 = vrot.slane %v2481_v11, 4  ;;  %v2483_v28 = vpop.f32.mrb[45].mxu0  ;;  %v2524_v36 = vpop.f32.mrb[45].mxu1  ;;  %v2651_v26 = vrot.slane %v2522_v46, 4  ;;  %v2643_v11 = vld [vmem:[#allocation2 + $0x30] sm:$0x30] }
 0x8a7   :  { %v2650_v15 = vrot.slane %v2483_v28, 4  ;;  %v2485_v23 = vpop.f32.mrb[46].mxu0  ;;  %v2526_v39 = vpop.f32.mrb[46].mxu1  ;;  %v2652_v40 = vrot.slane %v2524_v36, 4 }
 0x8a8   :  { %v2657_v60 = vadd.f32 %v2649_v17, %v2641_v63  ;;  %v2486_v18 = vpop.f32.mrb[47].mxu0  ;;  %v2527_v7 = vpop.f32.mrb[47].mxu1  ;;  %v2659_v5 = vadd.f32 %v2651_v26, %v2643_v11 }
 0x8a9   :  { %v2658_v45 = vadd.f32 %v2650_v15, %v2642_v25  ;;  %v2660_v62 = vadd.f32 %v2652_v40, %v2644_v3 }
 0x8aa   :  { %v3334_v55 = vmul.f32 -1.442695, %v2657_v60 }
 0x8ab   :  { %v3335_v47 = vmul.f32 -1.442695, %v2658_v45  ;;  %v3336_v56 = vmul.f32 -1.442695, %v2660_v62 }
 0x8ac   :  { %3533 = vpow2.f32 %v3334_v55  ;;  %v2681_v55 = vrot.slane %v4809_v59, 6 }
 0x8ad   :  { %3535 = vpow2.f32 %v3335_v47 }
 0x8ae   :  { %3537 = vpow2.f32 %v3336_v56 }
 0x8af   :  { %3539 = vtanh.f32 %v2659_v5 }
 0x8b6   :  { %v3534_v37 = vpop.eup %3533 }
 0x8b7   :  { %v3536_v28 = vpop.eup %3535  ;;  %v2664_v23 = vadd.f32 1.0, %v3534_v37 }
 0x8b8   :  { %v2670_v39 = vadd.f32 1.0, %v3536_v28  ;;  %v3538_v7 = vpop.eup %3537 }
 0x8b9   :  { %3541 = vrcp.f32 %v2664_v23  ;;  %v3540_v25 = vpop.eup %3539  ;;  %v2677_v40 = vadd.f32 1.0, %v3538_v7 }
 0x8ba   :  { %3543 = vrcp.f32 %v2670_v39 }
 0x8bb   :  { %3545 = vrcp.f32 %v2677_v40 }
 0x8c3   :  { %v3542_v15 = vpop.eup %3541 }
 0x8c4   :  { %v3544_v36 = vpop.eup %3543  ;;  %v2684_v17 = vmul.f32 %v3542_v15, %v3540_v25 }
 0x8c5   :  { %v2683_v3 = vmul.f32 %v3544_v36, %v2681_v55  ;;  %v3546_v37 = vpop.eup %3545 }
 0x8c7   :  { %v4958_v46 = vadd.f32 %v2684_v17, %v2683_v3 }
 0x8c9   :  { %6049 = vst [vmem:[#allocation74_spill] sm:$0xff] %v4958_v46  ;;  %3547 = vtanh.f32 %v4958_v46  ;;  %v6079_v46 = vld [vmem:[#allocation72_spill] sm:$0xff] }
 0x8d3   :  { %v3548_v56 = vpop.eup %3547 }
 0x8d4   :  { %v2687_v5 = vmul.f32 %v3548_v56, %v3546_v37 }
 0x8d6   :  { %v2688_v26 = vpack.c.bf16 %v2687_v5, %v2687_v5 }
 0x8d8   :  { %v2696_v62 = vrot.slane %v2688_v26, %v3935_v12 }
 0x8da   :  { %v2703_v63 = vrot.slane %v2696_v62, %v3935_v12 }
 0x8dc   :  { %v2704_v60 = vcombine.high %v2703_v63, %v2703_v63 }
 0x8de   :  { %2706 = vst [vmem:[#allocation3] sm:$0x1] %v2704_v60 }
 0x8e5   :  { %v2563_v59 = vpop.f32.mrb[48].mxu0  ;;  %v2604_v18 = vpop.f32.mrb[48].mxu1 }
 0x8e6   :  { %v2611_v45 = vadd.f32 %v2563_v59, %v4203_v4  ;;  %v2565_v47 = vpop.f32.mrb[49].mxu0  ;;  %v2606_v11 = vpop.f32.mrb[49].mxu1  ;;  %v2613_v40 = vadd.f32 %v2604_v18, %v4218_v52  ;;  %v6074_v52 = vld [vmem:[#allocation132_spill] sm:$0xff]  ;;  %v6077_v4 = vld [vmem:[#allocation135_spill] sm:$0xff] }
 0x8e7   :  { %v2612_v28 = vadd.f32 %v2565_v47, %v4207_v53  ;;  %v2567_v23 = vpop.f32.mrb[50].mxu0  ;;  %v2608_v39 = vpop.f32.mrb[50].mxu1  ;;  %v2614_v36 = vadd.f32 %v2606_v11, %v4213_v10  ;;  %v6075_v10 = vld [vmem:[#allocation133_spill] sm:$0xff]  ;;  %v6076_v53 = vld [vmem:[#allocation134_spill] sm:$0xff] }
 0x8e8   :  { %v3331_v7 = vmul.f32 -1.442695, %v2611_v45  ;;  %v2568_v25 = vpop.f32.mrb[51].mxu0  ;;  %v2609_v15 = vpop.f32.mrb[51].mxu1 }
 0x8e9   :  { %v3332_v55 = vmul.f32 -1.442695, %v2612_v28  ;;  %v3333_v17 = vmul.f32 -1.442695, %v2614_v36  ;;  %v6052_v36 = vld [vmem:[#allocation110_spill] sm:$0xff] }
 0x8ea   :  { %3549 = vpow2.f32 %v3331_v7 }
 0x8eb   :  { %3551 = vpow2.f32 %v3332_v55 }
 0x8ec   :  { %3553 = vpow2.f32 %v3333_v17  ;;  %v6053_v17 = vld [vmem:[#allocation111_spill] sm:$0xff] }
 0x8ed   :  { %3555 = vtanh.f32 %v2613_v40  ;;  %v6054_v40 = vld [vmem:[#allocation112_spill] sm:$0xff] }
 0x8f4   :  { %v3550_v3 = vpop.eup %3549 }
 0x8f5   :  { %v3552_v37 = vpop.eup %3551  ;;  %v2618_v56 = vadd.f32 1.0, %v3550_v3  ;;  %v6055_v3 = vld [vmem:[#allocation113_spill] sm:$0xff] }
 0x8f6   :  { %v2624_v5 = vadd.f32 1.0, %v3552_v37  ;;  %v3554_v26 = vpop.eup %3553  ;;  %v6056_v37 = vld [vmem:[#allocation114_spill] sm:$0xff] }
 0x8f7   :  { %3557 = vrcp.f32 %v2618_v56  ;;  %v3556_v62 = vpop.eup %3555  ;;  %v2631_v45 = vadd.f32 1.0, %v3554_v26  ;;  %v6057_v56 = vld [vmem:[#allocation115_spill] sm:$0xff]  ;;  %v6059_v26 = vld [vmem:[#allocation117_spill] sm:$0xff] }
 0x8f8   :  { %3559 = vrcp.f32 %v2624_v5  ;;  %v6058_v5 = vld [vmem:[#allocation116_spill] sm:$0xff] }
 0x8f9   :  { %3561 = vrcp.f32 %v2631_v45  ;;  %v6064_v45 = vld [vmem:[#allocation122_spill] sm:$0xff] }
 0x901   :  { %v3558_v63 = vpop.eup %3557 }
 0x902   :  { %v3560_v60 = vpop.eup %3559  ;;  %v2635_v59 = vmul.f32 %v3558_v63, %v3556_v62  ;;  %v6060_v62 = vld [vmem:[#allocation118_spill] sm:$0xff]  ;;  %v6061_v63 = vld [vmem:[#allocation119_spill] sm:$0xff] }
 0x903   :  { %v2634_v47 = vmul.f32 %v3560_v60, %v4818_v0  ;;  %v3562_v18 = vpop.eup %3561  ;;  %v6051_v0 = vld [vmem:[#allocation109_spill] sm:$0xff]  ;;  %v6062_v60 = vld [vmem:[#allocation120_spill] sm:$0xff] }
 0x905   :  { %v4968_v11 = vadd.f32 %v2635_v59, %v2634_v47  ;;  %v6063_v59 = vld [vmem:[#allocation121_spill] sm:$0xff]  ;;  %v6065_v47 = vld [vmem:[#allocation123_spill] sm:$0xff] }
 0x907   :  { %6050 = vst [vmem:[#allocation75_spill] sm:$0xff] %v4968_v11  ;;  %3563 = vtanh.f32 %v4968_v11  ;;  %v6073_v11 = vld [vmem:[#allocation131_spill] sm:$0xff] }
 0x911   :  { %v3564_v28 = vpop.eup %3563 }
 0x912   :  { %v2638_v23 = vmul.f32 %v3564_v28, %v3562_v18  ;;  %v6066_v18 = vld [vmem:[#allocation124_spill] sm:$0xff]  ;;  %v6067_v28 = vld [vmem:[#allocation125_spill] sm:$0xff] }
 0x914   :  { %v2639_v39 = vpack.c.bf16 %v2638_v23, %v2638_v23  ;;  %v6068_v23 = vld [vmem:[#allocation126_spill] sm:$0xff] }
 0x916   :  { %2640 = vst [vmem:[#allocation3 + $0x1] sm:$0x1] %v2639_v39  ;;  %v6069_v39 = vld [vmem:[#allocation127_spill] sm:$0xff] }
 0x91d   :  { %v3337_v7 = vld.sshfl [vmem:[#allocation3] sm:$0x11 pattern:$0x75316420] }
 0x91e   :  { %v2716_v25 = vcombine.high %v3337_v7, %v3337_v7  ;;  %v4973_v55 = vrot.slane %v3337_v7, %v3935_v12  ;;  %v6070_v7 = vld [vmem:[#allocation128_spill] sm:$0xff] }
 0x920   :  { %v2730_v15 = vrot.slane %v2716_v25, %v3935_v12  ;;  %v6071_v25 = vld [vmem:[#allocation129_spill] sm:$0xff]  ;;  %v6078_v12 = vld [vmem:[#allocation136_spill] sm:$0xff] }
 0x922   :  { %2765 = vmatprep.mubr.bf16.mxu0 %v2730_v15  ;;  %2806 = vmatprep.mubr.bf16.mxu1 %v2730_v15 }
 0x923   :  { %2766 = vmatmul.mubr.bf16.vlgmr.msra.gmra.mrb[52].mxu0 %v4973_v55  ;;  %2807 = vmatmul.mubr.bf16.vlgmr.msra.gmra.mrb[52].mxu1 %v4973_v55 }
 0x924   :  { %2816 = vmatpush1.bf16.msra.mxu0 %v5585_v8  ;;  %2857 = vmatpush1.bf16.msra.mxu1 %v5586_v13 }
 0x925   :  { %2847 = vmatprep.mubr.bf16.mxu0 %v2730_v15  ;;  %2888 = vmatprep.mubr.bf16.mxu1 %v2730_v15  ;;  %v6072_v15 = vld [vmem:[#allocation130_spill] sm:$0xff] }
 0x926   :  { %2817 = vmatprep.subr.bf16.mxu0 %v5587_v21  ;;  %2858 = vmatprep.subr.bf16.mxu1 %v5588_v31 }
 0x928   :  { %2818 = vmatpush1.bf16.msra.mxu0 %v5589_v29  ;;  %2859 = vmatpush1.bf16.msra.mxu1 %v5590_v35 }
 0x929   :  { %2819 = vmatprep.subr.bf16.mxu0 %v5591_v19  ;;  %2860 = vmatprep.subr.bf16.mxu1 %v5675_v44 }
 0x92c   :  { %2820 = vmatpush1.bf16.msra.mxu0 %v5676_v49  ;;  %2861 = vmatpush1.bf16.msra.mxu1 %v5677_v50 }
 0x92d   :  { %2821 = vmatprep.subr.bf16.mxu0 %v5678_v38  ;;  %2862 = vmatprep.subr.bf16.mxu1 %v5679_v54 }
 0x930   :  { %2822 = vmatpush1.bf16.msra.mxu0 %v5680_v30  ;;  %2863 = vmatpush1.bf16.msra.mxu1 %v5681_v33 }
 0x931   :  { %2823 = vmatprep.subr.bf16.mxu0 %v5682_v32  ;;  %2864 = vmatprep.subr.bf16.mxu1 %v5683_v34 }
 0x934   :  { %2824 = vmatpush1.bf16.msra.mxu0 %v5684_v57  ;;  %2865 = vmatpush1.bf16.msra.mxu1 %v5685_v58 }
 0x935   :  { %2825 = vmatprep.subr.bf16.mxu0 %v5769_v1  ;;  %2866 = vmatprep.subr.bf16.mxu1 %v5770_v20 }
 0x938   :  { %2826 = vmatpush1.bf16.msra.mxu0 %v5771_v24  ;;  %2867 = vmatpush1.bf16.msra.mxu1 %v5772_v61 }
 0x939   :  { %2827 = vmatprep.subr.bf16.mxu0 %v5773_v22  ;;  %2868 = vmatprep.subr.bf16.mxu1 %v5774_v6 }
 0x93c   :  { %2828 = vmatpush1.bf16.msra.mxu0 %v5775_v14  ;;  %2869 = vmatpush1.bf16.msra.mxu1 %v5776_v43 }
 0x93d   :  { %2829 = vmatprep.subr.bf16.mxu0 %v5694_v41  ;;  %2870 = vmatprep.subr.bf16.mxu1 %v5695_v42 }
 0x940   :  { %2830 = vmatpush1.bf16.msra.mxu0 %v5696_v48  ;;  %2871 = vmatpush1.bf16.msra.mxu1 %v5777_v27 }
 0x941   :  { %2831 = vmatprep.subr.bf16.mxu0 %v5778_v16  ;;  %2872 = vmatprep.subr.bf16.mxu1 %v5699_v9 }
 0x944   :  { %2832 = vmatpush1.bf16.msra.mxu0 %v5700_v51  ;;  %2873 = vmatpush1.bf16.msra.mxu1 %v5701_v2 }
 0x945   :  { %2833 = vmatprep.subr.bf16.mxu0 %v6051_v0  ;;  %2874 = vmatprep.subr.bf16.mxu1 %v6052_v36 }
 0x948   :  { %2834 = vmatpush1.bf16.msra.mxu0 %v6053_v17  ;;  %2875 = vmatpush1.bf16.msra.mxu1 %v6054_v40 }
 0x949   :  { %2835 = vmatprep.subr.bf16.mxu0 %v6055_v3  ;;  %2876 = vmatprep.subr.bf16.mxu1 %v6056_v37 }
 0x94c   :  { %2836 = vmatpush1.bf16.msra.mxu0 %v6057_v56  ;;  %2877 = vmatpush1.bf16.msra.mxu1 %v6058_v5 }
 0x94d   :  { %2837 = vmatprep.subr.bf16.mxu0 %v6059_v26  ;;  %2878 = vmatprep.subr.bf16.mxu1 %v6060_v62 }
 0x950   :  { %2838 = vmatpush1.bf16.msra.mxu0 %v6061_v63  ;;  %2879 = vmatpush1.bf16.msra.mxu1 %v6062_v60 }
 0x951   :  { %2839 = vmatprep.subr.bf16.mxu0 %v6063_v59  ;;  %2880 = vmatprep.subr.bf16.mxu1 %v6064_v45 }
 0x954   :  { %2840 = vmatpush1.bf16.msra.mxu0 %v6065_v47  ;;  %2881 = vmatpush1.bf16.msra.mxu1 %v6066_v18 }
 0x955   :  { %2841 = vmatprep.subr.bf16.mxu0 %v6067_v28  ;;  %2882 = vmatprep.subr.bf16.mxu1 %v6068_v23 }
 0x958   :  { %2842 = vmatpush1.bf16.msra.mxu0 %v6069_v39  ;;  %2883 = vmatpush1.bf16.msra.mxu1 %v6070_v7  ;;  %v6080_v39 = vld [vmem:[#allocation73_spill] sm:$0xff] }
 0x959   :  { %2843 = vmatprep.subr.bf16.mxu0 %v6071_v25  ;;  %2884 = vmatprep.subr.bf16.mxu1 %v6072_v15 }
 0x95c   :  { %2844 = vmatpush1.bf16.msra.mxu0 %v6073_v11  ;;  %2885 = vmatpush1.bf16.msra.mxu1 %v6074_v52 }
 0x95d   :  { %2845 = vmatprep.subr.bf16.mxu0 %v6075_v10  ;;  %2886 = vmatprep.subr.bf16.mxu1 %v6076_v53 }
 0x960   :  { %2846 = vmatpush1.bf16.msra.mxu0 %v6077_v4  ;;  %2887 = vmatpush1.bf16.msra.mxu1 %v6078_v12 }
 0x961   :  { %3020 = vmatprep.subr.bf16.mxu0 %v6079_v46  ;;  %3061 = vmatprep.subr.bf16.mxu1 %v6080_v39 }
 0x963   :  { %2848 = vmatmul.mubr.bf16.vlgmr.msra.gmra.mrb[56].mxu0 %v4973_v55  ;;  %2889 = vmatmul.mubr.bf16.vlgmr.msra.gmra.mrb[56].mxu1 %v4973_v55 }
 0x964   :  { %3021 = vmatpush1.bf16.msra.mxu0 %v5585_v8  ;;  %3062 = vmatpush1.bf16.msra.mxu1 %v5586_v13  ;;  %v6081_v8 = vld [vmem:[#allocation127_spill] sm:$0xff] }
 0x965   :  { %3022 = vmatprep.subr.bf16.mxu0 %v5587_v21  ;;  %3063 = vmatprep.subr.bf16.mxu1 %v5588_v31 }
 0x968   :  { %3023 = vmatpush1.bf16.msra.mxu0 %v5589_v29  ;;  %3064 = vmatpush1.bf16.msra.mxu1 %v5590_v35 }
 0x969   :  { %3024 = vmatprep.subr.bf16.mxu0 %v5591_v19  ;;  %3065 = vmatprep.subr.bf16.mxu1 %v5675_v44  ;;  %v2927_v19 = vld [vmem:[#allocation2 + $0x20] sm:$0xc0] }
 0x96c   :  { %3025 = vmatpush1.bf16.msra.mxu0 %v5676_v49  ;;  %3066 = vmatpush1.bf16.msra.mxu1 %v5677_v50 }
 0x96d   :  { %3026 = vmatprep.subr.bf16.mxu0 %v5678_v38  ;;  %3067 = vmatprep.subr.bf16.mxu1 %v5679_v54  ;;  %v2928_v54 = vld [vmem:[#allocation2 + $0x28] sm:$0xc0] }
 0x970   :  { %3027 = vmatpush1.bf16.msra.mxu0 %v5680_v30  ;;  %3068 = vmatpush1.bf16.msra.mxu1 %v5681_v33 }
 0x971   :  { %3028 = vmatprep.subr.bf16.mxu0 %v5682_v32  ;;  %3069 = vmatprep.subr.bf16.mxu1 %v5683_v34 }
 0x974   :  { %3029 = vmatpush1.bf16.msra.mxu0 %v5684_v57  ;;  %3070 = vmatpush1.bf16.msra.mxu1 %v5685_v58  ;;  %v2929_v57 = vld [vmem:[#allocation2 + $0x30] sm:$0xc0] }
 0x975   :  { %3030 = vmatprep.subr.bf16.mxu0 %v5769_v1  ;;  %3071 = vmatprep.subr.bf16.mxu1 %v5770_v20 }
 0x978   :  { %3031 = vmatpush1.bf16.msra.mxu0 %v5771_v24  ;;  %3072 = vmatpush1.bf16.msra.mxu1 %v5772_v61  ;;  %v6082_v24 = vld [vmem:[#allocation74_spill] sm:$0xff] }
 0x979   :  { %3032 = vmatprep.subr.bf16.mxu0 %v5773_v22  ;;  %3073 = vmatprep.subr.bf16.mxu1 %v5774_v6  ;;  %v2967_v61 = vrot.slane %v6082_v24, 6 }
 0x97c   :  { %3033 = vmatpush1.bf16.msra.mxu0 %v5775_v14  ;;  %3074 = vmatpush1.bf16.msra.mxu1 %v5776_v43 }
 0x97d   :  { %3034 = vmatprep.subr.bf16.mxu0 %v5694_v41  ;;  %3075 = vmatprep.subr.bf16.mxu1 %v5695_v42 }
 0x980   :  { %3035 = vmatpush1.bf16.msra.mxu0 %v5696_v48  ;;  %3076 = vmatpush1.bf16.msra.mxu1 %v5777_v27 }
 0x981   :  { %3036 = vmatprep.subr.bf16.mxu0 %v5778_v16  ;;  %3077 = vmatprep.subr.bf16.mxu1 %v5699_v9 }
 0x984   :  { %3037 = vmatpush1.bf16.msra.mxu0 %v5700_v51  ;;  %3078 = vmatpush1.bf16.msra.mxu1 %v5701_v2 }
 0x985   :  { %3038 = vmatprep.subr.bf16.mxu0 %v6051_v0  ;;  %3079 = vmatprep.subr.bf16.mxu1 %v6052_v36  ;;  %v6083_v0 = vld [vmem:[#allocation76_spill] sm:$0xff] }
 0x988   :  { %3039 = vmatpush1.bf16.msra.mxu0 %v6053_v17  ;;  %3080 = vmatpush1.bf16.msra.mxu1 %v6054_v40 }
 0x989   :  { %3040 = vmatprep.subr.bf16.mxu0 %v6055_v3  ;;  %3081 = vmatprep.subr.bf16.mxu1 %v6056_v37 }
 0x98c   :  { %3041 = vmatpush1.bf16.msra.mxu0 %v6057_v56  ;;  %3082 = vmatpush1.bf16.msra.mxu1 %v6058_v5  ;;  %v6084_v5 = vld [vmem:[#allocation137_spill] sm:$0xff] }
 0x98d   :  { %3042 = vmatprep.subr.bf16.mxu0 %v6059_v26  ;;  %3083 = vmatprep.subr.bf16.mxu1 %v6060_v62 }
 0x990   :  { %3043 = vmatpush1.bf16.msra.mxu0 %v6061_v63  ;;  %3084 = vmatpush1.bf16.msra.mxu1 %v6062_v60  ;;  %v6085_v60 = vld [vmem:[#allocation138_spill] sm:$0xff] }
 0x991   :  { %3044 = vmatprep.subr.bf16.mxu0 %v6063_v59  ;;  %3085 = vmatprep.subr.bf16.mxu1 %v6064_v45 }
 0x994   :  { %3045 = vmatpush1.bf16.msra.mxu0 %v6065_v47  ;;  %3086 = vmatpush1.bf16.msra.mxu1 %v6066_v18 }
 0x995   :  { %3046 = vmatprep.subr.bf16.mxu0 %v6067_v28  ;;  %3087 = vmatprep.subr.bf16.mxu1 %v6068_v23 }
 0x998   :  { %3047 = vmatpush1.bf16.msra.mxu0 %v6081_v8  ;;  %3088 = vmatpush1.bf16.msra.mxu1 %v6070_v7  ;;  %v6086_v7 = vld [vmem:[#allocation139_spill] sm:$0xff]  ;;  %v6087_v8 = vld [vmem:[#allocation140_spill] sm:$0xff] }
 0x999   :  { %3048 = vmatprep.subr.bf16.mxu0 %v6071_v25  ;;  %3089 = vmatprep.subr.bf16.mxu1 %v6072_v15 }
 0x99c   :  { %3049 = vmatpush1.bf16.msra.mxu0 %v6073_v11  ;;  %3090 = vmatpush1.bf16.msra.mxu1 %v6074_v52 }
 0x99d   :  { %3050 = vmatprep.subr.bf16.mxu0 %v6075_v10  ;;  %3091 = vmatprep.subr.bf16.mxu1 %v6076_v53 }
 0x9a0   :  { %3051 = vmatpush1.bf16.msra.mxu0 %v6077_v4  ;;  %3092 = vmatpush1.bf16.msra.mxu1 %v6078_v12  ;;  %v2930_v12 = vld [vmem:[#allocation2 + $0x38] sm:$0xc0] }
 0x9f6   :  { %v2767_v13 = vpop.f32.mrb[52].mxu0  ;;  %v2808_v21 = vpop.f32.mrb[52].mxu1 }
 0x9f7   :  { %v2935_v31 = vrot.slane %v2767_v13, 2  ;;  %v2769_v29 = vpop.f32.mrb[53].mxu0  ;;  %v2810_v35 = vpop.f32.mrb[53].mxu1  ;;  %v2937_v34 = vrot.slane %v2808_v21, 2 }
 0x9f8   :  { %v2936_v44 = vrot.slane %v2769_v29, 2  ;;  %v2771_v49 = vpop.f32.mrb[54].mxu0  ;;  %v2812_v50 = vpop.f32.mrb[54].mxu1  ;;  %v2938_v32 = vrot.slane %v2810_v35, 2 }
 0x9f9   :  { %v2943_v38 = vadd.f32 %v2935_v31, %v2927_v19  ;;  %v2772_v52 = vpop.f32.mrb[55].mxu0  ;;  %v2813_v30 = vpop.f32.mrb[55].mxu1  ;;  %v2945_v9 = vadd.f32 %v2937_v34, %v2929_v57 }
 0x9fa   :  { %v2944_v10 = vadd.f32 %v2936_v44, %v2928_v54  ;;  %v2946_v4 = vadd.f32 %v2938_v32, %v2930_v12  ;;  %v6088_v52 = vld [vmem:[#allocation75_spill] sm:$0xff] }
 0x9fb   :  { %v3341_v33 = vmul.f32 -1.442695, %v2943_v38 }
 0x9fc   :  { %v3342_v53 = vmul.f32 -1.442695, %v2944_v10  ;;  %v3343_v58 = vmul.f32 -1.442695, %v2946_v4 }
 0x9fd   :  { %3565 = vpow2.f32 %v3341_v33 }
 0x9fe   :  { %3567 = vpow2.f32 %v3342_v53 }
 0x9ff   :  { %3569 = vpow2.f32 %v3343_v58 }
 0xa00   :  { %3571 = vtanh.f32 %v2945_v9 }
 0xa07   :  { %v3566_v51 = vpop.eup %3565 }
 0xa08   :  { %v3568_v2 = vpop.eup %3567  ;;  %v2950_v41 = vadd.f32 1.0, %v3566_v51 }
 0xa09   :  { %v2956_v42 = vadd.f32 1.0, %v3568_v2  ;;  %v3570_v48 = vpop.eup %3569 }
 0xa0a   :  { %3573 = vrcp.f32 %v2950_v41  ;;  %v3572_v1 = vpop.eup %3571  ;;  %v2963_v14 = vadd.f32 1.0, %v3570_v48 }
 0xa0b   :  { %3575 = vrcp.f32 %v2956_v42 }
 0xa0c   :  { %3577 = vrcp.f32 %v2963_v14 }
 0xa14   :  { %v3574_v20 = vpop.eup %3573 }
 0xa15   :  { %v3576_v22 = vpop.eup %3575  ;;  %v2970_v6 = vmul.f32 %v3574_v20, %v3572_v1 }
 0xa16   :  { %v2969_v43 = vmul.f32 %v3576_v22, %v2967_v61  ;;  %v3578_v16 = vpop.eup %3577 }
 0xa18   :  { %v2971_v27 = vadd.f32 %v2970_v6, %v2969_v43 }
 0xa1a   :  { %3579 = vtanh.f32 %v2971_v27 }
 0xa24   :  { %v3580_v46 = vpop.eup %3579 }
 0xa25   :  { %v2973_v11 = vmul.f32 %v3580_v46, %v3578_v16 }
 0xa27   :  { %v2974_v55 = vpack.c.bf16 %v2973_v11, %v2973_v11 }
 0xa29   :  { %v2982_v36 = vrot.slane %v2974_v55, %v6083_v0 }
 0xa2b   :  { %v2983_v17 = vcombine.high %v2982_v36, %v2982_v36 }
 0xa2d   :  { %v2990_v40 = vrot.slane %v2983_v17, %v6083_v0 }
 0xa2f   :  { %v2991_v3 = vcombine.high %v2990_v40, %v2990_v40 }
 0xa31   :  { %2993 = vst [vmem:[#allocation3] sm:$0x1] %v2991_v3 }
 0xa36   :  { %v2849_v37 = vpop.f32.mrb[56].mxu0  ;;  %v2890_v56 = vpop.f32.mrb[56].mxu1 }
 0xa37   :  { %v2897_v26 = vadd.f32 %v2849_v37, %v6084_v5  ;;  %v2851_v62 = vpop.f32.mrb[57].mxu0  ;;  %v2892_v63 = vpop.f32.mrb[57].mxu1  ;;  %v2899_v13 = vadd.f32 %v2890_v56, %v6087_v8 }
 0xa38   :  { %v2898_v59 = vadd.f32 %v2851_v62, %v6085_v60  ;;  %v2853_v45 = vpop.f32.mrb[58].mxu0  ;;  %v2894_v47 = vpop.f32.mrb[58].mxu1  ;;  %v2900_v25 = vadd.f32 %v2892_v63, %v6086_v7  ;;  %v3348_v63 = vld [vmem:[%s5131_s5] ss:$0 sm:$0xff] }
 0xa39   :  { %v3338_v18 = vmul.f32 -1.442695, %v2897_v26  ;;  %v2854_v28 = vpop.f32.mrb[59].mxu0  ;;  %v2895_v23 = vpop.f32.mrb[59].mxu1 }
 0xa3a   :  { %v3339_v39 = vmul.f32 -1.442695, %v2898_v59  ;;  %v3340_v15 = vmul.f32 -1.442695, %v2900_v25 }
 0xa3b   :  { %3581 = vpow2.f32 %v3338_v18  ;;  %v3349_v18 = vld [vmem:[#allocation4] ss:$0 sm:$0xff] }
 0xa3c   :  { %3583 = vpow2.f32 %v3339_v39 }
 0xa3d   :  { %3585 = vpow2.f32 %v3340_v15 }
 0xa3e   :  { %3587 = vtanh.f32 %v2899_v13 }
 0xa45   :  { %v3582_v21 = vpop.eup %3581 }
 0xa46   :  { %v3584_v31 = vpop.eup %3583  ;;  %v2904_v29 = vadd.f32 1.0, %v3582_v21 }
 0xa47   :  { %v2910_v35 = vadd.f32 1.0, %v3584_v31  ;;  %v3586_v19 = vpop.eup %3585 }
 0xa48   :  { %3589 = vrcp.f32 %v2904_v29  ;;  %v3588_v44 = vpop.eup %3587  ;;  %v2917_v54 = vadd.f32 1.0, %v3586_v19 }
 0xa49   :  { %3591 = vrcp.f32 %v2910_v35 }
 0xa4a   :  { %3593 = vrcp.f32 %v2917_v54 }
 0xa52   :  { %v3590_v49 = vpop.eup %3589 }
 0xa53   :  { %v3592_v50 = vpop.eup %3591  ;;  %v2921_v38 = vmul.f32 %v3590_v49, %v3588_v44 }
 0xa54   :  { %v2920_v30 = vmul.f32 %v3592_v50, %v6088_v52  ;;  %v3594_v33 = vpop.eup %3593 }
 0xa56   :  { %v2922_v10 = vadd.f32 %v2921_v38, %v2920_v30 }
 0xa58   :  { %3595 = vtanh.f32 %v2922_v10 }
 0xa62   :  { %v3596_v53 = vpop.eup %3595 }
 0xa63   :  { %v2924_v32 = vmul.f32 %v3596_v53, %v3594_v33 }
 0xa65   :  { %v2925_v12 = vpack.c.bf16 %v2924_v32, %v2924_v32 }
 0xa67   :  { %2926 = vst [vmem:[#allocation3 + $0x1] sm:$0x1] %v2925_v12 }
 0xa6e   :  { %v3344_v4 = vld.sshfl [vmem:[#allocation3] sm:$0x11 pattern:$0x75316420] }
 0xa6f   :  { %v3003_v34 = vcombine.high %v3344_v4, %v3344_v4  ;;  %v3010_v58 = vrot.slane %v3344_v4, %v6083_v0 }
 0xa71   :  { %v3017_v57 = vrot.slane %v3003_v34, %v6083_v0 }
 0xa73   :  { %3052 = vmatprep.mubr.bf16.mxu0 %v3017_v57  ;;  %3093 = vmatprep.mubr.bf16.mxu1 %v3017_v57 }
 0xa74   :  { %3053 = vmatmul.mubr.bf16.vlgmr.msra.gmra.mrb[60].mxu0 %v3010_v58  ;;  %3094 = vmatmul.mubr.bf16.vlgmr.msra.gmra.mrb[60].mxu1 %v3010_v58 }
 0xb47   :  { %v3054_v9 = vpop.f32.mrb[60].mxu0  ;;  %v3095_v51 = vpop.f32.mrb[60].mxu1 }
 0xb48   :  { %v3102_v2 = vadd.f32 %v3054_v9, %v6084_v5  ;;  %v3056_v41 = vpop.f32.mrb[61].mxu0  ;;  %v3097_v42 = vpop.f32.mrb[61].mxu1  ;;  %v3104_v27 = vadd.f32 %v3095_v51, %v6087_v8 }
 0xb49   :  { %v3103_v48 = vadd.f32 %v3056_v41, %v6085_v60  ;;  %v3058_v1 = vpop.f32.mrb[62].mxu0  ;;  %v3099_v20 = vpop.f32.mrb[62].mxu1  ;;  %v3105_v14 = vadd.f32 %v3097_v42, %v6086_v7 }
 0xb4a   :  { %v3345_v24 = vmul.f32 -1.442695, %v3102_v2  ;;  %v3059_v61 = vpop.f32.mrb[63].mxu0  ;;  %v3100_v22 = vpop.f32.mrb[63].mxu1 }
 0xb4b   :  { %v3346_v6 = vmul.f32 -1.442695, %v3103_v48  ;;  %v3347_v43 = vmul.f32 -1.442695, %v3105_v14 }
 0xb4c   :  { %3597 = vpow2.f32 %v3345_v24 }
 0xb4d   :  { %3599 = vpow2.f32 %v3346_v6 }
 0xb4e   :  { %3601 = vpow2.f32 %v3347_v43 }
 0xb4f   :  { %3603 = vtanh.f32 %v3104_v27 }
 0xb56   :  { %v3598_v16 = vpop.eup %3597 }
 0xb57   :  { %v3600_v46 = vpop.eup %3599  ;;  %v3109_v11 = vadd.f32 1.0, %v3598_v16 }
 0xb58   :  { %v3115_v55 = vadd.f32 1.0, %v3600_v46  ;;  %v3602_v0 = vpop.eup %3601 }
 0xb59   :  { %3605 = vrcp.f32 %v3109_v11  ;;  %v3604_v36 = vpop.eup %3603  ;;  %v3122_v37 = vadd.f32 1.0, %v3602_v0 }
 0xb5a   :  { %3607 = vrcp.f32 %v3115_v55 }
 0xb5b   :  { %3609 = vrcp.f32 %v3122_v37 }
 0xb63   :  { %v3606_v17 = vpop.eup %3605 }
 0xb64   :  { %v3608_v40 = vpop.eup %3607  ;;  %v3126_v3 = vmul.f32 %v3606_v17, %v3604_v36 }
 0xb65   :  { %v3125_v56 = vmul.f32 %v3608_v40, %v2922_v10  ;;  %v3610_v26 = vpop.eup %3609 }
 0xb67   :  { %v3127_v5 = vadd.f32 %v3126_v3, %v3125_v56 }
 0xb69   :  { %3611 = vtanh.f32 %v3127_v5 }
 0xb73   :  { %v3612_v62 = vpop.eup %3611 }
 0xb74   :  { %v3129_v60 = vmul.f32 %v3612_v62, %v3610_v26 }
 0xb76   :  { %v3130_v59 = vpack.c.bf16 %v3129_v60, %v3129_v60  ;;  %v3139_v45 = vmul.f32 %v3348_v63, %v3129_v60 }
 0xb78   :  { %3131 = vst [vmem:[#allocation3 + $0x1] sm:$0x1] %v3130_v59  ;;  %v3140_v47 = vsel %vm91_vm0, %v3139_v45, 0.0 }
 0xb79   :  { %3141 = vadd.xlane.f32.xlu0 %v3140_v47 }
 0xc06   :  { %v3142_v28 = vpop.xlane.xlu0 %3141 }
 0xc07   :  { %v3150_v23 = vadd.f32 %v3349_v18, %v3142_v28 }
 0xc09   :  { %3152 = vst.msk [vmem:[%s5133_s7] sm:$0x3] %vm3151_vm2, %v3150_v23 }
 0xc0a   :  { %3157 = vsyncpa [#allocation6], 1 }

</bundles_post_ra>
